<compile_context>
chip_gen: v7x
topology: tpu7x:2x2x1
jax: 0.10.0
libtpu: 0.0.40
codegen_flags: <defaults>
</compile_context>

<pallas_src>
import functools

import jax
import jax.numpy as jnp
from jax import lax
from jax.experimental import pallas as pl
from jax.experimental.pallas import tpu as pltpu

_LN_EPS = 1e-5                 # WithBias_LayerNorm / nn.LayerNorm eps
_NORM_EPS2 = 1e-24             # (torch F.normalize eps = 1e-12)^2
_INV_SQRT2 = 0.7071067811865476
_MM_DTYPE = jnp.bfloat16       # MXU operand dtype (accumulation is always f32)
_VMEM_LIMIT = 48 * 1024 * 1024


def _gelu(x):
    # exact (erf) GELU == torch.nn.GELU(approximate='none')
    return 0.5 * x * (1.0 + lax.erf(x * _INV_SQRT2))


def _ln_cn(x, w, b):
    # LayerNorm over the channel axis of a channel-major (C, N) tile.
    mu = jnp.mean(x, axis=0, keepdims=True)
    xc = x - mu
    var = jnp.mean(xc * xc, axis=0, keepdims=True)
    return xc * lax.rsqrt(var + _LN_EPS) * w + b


# ---------------------------------------------------------------------------
# Fused attention block:
#   out = [postLN]( xn + Wo @ Attn(q = Wq @ xn, k,v = Wkv @ ykv) ),
#   xn = [preLN](x), ykv = xn (self-attention) or a pre-normed y (cross).
# ---------------------------------------------------------------------------
def _attn_kernel(*refs, num_heads, self_attn, has_ln_pre, has_ln_post,
                 branch_grid):
    it = iter(refs)
    x_ref = next(it)                                    # (C, N)
    y_ref = None if self_attn else next(it)             # (C, N) pre-normed kv src
    if has_ln_pre:
        lnq_w, lnq_b = next(it), next(it)               # (C, 1) each
    if has_ln_post:
        lnp_w, lnp_b = next(it), next(it)               # (C, 1) each
    if self_attn:
        wqkv_ref = next(it)                             # (3C, C) bf16 [Wq;Wk;Wv]
    else:
        wq_ref = next(it)                               # (C, C)  bf16
        wkv_ref = next(it)                              # (2C, C) bf16 [Wk;Wv]
    wo_ref = next(it)                                   # (C, C)  bf16
    temp_ref = next(it)                                 # (nb, num_heads) SMEM f32
    o_ref = next(it)                                    # (C, N)
    a_scr = next(it)                                    # (C, N) f32 VMEM scratch

    bi = pl.program_id(0) if branch_grid else 0

    x = x_ref[...].astype(jnp.float32)
    xn = _ln_cn(x, lnq_w[...], lnq_b[...]) if has_ln_pre else x
    xb = xn.astype(_MM_DTYPE)
    C = xn.shape[0]
    D = C // num_heads

    if self_attn:
        qkv = jnp.dot(wqkv_ref[...], xb, preferred_element_type=jnp.float32)
        q, k, v = qkv[:C], qkv[C:2 * C], qkv[2 * C:]
    else:
        yb = y_ref[...].astype(_MM_DTYPE)
        q = jnp.dot(wq_ref[...], xb, preferred_element_type=jnp.float32)
        kv = jnp.dot(wkv_ref[...], yb, preferred_element_type=jnp.float32)
        k, v = kv[:C], kv[C:]

    for h in range(num_heads):                           # heads batched per call
        sl = slice(h * D, (h + 1) * D)
        qh, kh, vh = q[sl], k[sl], v[sl]                 # (D, N) f32
        t = temp_ref[bi, h]                              # SMEM scalar temperature
        # torch F.normalize(dim=-1): x * rsqrt(max(sum(x^2), eps^2)).
        # The q-side rsqrt and the temperature are folded into the tiny (D,D)
        # logits (row scale); k keeps the pre-matmul scale (column scale of the
        # logits would need a (1,D) relayout for marginal gain).
        nq = jnp.sum(qh * qh, axis=-1, keepdims=True)
        nk = jnp.sum(kh * kh, axis=-1, keepdims=True)
        kn = kh * lax.rsqrt(jnp.maximum(nk, _NORM_EPS2))
        raw = lax.dot_general(qh.astype(_MM_DTYPE), kn.astype(_MM_DTYPE),
                              (((1,), (1,)), ((), ())),
                              preferred_element_type=jnp.float32)      # (D, D)
        logits = raw * (t * lax.rsqrt(jnp.maximum(nq, _NORM_EPS2)))
        logits = logits - jnp.max(logits, axis=-1, keepdims=True)
        p = jnp.exp(logits)
        attn = p / jnp.sum(p, axis=-1, keepdims=True)    # exact divide, (D,D) only
        a_scr[sl, :] = jnp.dot(attn.astype(_MM_DTYPE), vh.astype(_MM_DTYPE),
                               preferred_element_type=jnp.float32)

    proj = jnp.dot(wo_ref[...], a_scr[...].astype(_MM_DTYPE),
                   preferred_element_type=jnp.float32)
    out = xn + proj                                      # fused residual
    if has_ln_post:
        out = _ln_cn(out, lnp_w[...], lnp_b[...])
    o_ref[...] = out.astype(o_ref.dtype)


def _self_attn_pair(x_pair, pre_w, pre_b, post_w, post_b, wqkv, wo, temps, *,
                    num_heads):
    """Merged image/event self-attention. x_pair: (2, B, C, N)."""
    NB, B, C, N = x_pair.shape
    kern = functools.partial(_attn_kernel, num_heads=num_heads, self_attn=True,
                             has_ln_pre=True, has_ln_post=True, branch_grid=True)
    act_spec = pl.BlockSpec((None, None, C, N), lambda br, b: (br, b, 0, 0))
    vec_spec = pl.BlockSpec((None, C, 1), lambda br, b: (br, 0, 0))
    return pl.pallas_call(
        kern,
        out_shape=jax.ShapeDtypeStruct((NB, B, C, N), x_pair.dtype),
        grid=(NB, B),
        in_specs=[act_spec, vec_spec, vec_spec, vec_spec, vec_spec,
                  pl.BlockSpec((None, 3 * C, C), lambda br, b: (br, 0, 0)),
                  pl.BlockSpec((None, C, C), lambda br, b: (br, 0, 0)),
                  pl.BlockSpec(memory_space=pltpu.MemorySpace.SMEM)],
        out_specs=act_spec,
        scratch_shapes=[pltpu.VMEM((C, N), jnp.float32)],
        compiler_params=pltpu.CompilerParams(
            dimension_semantics=("parallel", "parallel"),
            vmem_limit_bytes=_VMEM_LIMIT),
    )(x_pair, pre_w, pre_b, post_w, post_b, wqkv, wo, temps)


def _cross_attn(x, y, attn_p, *, num_heads, ln_pre=None, ln_post=None):
    """Cross-attention: x, y are (B, C, N); k, v come from y."""
    B, C, N = x.shape
    act_spec = pl.BlockSpec((None, C, N), lambda b: (b, 0, 0))
    vec_spec = pl.BlockSpec((C, 1), lambda b: (0, 0))
    args = [x, y]
    specs = [act_spec, act_spec]
    for ln in (ln_pre, ln_post):
        if ln is not None:
            args += [ln["w"].reshape(C, 1), ln["b"].reshape(C, 1)]
            specs += [vec_spec, vec_spec]
    args += [attn_p["wq"].astype(_MM_DTYPE), attn_p["wkv"].astype(_MM_DTYPE),
             attn_p["wo"].astype(_MM_DTYPE), attn_p["temp"].reshape(1, num_heads)]
    specs += [pl.BlockSpec((C, C), lambda b: (0, 0)),
              pl.BlockSpec((2 * C, C), lambda b: (0, 0)),
              pl.BlockSpec((C, C), lambda b: (0, 0)),
              pl.BlockSpec(memory_space=pltpu.MemorySpace.SMEM)]
    kern = functools.partial(_attn_kernel, num_heads=num_heads, self_attn=False,
                             has_ln_pre=ln_pre is not None,
                             has_ln_post=ln_post is not None, branch_grid=False)
    return pl.pallas_call(
        kern,
        out_shape=jax.ShapeDtypeStruct((B, C, N), x.dtype),
        grid=(B,),
        in_specs=specs,
        out_specs=act_spec,
        scratch_shapes=[pltpu.VMEM((C, N), jnp.float32)],
        compiler_params=pltpu.CompilerParams(
            dimension_semantics=("parallel",),
            vmem_limit_bytes=_VMEM_LIMIT),
    )(*args)


# ---------------------------------------------------------------------------
# Fused MLP block:
#   out = xn + W2 @ GELU(dwconv3x3(GELU(W1 @ xn + b1)) + bd) + b2,  xn = LN(x)
# The depthwise conv works on the flattened (hidden, N=H*W) activation: each
# 3x3 tap is a static lane roll (pltpu.roll) + a boundary mask derived from
# precomputed row/col indices — no transposes, no halo scratch.
# ---------------------------------------------------------------------------
def _mlp_kernel(x_ref, idx_ref, lnw_ref, lnb_ref, w1_ref, b1_ref, wd_ref,
                bd_ref, w2_ref, b2_ref, o_ref, *, H, W):
    x = x_ref[...].astype(jnp.float32)                            # (C, N)
    xn = _ln_cn(x, lnw_ref[...], lnb_ref[...])

    h1 = jnp.dot(w1_ref[...], xn.astype(_MM_DTYPE),
                 preferred_element_type=jnp.float32) + b1_ref[...]
    h1 = _gelu(h1)                                                # (hidden, N)
    N = h1.shape[1]

    idx = idx_ref[...]                                            # (2, N) f32
    rows, cols = idx[0:1, :], idx[1:2, :]                         # (1, N) each
    wd = wd_ref[...]                                              # (hidden, 9)

    acc = jnp.zeros_like(h1)
    for ky in range(3):
        dy = ky - 1
        for kx in range(3):
            dx = kx - 1
            s = dy * W + dx                                       # flattened tap shift
            tap = h1 if s == 0 else pltpu.roll(h1, (-s) % N, axis=1)
            valid = ((rows >= -dy) & (rows <= (H - 1) - dy)
                     & (cols >= -dx) & (cols <= (W - 1) - dx))
            acc = acc + (jnp.where(valid, tap, 0.0)
                         * wd[:, ky * 3 + kx: ky * 3 + kx + 1])
    acc = _gelu(acc + bd_ref[...])

    out = jnp.dot(w2_ref[...], acc.astype(_MM_DTYPE),
                  preferred_element_type=jnp.float32) + b2_ref[...]
    o_ref[...] = (xn + out).astype(o_ref.dtype)


def _mlp_pair(x_pair, ln_w, ln_b, w1, b1, wd, bd, w2, b2, idx, *, H, W):
    """Merged image/event MLP. x_pair: (2, B, C, N)."""
    NB, B, C, N = x_pair.shape
    hidden = w1.shape[1]
    kern = functools.partial(_mlp_kernel, H=H, W=W)
    act_spec = pl.BlockSpec((None, None, C, N), lambda br, b: (br, b, 0, 0))
    return pl.pallas_call(
        kern,
        out_shape=jax.ShapeDtypeStruct((NB, B, C, N), x_pair.dtype),
        grid=(NB, B),
        in_specs=[
            act_spec,
            pl.BlockSpec((2, N), lambda br, b: (0, 0)),
            pl.BlockSpec((None, C, 1), lambda br, b: (br, 0, 0)),
            pl.BlockSpec((None, C, 1), lambda br, b: (br, 0, 0)),
            pl.BlockSpec((None, hidden, C), lambda br, b: (br, 0, 0)),
            pl.BlockSpec((None, hidden, 1), lambda br, b: (br, 0, 0)),
            pl.BlockSpec((None, hidden, 9), lambda br, b: (br, 0, 0)),
            pl.BlockSpec((None, hidden, 1), lambda br, b: (br, 0, 0)),
            pl.BlockSpec((None, C, hidden), lambda br, b: (br, 0, 0)),
            pl.BlockSpec((None, C, 1), lambda br, b: (br, 0, 0)),
        ],
        out_specs=act_spec,
        compiler_params=pltpu.CompilerParams(
            dimension_semantics=("parallel", "parallel"),
            vmem_limit_bytes=_VMEM_LIMIT),
    )(x_pair, idx, ln_w, ln_b, w1, b1, wd, bd, w2, b2)


# ---------------------------------------------------------------------------
# Module-level composition (4 fused pallas_calls)
# ---------------------------------------------------------------------------
def dual_channel_block(image, event, params, num_heads):
    B, C, H, W = image.shape
    N = H * W
    p = params
    img = image.reshape(B, C, N)          # NCHW -> channel-major tokens (free)
    evt = event.reshape(B, C, N)

    def stack_ln(a, b):
        return (jnp.stack([a["w"], b["w"]]).reshape(2, C, 1),
                jnp.stack([a["b"], b["b"]]).reshape(2, C, 1))

    # ---- stage 1: merged self-attention (branch axis: 0=image, 1=event) ----
    # image: LN1 -> attn -> +res -> LN2 ; event: LN1 -> attn -> +res -> LN2
    # (event_norm2 folded as post-LN so the branches are symmetric.)
    pre_w, pre_b = stack_ln(p["image_norm1"], p["event_norm1"])
    post_w, post_b = stack_ln(p["image_norm2"], p["event_norm2"])
    wqkv = jnp.stack([
        jnp.concatenate([p["attn_image"]["wq"], p["attn_image"]["wkv"]], axis=0),
        jnp.concatenate([p["attn_event"]["wq"], p["attn_event"]["wkv"]], axis=0),
    ]).astype(_MM_DTYPE)
    wo = jnp.stack([p["attn_image"]["wo"],
                    p["attn_event"]["wo"]]).astype(_MM_DTYPE)
    temps = jnp.stack([p["attn_image"]["temp"], p["attn_event"]["temp"]])

    pair = _self_attn_pair(jnp.stack([img, evt]), pre_w, pre_b, post_w, post_b,
                           wqkv, wo, temps, num_heads=num_heads)
    img, evt = pair[0], pair[1]

    # ---- stages 2/3: cross attention (sequential data dependency) ----------
    evt = _cross_attn(evt, img, p["cross_attn_event"], num_heads=num_heads,
                      ln_post=p["event_norm3"])
    img = _cross_attn(img, evt, p["cross_attn_img"], num_heads=num_heads)

    # ---- stage 4: merged MLP (LN -> lin1+GELU -> dwconv3x3+GELU -> lin2) ---
    hidden = p["image_ffn"]["w1"].shape[0]
    ln_w, ln_b = stack_ln(p["image_norm3"], p["event_norm4"])
    w1 = jnp.stack([p["image_ffn"]["w1"],
                    p["event_ffn"]["w1"]]).astype(_MM_DTYPE)
    b1 = jnp.stack([p["image_ffn"]["b1"],
                    p["event_ffn"]["b1"]]).reshape(2, hidden, 1)
    wd = jnp.stack([p["image_ffn"]["wd"].reshape(9, hidden).T,
                    p["event_ffn"]["wd"].reshape(9, hidden).T])
    bd = jnp.stack([p["image_ffn"]["bd"],
                    p["event_ffn"]["bd"]]).reshape(2, hidden, 1)
    w2 = jnp.stack([p["image_ffn"]["w2"],
                    p["event_ffn"]["w2"]]).astype(_MM_DTYPE)
    b2 = jnp.stack([p["image_ffn"]["b2"],
                    p["event_ffn"]["b2"]]).reshape(2, C, 1)
    n_idx = jnp.arange(N, dtype=jnp.int32)
    idx = jnp.stack([n_idx // W, n_idx % W]).astype(jnp.float32)   # (2, N)

    pair = _mlp_pair(jnp.stack([img, evt]), ln_w, ln_b, w1, b1, wd, bd, w2, b2,
                     idx, H=H, W=W)
    img, evt = pair[0], pair[1]

    return img.reshape(B, C, H, W), evt.reshape(B, C, H, W)


# ---------------------------------------------------------------------------
# Deterministic synthetic parameters
# ---------------------------------------------------------------------------
def init_params(key, dim, num_heads, hidden):
    keys = iter(jax.random.split(key, 64))

    def rnd(shape, scale=0.05):
        return scale * jax.random.normal(next(keys), shape, dtype=jnp.float32)

    def ln_p():
        return {"w": 1.0 + rnd((dim,), 0.02), "b": rnd((dim,), 0.02)}

    def attn_p():
        # 1x1-conv weights stored (Cout, Cin) so y = W @ x in channel-major;
        # k and v projections concatenated into a single (2C, C) matmul.
        return {"temp": 1.0 + rnd((num_heads,), 0.1),
                "wq": rnd((dim, dim)),
                "wkv": rnd((2 * dim, dim)),
                "wo": rnd((dim, dim))}

    def mlp_p():
        return {"w1": rnd((hidden, dim)), "b1": rnd((hidden,), 0.02),
                "wd": rnd((3, 3, hidden)), "bd": rnd((hidden,), 0.02),
                "w2": rnd((dim, hidden)), "b2": rnd((dim,), 0.02)}

    return {
        "image_norm1": ln_p(), "event_norm1": ln_p(),
        "attn_image": attn_p(), "attn_event": attn_p(),
        "image_norm2": ln_p(), "event_norm2": ln_p(),
        "cross_attn_img": attn_p(), "cross_attn_event": attn_p(),
        "event_norm3": ln_p(), "image_norm3": ln_p(), "event_norm4": ln_p(),
        "image_ffn": mlp_p(), "event_ffn": mlp_p(),
    }


# ---------------------------------------------------------------------------
# Pure-JAX reference (token/channels-last layout, mirrors the PyTorch module)
# ---------------------------------------------------------------------------
def _reference(image, event, params, num_heads):
    B, C, H, W = image.shape
    N = H * W

    def to_tok(t):
        return t.reshape(B, C, N).transpose(0, 2, 1)          # (B, N, C)

    def ln(x, p):
        mu = x.mean(-1, keepdims=True)
        var = ((x - mu) ** 2).mean(-1, keepdims=True)
        return (x - mu) / jnp.sqrt(var + _LN_EPS) * p["w"] + p["b"]

    def attn(x_tok, y_tok, p):
        q = jnp.einsum("bnc,dc->bnd", x_tok, p["wq"])
        kv = jnp.einsum("bnc,dc->bnd", y_tok, p["wkv"])
        k, v = kv[..., :C], kv[..., C:]

        def split(t):
            return t.transpose(0, 2, 1).reshape(B, num_heads, C // num_heads, N)

        qh, kh, vh = split(q), split(k), split(v)
        qn = qh / jnp.maximum(jnp.sqrt((qh * qh).sum(-1, keepdims=True)), 1e-12)
        kn = kh / jnp.maximum(jnp.sqrt((kh * kh).sum(-1, keepdims=True)), 1e-12)
        logits = jnp.einsum("bhdn,bhen->bhde", qn, kn)
        logits = logits * p["temp"].reshape(1, num_heads, 1, 1)
        a = jax.nn.softmax(logits, axis=-1)
        o = jnp.einsum("bhde,bhen->bhdn", a, vh)
        o = o.reshape(B, C, N).transpose(0, 2, 1)
        return jnp.einsum("bnc,dc->bnd", o, p["wo"])

    def mlp(x_tok, p):
        h1 = jnp.einsum("bnc,hc->bnh", x_tok, p["w1"]) + p["b1"]
        h1 = jax.nn.gelu(h1, approximate=False)
        hs = h1.reshape(B, H, W, -1)
        hp = jnp.pad(hs, ((0, 0), (1, 1), (1, 1), (0, 0)))
        acc = sum(hp[:, dy:dy + H, dx:dx + W, :] * p["wd"][dy, dx]
                  for dy in range(3) for dx in range(3)) + p["bd"]
        acc = jax.nn.gelu(acc, approximate=False).reshape(B, N, -1)
        return jnp.einsum("bnh,ch->bnc", acc, p["w2"]) + p["b2"]

    p = params
    img, evt = to_tok(image), to_tok(event)
    img = ln(img, p["image_norm1"]); evt = ln(evt, p["event_norm1"])
    img = img + attn(img, img, p["attn_image"])
    evt = evt + attn(evt, evt, p["attn_event"])
    img = ln(img, p["image_norm2"]); evt = ln(evt, p["event_norm2"])
    evt = evt + attn(evt, img, p["cross_attn_event"])
    evt = ln(evt, p["event_norm3"])
    img = img + attn(img, evt, p["cross_attn_img"])
    img = ln(img, p["image_norm3"]); img = img + mlp(img, p["image_ffn"])
    evt = ln(evt, p["event_norm4"]); evt = evt + mlp(evt, p["event_ffn"])
    back = lambda t: t.transpose(0, 2, 1).reshape(B, C, H, W)
    return back(img), back(evt)


if __name__ == "__main__":
    B, C, H, W = 2, 32, 8, 8        # dim=32, h=w=8 (small but structure-faithful)
    num_heads = 4
    hidden = 2 * C                   # ffn_expansion_factor = 2
    key = jax.random.PRNGKey(0)
    kimg, kevt, kpar = jax.random.split(key, 3)
    image = jax.random.normal(kimg, (B, C, H, W), jnp.float32)
    event = jax.random.normal(kevt, (B, C, H, W), jnp.float32)
    params = init_params(kpar, C, num_heads, hidden)

    fwd = jax.jit(functools.partial(dual_channel_block, num_heads=num_heads))
    out_img, out_evt = fwd(image, event, params)
    jax.block_until_ready((out_img, out_evt))

    assert out_img.shape == (B, C, H, W) and out_evt.shape == (B, C, H, W)
    assert bool(jnp.all(jnp.isfinite(out_img))) and bool(jnp.all(jnp.isfinite(out_evt)))

    # cross-check vs a pure-JAX reference; tolerance covers bf16 MXU operands.
    ref_img, ref_evt = _reference(image, event, params, num_heads)
    err = max(float(jnp.max(jnp.abs(out_img - ref_img))),
              float(jnp.max(jnp.abs(out_evt - ref_evt))))
    assert err < 1e-1, f"mismatch vs reference: {err}"
    print("KERNEL_OK")
</pallas_src>

<mosaic_0001>
module attributes {stable_mosaic.version = 11 : i64} {
  func.func @_attn_kernel(%arg0: i32, %arg1: memref<1x32x64xf32, #tpu.memory_space<vmem>>, %arg2: memref<1x32x64xf32, #tpu.memory_space<vmem>>, %arg3: memref<32x32xbf16, #tpu.memory_space<vmem>>, %arg4: memref<64x32xbf16, #tpu.memory_space<vmem>>, %arg5: memref<32x32xbf16, #tpu.memory_space<vmem>>, %arg6: memref<1x4xf32, #tpu.memory_space<smem>>, %arg7: memref<1x32x64xf32, #tpu.memory_space<vmem>>, %arg8: memref<32x64xf32, #tpu.memory_space<vmem>>) attributes {dimension_semantics = [#tpu.dimension_semantics<parallel>], iteration_bounds = array<i64: 2>, scalar_prefetch = 0 : i64, scratch_operands = 1 : i64, tpu.core_type = #tpu.core_type<tc>, window_params = [{transform_indices = @transform_0, window_bounds = array<i64: 1, 32, 64>}, {transform_indices = @transform_1, window_bounds = array<i64: 1, 32, 64>}, {pipeline_mode = #tpu.pipeline_mode<synchronous>, transform_indices = @transform_2, window_bounds = array<i64: 32, 32>}, {pipeline_mode = #tpu.pipeline_mode<synchronous>, transform_indices = @transform_3, window_bounds = array<i64: 64, 32>}, {pipeline_mode = #tpu.pipeline_mode<synchronous>, transform_indices = @transform_4, window_bounds = array<i64: 32, 32>}, {transform_indices = @transform_5, window_bounds = array<i64: 1, 4>}, {transform_indices = @transform_6, window_bounds = array<i64: 1, 32, 64>}]} {
    %c0 = arith.constant 0 : index
    %c0_0 = arith.constant 0 : index
    %c0_1 = arith.constant 0 : index
    %0 = vector.load %arg1[%c0, %c0_0, %c0_1] : memref<1x32x64xf32, #tpu.memory_space<vmem>>, vector<1x32x64xf32>
    %1 = vector.shape_cast %0 : vector<1x32x64xf32> to vector<32x64xf32>
    %2 = arith.truncf %1 : vector<32x64xf32> to vector<32x64xbf16>
    %c0_2 = arith.constant 0 : index
    %c0_3 = arith.constant 0 : index
    %c0_4 = arith.constant 0 : index
    %3 = vector.load %arg2[%c0_2, %c0_3, %c0_4] : memref<1x32x64xf32, #tpu.memory_space<vmem>>, vector<1x32x64xf32>
    %4 = vector.shape_cast %3 : vector<1x32x64xf32> to vector<32x64xf32>
    %5 = arith.truncf %4 : vector<32x64xf32> to vector<32x64xbf16>
    %c0_5 = arith.constant 0 : index
    %c0_6 = arith.constant 0 : index
    %6 = vector.load %arg3[%c0_5, %c0_6] : memref<32x32xbf16, #tpu.memory_space<vmem>>, vector<32x32xbf16>
    %cst = arith.constant dense<0.000000e+00> : vector<32x64xf32>
    %7 = tpu.matmul %6, %2, %cst {dimension_numbers = #tpu.dot_dimension_numbers<[1], [0], [0], [1], [0, 0, 1, 1], [], []>} : vector<32x32xbf16>, vector<32x64xbf16>, vector<32x64xf32> -> vector<32x64xf32>
    %c0_7 = arith.constant 0 : index
    %c0_8 = arith.constant 0 : index
    %8 = vector.load %arg4[%c0_7, %c0_8] : memref<64x32xbf16, #tpu.memory_space<vmem>>, vector<64x32xbf16>
    %cst_9 = arith.constant dense<0.000000e+00> : vector<64x64xf32>
    %9 = tpu.matmul %8, %5, %cst_9 {dimension_numbers = #tpu.dot_dimension_numbers<[1], [0], [0], [1], [0, 0, 1, 1], [], []>} : vector<64x32xbf16>, vector<32x64xbf16>, vector<64x64xf32> -> vector<64x64xf32>
    %10 = vector.extract_strided_slice %9 {offsets = [0, 0], sizes = [32, 64], strides = [1, 1]} : vector<64x64xf32> to vector<32x64xf32>
    %11 = vector.extract_strided_slice %9 {offsets = [32, 0], sizes = [32, 64], strides = [1, 1]} : vector<64x64xf32> to vector<32x64xf32>
    %12 = vector.extract_strided_slice %7 {offsets = [0, 0], sizes = [8, 64], strides = [1, 1]} : vector<32x64xf32> to vector<8x64xf32>
    %13 = vector.extract_strided_slice %10 {offsets = [0, 0], sizes = [8, 64], strides = [1, 1]} : vector<32x64xf32> to vector<8x64xf32>
    %14 = vector.extract_strided_slice %11 {offsets = [0, 0], sizes = [8, 64], strides = [1, 1]} : vector<32x64xf32> to vector<8x64xf32>
    %c0_10 = arith.constant 0 : index
    %c0_11 = arith.constant 0 : index
    %15 = memref.load %arg6[%c0_10, %c0_11] : memref<1x4xf32, #tpu.memory_space<smem>>
    %16 = arith.mulf %12, %12 : vector<8x64xf32>
    %cst_12 = arith.constant dense<0.000000e+00> : vector<8xf32>
    %17 = vector.multi_reduction <add>, %16, %cst_12 [1] : vector<8x64xf32> to vector<8xf32>
    %18 = vector.shape_cast %17 : vector<8xf32> to vector<8x1xf32>
    %19 = arith.mulf %13, %13 : vector<8x64xf32>
    %cst_13 = arith.constant dense<0.000000e+00> : vector<8xf32>
    %20 = vector.multi_reduction <add>, %19, %cst_13 [1] : vector<8x64xf32> to vector<8xf32>
    %21 = vector.shape_cast %20 : vector<8xf32> to vector<8x1xf32>
    %cst_14 = arith.constant 1.000000e-24 : f32
    %22 = vector.broadcast %cst_14 : f32 to vector<8x1xf32>
    %23 = arith.maximumf %21, %22 : vector<8x1xf32>
    %24 = math.rsqrt %23 : vector<8x1xf32>
    %25 = vector.broadcast %24 : vector<8x1xf32> to vector<8x64xf32>
    %26 = arith.mulf %13, %25 : vector<8x64xf32>
    %27 = arith.truncf %12 : vector<8x64xf32> to vector<8x64xbf16>
    %28 = arith.truncf %26 : vector<8x64xf32> to vector<8x64xbf16>
    %cst_15 = arith.constant dense<0.000000e+00> : vector<8x8xf32>
    %29 = tpu.matmul %27, %28, %cst_15 {dimension_numbers = #tpu.dot_dimension_numbers<[1], [1], [0], [0], [0, 0, 1, 0], [], []>} : vector<8x64xbf16>, vector<8x64xbf16>, vector<8x8xf32> -> vector<8x8xf32>
    %cst_16 = arith.constant 1.000000e-24 : f32
    %30 = vector.broadcast %cst_16 : f32 to vector<8x1xf32>
    %31 = arith.maximumf %18, %30 : vector<8x1xf32>
    %32 = math.rsqrt %31 : vector<8x1xf32>
    %33 = vector.broadcast %15 : f32 to vector<8x1xf32>
    %34 = arith.mulf %33, %32 : vector<8x1xf32>
    %35 = vector.broadcast %34 : vector<8x1xf32> to vector<8x8xf32>
    %36 = arith.mulf %29, %35 : vector<8x8xf32>
    %cst_17 = arith.constant dense<0xFF800000> : vector<8xf32>
    %37 = vector.multi_reduction <maximumf>, %36, %cst_17 [1] : vector<8x8xf32> to vector<8xf32>
    %38 = vector.shape_cast %37 : vector<8xf32> to vector<8x1xf32>
    %39 = vector.broadcast %38 : vector<8x1xf32> to vector<8x8xf32>
    %40 = arith.subf %36, %39 : vector<8x8xf32>
    %41 = math.exp %40 : vector<8x8xf32>
    %cst_18 = arith.constant dense<0.000000e+00> : vector<8xf32>
    %42 = vector.multi_reduction <add>, %41, %cst_18 [1] : vector<8x8xf32> to vector<8xf32>
    %43 = vector.shape_cast %42 : vector<8xf32> to vector<8x1xf32>
    %44 = vector.broadcast %43 : vector<8x1xf32> to vector<8x8xf32>
    %45 = arith.divf %41, %44 : vector<8x8xf32>
    %46 = arith.truncf %45 : vector<8x8xf32> to vector<8x8xbf16>
    %47 = arith.truncf %14 : vector<8x64xf32> to vector<8x64xbf16>
    %cst_19 = arith.constant dense<0.000000e+00> : vector<8x64xf32>
    %48 = tpu.matmul %46, %47, %cst_19 {dimension_numbers = #tpu.dot_dimension_numbers<[1], [0], [0], [1], [0, 0, 1, 1], [], []>} : vector<8x8xbf16>, vector<8x64xbf16>, vector<8x64xf32> -> vector<8x64xf32>
    %c0_20 = arith.constant 0 : index
    %c0_21 = arith.constant 0 : index
    %49 = vector.load %arg8[%c0_20, %c0_21] : memref<32x64xf32, #tpu.memory_space<vmem>>, vector<8x64xf32>
    tpu.vector_store %arg8[%c0_20, %c0_21], %48 {strides = array<i32>} : memref<32x64xf32, #tpu.memory_space<vmem>>, vector<8x64xf32>,
    %50 = vector.extract_strided_slice %7 {offsets = [8, 0], sizes = [8, 64], strides = [1, 1]} : vector<32x64xf32> to vector<8x64xf32>
    %51 = vector.extract_strided_slice %10 {offsets = [8, 0], sizes = [8, 64], strides = [1, 1]} : vector<32x64xf32> to vector<8x64xf32>
    %52 = vector.extract_strided_slice %11 {offsets = [8, 0], sizes = [8, 64], strides = [1, 1]} : vector<32x64xf32> to vector<8x64xf32>
    %c0_22 = arith.constant 0 : index
    %c1 = arith.constant 1 : index
    %53 = memref.load %arg6[%c0_22, %c1] : memref<1x4xf32, #tpu.memory_space<smem>>
    %54 = arith.mulf %50, %50 : vector<8x64xf32>
    %cst_23 = arith.constant dense<0.000000e+00> : vector<8xf32>
    %55 = vector.multi_reduction <add>, %54, %cst_23 [1] : vector<8x64xf32> to vector<8xf32>
    %56 = vector.shape_cast %55 : vector<8xf32> to vector<8x1xf32>
    %57 = arith.mulf %51, %51 : vector<8x64xf32>
    %cst_24 = arith.constant dense<0.000000e+00> : vector<8xf32>
    %58 = vector.multi_reduction <add>, %57, %cst_24 [1] : vector<8x64xf32> to vector<8xf32>
    %59 = vector.shape_cast %58 : vector<8xf32> to vector<8x1xf32>
    %cst_25 = arith.constant 1.000000e-24 : f32
    %60 = vector.broadcast %cst_25 : f32 to vector<8x1xf32>
    %61 = arith.maximumf %59, %60 : vector<8x1xf32>
    %62 = math.rsqrt %61 : vector<8x1xf32>
    %63 = vector.broadcast %62 : vector<8x1xf32> to vector<8x64xf32>
    %64 = arith.mulf %51, %63 : vector<8x64xf32>
    %65 = arith.truncf %50 : vector<8x64xf32> to vector<8x64xbf16>
    %66 = arith.truncf %64 : vector<8x64xf32> to vector<8x64xbf16>
    %cst_26 = arith.constant dense<0.000000e+00> : vector<8x8xf32>
    %67 = tpu.matmul %65, %66, %cst_26 {dimension_numbers = #tpu.dot_dimension_numbers<[1], [1], [0], [0], [0, 0, 1, 0], [], []>} : vector<8x64xbf16>, vector<8x64xbf16>, vector<8x8xf32> -> vector<8x8xf32>
    %cst_27 = arith.constant 1.000000e-24 : f32
    %68 = vector.broadcast %cst_27 : f32 to vector<8x1xf32>
    %69 = arith.maximumf %56, %68 : vector<8x1xf32>
    %70 = math.rsqrt %69 : vector<8x1xf32>
    %71 = vector.broadcast %53 : f32 to vector<8x1xf32>
    %72 = arith.mulf %71, %70 : vector<8x1xf32>
    %73 = vector.broadcast %72 : vector<8x1xf32> to vector<8x8xf32>
    %74 = arith.mulf %67, %73 : vector<8x8xf32>
    %cst_28 = arith.constant dense<0xFF800000> : vector<8xf32>
    %75 = vector.multi_reduction <maximumf>, %74, %cst_28 [1] : vector<8x8xf32> to vector<8xf32>
    %76 = vector.shape_cast %75 : vector<8xf32> to vector<8x1xf32>
    %77 = vector.broadcast %76 : vector<8x1xf32> to vector<8x8xf32>
    %78 = arith.subf %74, %77 : vector<8x8xf32>
    %79 = math.exp %78 : vector<8x8xf32>
    %cst_29 = arith.constant dense<0.000000e+00> : vector<8xf32>
    %80 = vector.multi_reduction <add>, %79, %cst_29 [1] : vector<8x8xf32> to vector<8xf32>
    %81 = vector.shape_cast %80 : vector<8xf32> to vector<8x1xf32>
    %82 = vector.broadcast %81 : vector<8x1xf32> to vector<8x8xf32>
    %83 = arith.divf %79, %82 : vector<8x8xf32>
    %84 = arith.truncf %83 : vector<8x8xf32> to vector<8x8xbf16>
    %85 = arith.truncf %52 : vector<8x64xf32> to vector<8x64xbf16>
    %cst_30 = arith.constant dense<0.000000e+00> : vector<8x64xf32>
    %86 = tpu.matmul %84, %85, %cst_30 {dimension_numbers = #tpu.dot_dimension_numbers<[1], [0], [0], [1], [0, 0, 1, 1], [], []>} : vector<8x8xbf16>, vector<8x64xbf16>, vector<8x64xf32> -> vector<8x64xf32>
    %c8 = arith.constant 8 : index
    %c0_31 = arith.constant 0 : index
    %87 = vector.load %arg8[%c8, %c0_31] : memref<32x64xf32, #tpu.memory_space<vmem>>, vector<8x64xf32>
    tpu.vector_store %arg8[%c8, %c0_31], %86 {strides = array<i32>} : memref<32x64xf32, #tpu.memory_space<vmem>>, vector<8x64xf32>,
    %88 = vector.extract_strided_slice %7 {offsets = [16, 0], sizes = [8, 64], strides = [1, 1]} : vector<32x64xf32> to vector<8x64xf32>
    %89 = vector.extract_strided_slice %10 {offsets = [16, 0], sizes = [8, 64], strides = [1, 1]} : vector<32x64xf32> to vector<8x64xf32>
    %90 = vector.extract_strided_slice %11 {offsets = [16, 0], sizes = [8, 64], strides = [1, 1]} : vector<32x64xf32> to vector<8x64xf32>
    %c0_32 = arith.constant 0 : index
    %c2 = arith.constant 2 : index
    %91 = memref.load %arg6[%c0_32, %c2] : memref<1x4xf32, #tpu.memory_space<smem>>
    %92 = arith.mulf %88, %88 : vector<8x64xf32>
    %cst_33 = arith.constant dense<0.000000e+00> : vector<8xf32>
    %93 = vector.multi_reduction <add>, %92, %cst_33 [1] : vector<8x64xf32> to vector<8xf32>
    %94 = vector.shape_cast %93 : vector<8xf32> to vector<8x1xf32>
    %95 = arith.mulf %89, %89 : vector<8x64xf32>
    %cst_34 = arith.constant dense<0.000000e+00> : vector<8xf32>
    %96 = vector.multi_reduction <add>, %95, %cst_34 [1] : vector<8x64xf32> to vector<8xf32>
    %97 = vector.shape_cast %96 : vector<8xf32> to vector<8x1xf32>
    %cst_35 = arith.constant 1.000000e-24 : f32
    %98 = vector.broadcast %cst_35 : f32 to vector<8x1xf32>
    %99 = arith.maximumf %97, %98 : vector<8x1xf32>
    %100 = math.rsqrt %99 : vector<8x1xf32>
    %101 = vector.broadcast %100 : vector<8x1xf32> to vector<8x64xf32>
    %102 = arith.mulf %89, %101 : vector<8x64xf32>
    %103 = arith.truncf %88 : vector<8x64xf32> to vector<8x64xbf16>
    %104 = arith.truncf %102 : vector<8x64xf32> to vector<8x64xbf16>
    %cst_36 = arith.constant dense<0.000000e+00> : vector<8x8xf32>
    %105 = tpu.matmul %103, %104, %cst_36 {dimension_numbers = #tpu.dot_dimension_numbers<[1], [1], [0], [0], [0, 0, 1, 0], [], []>} : vector<8x64xbf16>, vector<8x64xbf16>, vector<8x8xf32> -> vector<8x8xf32>
    %cst_37 = arith.constant 1.000000e-24 : f32
    %106 = vector.broadcast %cst_37 : f32 to vector<8x1xf32>
    %107 = arith.maximumf %94, %106 : vector<8x1xf32>
    %108 = math.rsqrt %107 : vector<8x1xf32>
    %109 = vector.broadcast %91 : f32 to vector<8x1xf32>
    %110 = arith.mulf %109, %108 : vector<8x1xf32>
    %111 = vector.broadcast %110 : vector<8x1xf32> to vector<8x8xf32>
    %112 = arith.mulf %105, %111 : vector<8x8xf32>
    %cst_38 = arith.constant dense<0xFF800000> : vector<8xf32>
    %113 = vector.multi_reduction <maximumf>, %112, %cst_38 [1] : vector<8x8xf32> to vector<8xf32>
    %114 = vector.shape_cast %113 : vector<8xf32> to vector<8x1xf32>
    %115 = vector.broadcast %114 : vector<8x1xf32> to vector<8x8xf32>
    %116 = arith.subf %112, %115 : vector<8x8xf32>
    %117 = math.exp %116 : vector<8x8xf32>
    %cst_39 = arith.constant dense<0.000000e+00> : vector<8xf32>
    %118 = vector.multi_reduction <add>, %117, %cst_39 [1] : vector<8x8xf32> to vector<8xf32>
    %119 = vector.shape_cast %118 : vector<8xf32> to vector<8x1xf32>
    %120 = vector.broadcast %119 : vector<8x1xf32> to vector<8x8xf32>
    %121 = arith.divf %117, %120 : vector<8x8xf32>
    %122 = arith.truncf %121 : vector<8x8xf32> to vector<8x8xbf16>
    %123 = arith.truncf %90 : vector<8x64xf32> to vector<8x64xbf16>
    %cst_40 = arith.constant dense<0.000000e+00> : vector<8x64xf32>
    %124 = tpu.matmul %122, %123, %cst_40 {dimension_numbers = #tpu.dot_dimension_numbers<[1], [0], [0], [1], [0, 0, 1, 1], [], []>} : vector<8x8xbf16>, vector<8x64xbf16>, vector<8x64xf32> -> vector<8x64xf32>
    %c16 = arith.constant 16 : index
    %c0_41 = arith.constant 0 : index
    %125 = vector.load %arg8[%c16, %c0_41] : memref<32x64xf32, #tpu.memory_space<vmem>>, vector<8x64xf32>
    tpu.vector_store %arg8[%c16, %c0_41], %124 {strides = array<i32>} : memref<32x64xf32, #tpu.memory_space<vmem>>, vector<8x64xf32>,
    %126 = vector.extract_strided_slice %7 {offsets = [24, 0], sizes = [8, 64], strides = [1, 1]} : vector<32x64xf32> to vector<8x64xf32>
    %127 = vector.extract_strided_slice %10 {offsets = [24, 0], sizes = [8, 64], strides = [1, 1]} : vector<32x64xf32> to vector<8x64xf32>
    %128 = vector.extract_strided_slice %11 {offsets = [24, 0], sizes = [8, 64], strides = [1, 1]} : vector<32x64xf32> to vector<8x64xf32>
    %c0_42 = arith.constant 0 : index
    %c3 = arith.constant 3 : index
    %129 = memref.load %arg6[%c0_42, %c3] : memref<1x4xf32, #tpu.memory_space<smem>>
    %130 = arith.mulf %126, %126 : vector<8x64xf32>
    %cst_43 = arith.constant dense<0.000000e+00> : vector<8xf32>
    %131 = vector.multi_reduction <add>, %130, %cst_43 [1] : vector<8x64xf32> to vector<8xf32>
    %132 = vector.shape_cast %131 : vector<8xf32> to vector<8x1xf32>
    %133 = arith.mulf %127, %127 : vector<8x64xf32>
    %cst_44 = arith.constant dense<0.000000e+00> : vector<8xf32>
    %134 = vector.multi_reduction <add>, %133, %cst_44 [1] : vector<8x64xf32> to vector<8xf32>
    %135 = vector.shape_cast %134 : vector<8xf32> to vector<8x1xf32>
    %cst_45 = arith.constant 1.000000e-24 : f32
    %136 = vector.broadcast %cst_45 : f32 to vector<8x1xf32>
    %137 = arith.maximumf %135, %136 : vector<8x1xf32>
    %138 = math.rsqrt %137 : vector<8x1xf32>
    %139 = vector.broadcast %138 : vector<8x1xf32> to vector<8x64xf32>
    %140 = arith.mulf %127, %139 : vector<8x64xf32>
    %141 = arith.truncf %126 : vector<8x64xf32> to vector<8x64xbf16>
    %142 = arith.truncf %140 : vector<8x64xf32> to vector<8x64xbf16>
    %cst_46 = arith.constant dense<0.000000e+00> : vector<8x8xf32>
    %143 = tpu.matmul %141, %142, %cst_46 {dimension_numbers = #tpu.dot_dimension_numbers<[1], [1], [0], [0], [0, 0, 1, 0], [], []>} : vector<8x64xbf16>, vector<8x64xbf16>, vector<8x8xf32> -> vector<8x8xf32>
    %cst_47 = arith.constant 1.000000e-24 : f32
    %144 = vector.broadcast %cst_47 : f32 to vector<8x1xf32>
    %145 = arith.maximumf %132, %144 : vector<8x1xf32>
    %146 = math.rsqrt %145 : vector<8x1xf32>
    %147 = vector.broadcast %129 : f32 to vector<8x1xf32>
    %148 = arith.mulf %147, %146 : vector<8x1xf32>
    %149 = vector.broadcast %148 : vector<8x1xf32> to vector<8x8xf32>
    %150 = arith.mulf %143, %149 : vector<8x8xf32>
    %cst_48 = arith.constant dense<0xFF800000> : vector<8xf32>
    %151 = vector.multi_reduction <maximumf>, %150, %cst_48 [1] : vector<8x8xf32> to vector<8xf32>
    %152 = vector.shape_cast %151 : vector<8xf32> to vector<8x1xf32>
    %153 = vector.broadcast %152 : vector<8x1xf32> to vector<8x8xf32>
    %154 = arith.subf %150, %153 : vector<8x8xf32>
    %155 = math.exp %154 : vector<8x8xf32>
    %cst_49 = arith.constant dense<0.000000e+00> : vector<8xf32>
    %156 = vector.multi_reduction <add>, %155, %cst_49 [1] : vector<8x8xf32> to vector<8xf32>
    %157 = vector.shape_cast %156 : vector<8xf32> to vector<8x1xf32>
    %158 = vector.broadcast %157 : vector<8x1xf32> to vector<8x8xf32>
    %159 = arith.divf %155, %158 : vector<8x8xf32>
    %160 = arith.truncf %159 : vector<8x8xf32> to vector<8x8xbf16>
    %161 = arith.truncf %128 : vector<8x64xf32> to vector<8x64xbf16>
    %cst_50 = arith.constant dense<0.000000e+00> : vector<8x64xf32>
    %162 = tpu.matmul %160, %161, %cst_50 {dimension_numbers = #tpu.dot_dimension_numbers<[1], [0], [0], [1], [0, 0, 1, 1], [], []>} : vector<8x8xbf16>, vector<8x64xbf16>, vector<8x64xf32> -> vector<8x64xf32>
    %c24 = arith.constant 24 : index
    %c0_51 = arith.constant 0 : index
    %163 = vector.load %arg8[%c24, %c0_51] : memref<32x64xf32, #tpu.memory_space<vmem>>, vector<8x64xf32>
    tpu.vector_store %arg8[%c24, %c0_51], %162 {strides = array<i32>} : memref<32x64xf32, #tpu.memory_space<vmem>>, vector<8x64xf32>,
    %c0_52 = arith.constant 0 : index
    %c0_53 = arith.constant 0 : index
    %164 = vector.load %arg5[%c0_52, %c0_53] : memref<32x32xbf16, #tpu.memory_space<vmem>>, vector<32x32xbf16>
    %c0_54 = arith.constant 0 : index
    %c0_55 = arith.constant 0 : index
    %165 = vector.load %arg8[%c0_54, %c0_55] : memref<32x64xf32, #tpu.memory_space<vmem>>, vector<32x64xf32>
    %166 = arith.truncf %165 : vector<32x64xf32> to vector<32x64xbf16>
    %cst_56 = arith.constant dense<0.000000e+00> : vector<32x64xf32>
    %167 = tpu.matmul %164, %166, %cst_56 {dimension_numbers = #tpu.dot_dimension_numbers<[1], [0], [0], [1], [0, 0, 1, 1], [], []>} : vector<32x32xbf16>, vector<32x64xbf16>, vector<32x64xf32> -> vector<32x64xf32>
    %168 = arith.addf %1, %167 : vector<32x64xf32>
    %c0_57 = arith.constant 0 : index
    %c0_58 = arith.constant 0 : index
    %c0_59 = arith.constant 0 : index
    %169 = vector.load %arg7[%c0_57, %c0_58, %c0_59] : memref<1x32x64xf32, #tpu.memory_space<vmem>>, vector<1x32x64xf32>
    %170 = vector.shape_cast %169 : vector<1x32x64xf32> to vector<32x64xf32>
    %171 = vector.shape_cast %168 : vector<32x64xf32> to vector<1x32x64xf32>
    tpu.vector_store %arg7[%c0_57, %c0_58, %c0_59], %171 {strides = array<i32>} : memref<1x32x64xf32, #tpu.memory_space<vmem>>, vector<1x32x64xf32>,
    return
  }
  func.func @transform_0(%arg0: i32) -> (i32, i32, i32) {
    %c0_i32 = arith.constant 0 : i32
    %c0_i32_0 = arith.constant 0 : i32
    %c0_i32_1 = arith.constant 0 : i32
    return %arg0, %c0_i32, %c0_i32_0 : i32, i32, i32
  }
  func.func @transform_1(%arg0: i32) -> (i32, i32, i32) {
    %c0_i32 = arith.constant 0 : i32
    %c0_i32_0 = arith.constant 0 : i32
    %c0_i32_1 = arith.constant 0 : i32
    return %arg0, %c0_i32, %c0_i32_0 : i32, i32, i32
  }
  func.func @transform_2(%arg0: i32) -> (i32, i32) {
    %c0_i32 = arith.constant 0 : i32
    %c0_i32_0 = arith.constant 0 : i32
    %c0_i32_1 = arith.constant 0 : i32
    return %c0_i32, %c0_i32_0 : i32, i32
  }
  func.func @transform_3(%arg0: i32) -> (i32, i32) {
    %c0_i32 = arith.constant 0 : i32
    %c0_i32_0 = arith.constant 0 : i32
    %c0_i32_1 = arith.constant 0 : i32
    return %c0_i32, %c0_i32_0 : i32, i32
  }
  func.func @transform_4(%arg0: i32) -> (i32, i32) {
    %c0_i32 = arith.constant 0 : i32
    %c0_i32_0 = arith.constant 0 : i32
    %c0_i32_1 = arith.constant 0 : i32
    return %c0_i32, %c0_i32_0 : i32, i32
  }
  func.func @transform_5(%arg0: i32) -> (i32, i32) {
    %c0_i32 = arith.constant 0 : i32
    %c0_i32_0 = arith.constant 0 : i32
    %c0_i32_1 = arith.constant 0 : i32
    return %c0_i32, %c0_i32_0 : i32, i32
  }
  func.func @transform_6(%arg0: i32) -> (i32, i32, i32) {
    %c0_i32 = arith.constant 0 : i32
    %c0_i32_0 = arith.constant 0 : i32
    %c0_i32_1 = arith.constant 0 : i32
    return %arg0, %c0_i32, %c0_i32_0 : i32, i32, i32
  }
}

module attributes {stable_mosaic.version = 11 : i64} {
  func.func @_attn_kernel(%arg0: i32, %arg1: memref<1x32x64xf32, #tpu.memory_space<vmem>>, %arg2: memref<1x32x64xf32, #tpu.memory_space<vmem>>, %arg3: memref<32x1xf32, #tpu.memory_space<vmem>>, %arg4: memref<32x1xf32, #tpu.memory_space<vmem>>, %arg5: memref<32x32xbf16, #tpu.memory_space<vmem>>, %arg6: memref<64x32xbf16, #tpu.memory_space<vmem>>, %arg7: memref<32x32xbf16, #tpu.memory_space<vmem>>, %arg8: memref<1x4xf32, #tpu.memory_space<smem>>, %arg9: memref<1x32x64xf32, #tpu.memory_space<vmem>>, %arg10: memref<32x64xf32, #tpu.memory_space<vmem>>) attributes {dimension_semantics = [#tpu.dimension_semantics<parallel>], iteration_bounds = array<i64: 2>, scalar_prefetch = 0 : i64, scratch_operands = 1 : i64, tpu.core_type = #tpu.core_type<tc>, window_params = [{transform_indices = @transform_0, window_bounds = array<i64: 1, 32, 64>}, {transform_indices = @transform_1, window_bounds = array<i64: 1, 32, 64>}, {pipeline_mode = #tpu.pipeline_mode<synchronous>, transform_indices = @transform_2, window_bounds = array<i64: 32, 1>}, {pipeline_mode = #tpu.pipeline_mode<synchronous>, transform_indices = @transform_3, window_bounds = array<i64: 32, 1>}, {pipeline_mode = #tpu.pipeline_mode<synchronous>, transform_indices = @transform_4, window_bounds = array<i64: 32, 32>}, {pipeline_mode = #tpu.pipeline_mode<synchronous>, transform_indices = @transform_5, window_bounds = array<i64: 64, 32>}, {pipeline_mode = #tpu.pipeline_mode<synchronous>, transform_indices = @transform_6, window_bounds = array<i64: 32, 32>}, {transform_indices = @transform_7, window_bounds = array<i64: 1, 4>}, {transform_indices = @transform_8, window_bounds = array<i64: 1, 32, 64>}]} {
    %c0 = arith.constant 0 : index
    %c0_0 = arith.constant 0 : index
    %c0_1 = arith.constant 0 : index
    %0 = vector.load %arg1[%c0, %c0_0, %c0_1] : memref<1x32x64xf32, #tpu.memory_space<vmem>>, vector<1x32x64xf32>
    %1 = vector.shape_cast %0 : vector<1x32x64xf32> to vector<32x64xf32>
    %2 = arith.truncf %1 : vector<32x64xf32> to vector<32x64xbf16>
    %c0_2 = arith.constant 0 : index
    %c0_3 = arith.constant 0 : index
    %c0_4 = arith.constant 0 : index
    %3 = vector.load %arg2[%c0_2, %c0_3, %c0_4] : memref<1x32x64xf32, #tpu.memory_space<vmem>>, vector<1x32x64xf32>
    %4 = vector.shape_cast %3 : vector<1x32x64xf32> to vector<32x64xf32>
    %5 = arith.truncf %4 : vector<32x64xf32> to vector<32x64xbf16>
    %c0_5 = arith.constant 0 : index
    %c0_6 = arith.constant 0 : index
    %6 = vector.load %arg5[%c0_5, %c0_6] : memref<32x32xbf16, #tpu.memory_space<vmem>>, vector<32x32xbf16>
    %cst = arith.constant dense<0.000000e+00> : vector<32x64xf32>
    %7 = tpu.matmul %6, %2, %cst {dimension_numbers = #tpu.dot_dimension_numbers<[1], [0], [0], [1], [0, 0, 1, 1], [], []>} : vector<32x32xbf16>, vector<32x64xbf16>, vector<32x64xf32> -> vector<32x64xf32>
    %c0_7 = arith.constant 0 : index
    %c0_8 = arith.constant 0 : index
    %8 = vector.load %arg6[%c0_7, %c0_8] : memref<64x32xbf16, #tpu.memory_space<vmem>>, vector<64x32xbf16>
    %cst_9 = arith.constant dense<0.000000e+00> : vector<64x64xf32>
    %9 = tpu.matmul %8, %5, %cst_9 {dimension_numbers = #tpu.dot_dimension_numbers<[1], [0], [0], [1], [0, 0, 1, 1], [], []>} : vector<64x32xbf16>, vector<32x64xbf16>, vector<64x64xf32> -> vector<64x64xf32>
    %10 = vector.extract_strided_slice %9 {offsets = [0, 0], sizes = [32, 64], strides = [1, 1]} : vector<64x64xf32> to vector<32x64xf32>
    %11 = vector.extract_strided_slice %9 {offsets = [32, 0], sizes = [32, 64], strides = [1, 1]} : vector<64x64xf32> to vector<32x64xf32>
    %12 = vector.extract_strided_slice %7 {offsets = [0, 0], sizes = [8, 64], strides = [1, 1]} : vector<32x64xf32> to vector<8x64xf32>
    %13 = vector.extract_strided_slice %10 {offsets = [0, 0], sizes = [8, 64], strides = [1, 1]} : vector<32x64xf32> to vector<8x64xf32>
    %14 = vector.extract_strided_slice %11 {offsets = [0, 0], sizes = [8, 64], strides = [1, 1]} : vector<32x64xf32> to vector<8x64xf32>
    %c0_10 = arith.constant 0 : index
    %c0_11 = arith.constant 0 : index
    %15 = memref.load %arg8[%c0_10, %c0_11] : memref<1x4xf32, #tpu.memory_space<smem>>
    %16 = arith.mulf %12, %12 : vector<8x64xf32>
    %cst_12 = arith.constant dense<0.000000e+00> : vector<8xf32>
    %17 = vector.multi_reduction <add>, %16, %cst_12 [1] : vector<8x64xf32> to vector<8xf32>
    %18 = vector.shape_cast %17 : vector<8xf32> to vector<8x1xf32>
    %19 = arith.mulf %13, %13 : vector<8x64xf32>
    %cst_13 = arith.constant dense<0.000000e+00> : vector<8xf32>
    %20 = vector.multi_reduction <add>, %19, %cst_13 [1] : vector<8x64xf32> to vector<8xf32>
    %21 = vector.shape_cast %20 : vector<8xf32> to vector<8x1xf32>
    %cst_14 = arith.constant 1.000000e-24 : f32
    %22 = vector.broadcast %cst_14 : f32 to vector<8x1xf32>
    %23 = arith.maximumf %21, %22 : vector<8x1xf32>
    %24 = math.rsqrt %23 : vector<8x1xf32>
    %25 = vector.broadcast %24 : vector<8x1xf32> to vector<8x64xf32>
    %26 = arith.mulf %13, %25 : vector<8x64xf32>
    %27 = arith.truncf %12 : vector<8x64xf32> to vector<8x64xbf16>
    %28 = arith.truncf %26 : vector<8x64xf32> to vector<8x64xbf16>
    %cst_15 = arith.constant dense<0.000000e+00> : vector<8x8xf32>
    %29 = tpu.matmul %27, %28, %cst_15 {dimension_numbers = #tpu.dot_dimension_numbers<[1], [1], [0], [0], [0, 0, 1, 0], [], []>} : vector<8x64xbf16>, vector<8x64xbf16>, vector<8x8xf32> -> vector<8x8xf32>
    %cst_16 = arith.constant 1.000000e-24 : f32
    %30 = vector.broadcast %cst_16 : f32 to vector<8x1xf32>
    %31 = arith.maximumf %18, %30 : vector<8x1xf32>
    %32 = math.rsqrt %31 : vector<8x1xf32>
    %33 = vector.broadcast %15 : f32 to vector<8x1xf32>
    %34 = arith.mulf %33, %32 : vector<8x1xf32>
    %35 = vector.broadcast %34 : vector<8x1xf32> to vector<8x8xf32>
    %36 = arith.mulf %29, %35 : vector<8x8xf32>
    %cst_17 = arith.constant dense<0xFF800000> : vector<8xf32>
    %37 = vector.multi_reduction <maximumf>, %36, %cst_17 [1] : vector<8x8xf32> to vector<8xf32>
    %38 = vector.shape_cast %37 : vector<8xf32> to vector<8x1xf32>
    %39 = vector.broadcast %38 : vector<8x1xf32> to vector<8x8xf32>
    %40 = arith.subf %36, %39 : vector<8x8xf32>
    %41 = math.exp %40 : vector<8x8xf32>
    %cst_18 = arith.constant dense<0.000000e+00> : vector<8xf32>
    %42 = vector.multi_reduction <add>, %41, %cst_18 [1] : vector<8x8xf32> to vector<8xf32>
    %43 = vector.shape_cast %42 : vector<8xf32> to vector<8x1xf32>
    %44 = vector.broadcast %43 : vector<8x1xf32> to vector<8x8xf32>
    %45 = arith.divf %41, %44 : vector<8x8xf32>
    %46 = arith.truncf %45 : vector<8x8xf32> to vector<8x8xbf16>
    %47 = arith.truncf %14 : vector<8x64xf32> to vector<8x64xbf16>
    %cst_19 = arith.constant dense<0.000000e+00> : vector<8x64xf32>
    %48 = tpu.matmul %46, %47, %cst_19 {dimension_numbers = #tpu.dot_dimension_numbers<[1], [0], [0], [1], [0, 0, 1, 1], [], []>} : vector<8x8xbf16>, vector<8x64xbf16>, vector<8x64xf32> -> vector<8x64xf32>
    %c0_20 = arith.constant 0 : index
    %c0_21 = arith.constant 0 : index
    %49 = vector.load %arg10[%c0_20, %c0_21] : memref<32x64xf32, #tpu.memory_space<vmem>>, vector<8x64xf32>
    tpu.vector_store %arg10[%c0_20, %c0_21], %48 {strides = array<i32>} : memref<32x64xf32, #tpu.memory_space<vmem>>, vector<8x64xf32>,
    %50 = vector.extract_strided_slice %7 {offsets = [8, 0], sizes = [8, 64], strides = [1, 1]} : vector<32x64xf32> to vector<8x64xf32>
    %51 = vector.extract_strided_slice %10 {offsets = [8, 0], sizes = [8, 64], strides = [1, 1]} : vector<32x64xf32> to vector<8x64xf32>
    %52 = vector.extract_strided_slice %11 {offsets = [8, 0], sizes = [8, 64], strides = [1, 1]} : vector<32x64xf32> to vector<8x64xf32>
    %c0_22 = arith.constant 0 : index
    %c1 = arith.constant 1 : index
    %53 = memref.load %arg8[%c0_22, %c1] : memref<1x4xf32, #tpu.memory_space<smem>>
    %54 = arith.mulf %50, %50 : vector<8x64xf32>
    %cst_23 = arith.constant dense<0.000000e+00> : vector<8xf32>
    %55 = vector.multi_reduction <add>, %54, %cst_23 [1] : vector<8x64xf32> to vector<8xf32>
    %56 = vector.shape_cast %55 : vector<8xf32> to vector<8x1xf32>
    %57 = arith.mulf %51, %51 : vector<8x64xf32>
    %cst_24 = arith.constant dense<0.000000e+00> : vector<8xf32>
    %58 = vector.multi_reduction <add>, %57, %cst_24 [1] : vector<8x64xf32> to vector<8xf32>
    %59 = vector.shape_cast %58 : vector<8xf32> to vector<8x1xf32>
    %cst_25 = arith.constant 1.000000e-24 : f32
    %60 = vector.broadcast %cst_25 : f32 to vector<8x1xf32>
    %61 = arith.maximumf %59, %60 : vector<8x1xf32>
    %62 = math.rsqrt %61 : vector<8x1xf32>
    %63 = vector.broadcast %62 : vector<8x1xf32> to vector<8x64xf32>
    %64 = arith.mulf %51, %63 : vector<8x64xf32>
    %65 = arith.truncf %50 : vector<8x64xf32> to vector<8x64xbf16>
    %66 = arith.truncf %64 : vector<8x64xf32> to vector<8x64xbf16>
    %cst_26 = arith.constant dense<0.000000e+00> : vector<8x8xf32>
    %67 = tpu.matmul %65, %66, %cst_26 {dimension_numbers = #tpu.dot_dimension_numbers<[1], [1], [0], [0], [0, 0, 1, 0], [], []>} : vector<8x64xbf16>, vector<8x64xbf16>, vector<8x8xf32> -> vector<8x8xf32>
    %cst_27 = arith.constant 1.000000e-24 : f32
    %68 = vector.broadcast %cst_27 : f32 to vector<8x1xf32>
    %69 = arith.maximumf %56, %68 : vector<8x1xf32>
    %70 = math.rsqrt %69 : vector<8x1xf32>
    %71 = vector.broadcast %53 : f32 to vector<8x1xf32>
    %72 = arith.mulf %71, %70 : vector<8x1xf32>
    %73 = vector.broadcast %72 : vector<8x1xf32> to vector<8x8xf32>
    %74 = arith.mulf %67, %73 : vector<8x8xf32>
    %cst_28 = arith.constant dense<0xFF800000> : vector<8xf32>
    %75 = vector.multi_reduction <maximumf>, %74, %cst_28 [1] : vector<8x8xf32> to vector<8xf32>
    %76 = vector.shape_cast %75 : vector<8xf32> to vector<8x1xf32>
    %77 = vector.broadcast %76 : vector<8x1xf32> to vector<8x8xf32>
    %78 = arith.subf %74, %77 : vector<8x8xf32>
    %79 = math.exp %78 : vector<8x8xf32>
    %cst_29 = arith.constant dense<0.000000e+00> : vector<8xf32>
    %80 = vector.multi_reduction <add>, %79, %cst_29 [1] : vector<8x8xf32> to vector<8xf32>
    %81 = vector.shape_cast %80 : vector<8xf32> to vector<8x1xf32>
    %82 = vector.broadcast %81 : vector<8x1xf32> to vector<8x8xf32>
    %83 = arith.divf %79, %82 : vector<8x8xf32>
    %84 = arith.truncf %83 : vector<8x8xf32> to vector<8x8xbf16>
    %85 = arith.truncf %52 : vector<8x64xf32> to vector<8x64xbf16>
    %cst_30 = arith.constant dense<0.000000e+00> : vector<8x64xf32>
    %86 = tpu.matmul %84, %85, %cst_30 {dimension_numbers = #tpu.dot_dimension_numbers<[1], [0], [0], [1], [0, 0, 1, 1], [], []>} : vector<8x8xbf16>, vector<8x64xbf16>, vector<8x64xf32> -> vector<8x64xf32>
    %c8 = arith.constant 8 : index
    %c0_31 = arith.constant 0 : index
    %87 = vector.load %arg10[%c8, %c0_31] : memref<32x64xf32, #tpu.memory_space<vmem>>, vector<8x64xf32>
    tpu.vector_store %arg10[%c8, %c0_31], %86 {strides = array<i32>} : memref<32x64xf32, #tpu.memory_space<vmem>>, vector<8x64xf32>,
    %88 = vector.extract_strided_slice %7 {offsets = [16, 0], sizes = [8, 64], strides = [1, 1]} : vector<32x64xf32> to vector<8x64xf32>
    %89 = vector.extract_strided_slice %10 {offsets = [16, 0], sizes = [8, 64], strides = [1, 1]} : vector<32x64xf32> to vector<8x64xf32>
    %90 = vector.extract_strided_slice %11 {offsets = [16, 0], sizes = [8, 64], strides = [1, 1]} : vector<32x64xf32> to vector<8x64xf32>
    %c0_32 = arith.constant 0 : index
    %c2 = arith.constant 2 : index
    %91 = memref.load %arg8[%c0_32, %c2] : memref<1x4xf32, #tpu.memory_space<smem>>
    %92 = arith.mulf %88, %88 : vector<8x64xf32>
    %cst_33 = arith.constant dense<0.000000e+00> : vector<8xf32>
    %93 = vector.multi_reduction <add>, %92, %cst_33 [1] : vector<8x64xf32> to vector<8xf32>
    %94 = vector.shape_cast %93 : vector<8xf32> to vector<8x1xf32>
    %95 = arith.mulf %89, %89 : vector<8x64xf32>
    %cst_34 = arith.constant dense<0.000000e+00> : vector<8xf32>
    %96 = vector.multi_reduction <add>, %95, %cst_34 [1] : vector<8x64xf32> to vector<8xf32>
    %97 = vector.shape_cast %96 : vector<8xf32> to vector<8x1xf32>
    %cst_35 = arith.constant 1.000000e-24 : f32
    %98 = vector.broadcast %cst_35 : f32 to vector<8x1xf32>
    %99 = arith.maximumf %97, %98 : vector<8x1xf32>
    %100 = math.rsqrt %99 : vector<8x1xf32>
    %101 = vector.broadcast %100 : vector<8x1xf32> to vector<8x64xf32>
    %102 = arith.mulf %89, %101 : vector<8x64xf32>
    %103 = arith.truncf %88 : vector<8x64xf32> to vector<8x64xbf16>
    %104 = arith.truncf %102 : vector<8x64xf32> to vector<8x64xbf16>
    %cst_36 = arith.constant dense<0.000000e+00> : vector<8x8xf32>
    %105 = tpu.matmul %103, %104, %cst_36 {dimension_numbers = #tpu.dot_dimension_numbers<[1], [1], [0], [0], [0, 0, 1, 0], [], []>} : vector<8x64xbf16>, vector<8x64xbf16>, vector<8x8xf32> -> vector<8x8xf32>
    %cst_37 = arith.constant 1.000000e-24 : f32
    %106 = vector.broadcast %cst_37 : f32 to vector<8x1xf32>
    %107 = arith.maximumf %94, %106 : vector<8x1xf32>
    %108 = math.rsqrt %107 : vector<8x1xf32>
    %109 = vector.broadcast %91 : f32 to vector<8x1xf32>
    %110 = arith.mulf %109, %108 : vector<8x1xf32>
    %111 = vector.broadcast %110 : vector<8x1xf32> to vector<8x8xf32>
    %112 = arith.mulf %105, %111 : vector<8x8xf32>
    %cst_38 = arith.constant dense<0xFF800000> : vector<8xf32>
    %113 = vector.multi_reduction <maximumf>, %112, %cst_38 [1] : vector<8x8xf32> to vector<8xf32>
    %114 = vector.shape_cast %113 : vector<8xf32> to vector<8x1xf32>
    %115 = vector.broadcast %114 : vector<8x1xf32> to vector<8x8xf32>
    %116 = arith.subf %112, %115 : vector<8x8xf32>
    %117 = math.exp %116 : vector<8x8xf32>
    %cst_39 = arith.constant dense<0.000000e+00> : vector<8xf32>
    %118 = vector.multi_reduction <add>, %117, %cst_39 [1] : vector<8x8xf32> to vector<8xf32>
    %119 = vector.shape_cast %118 : vector<8xf32> to vector<8x1xf32>
    %120 = vector.broadcast %119 : vector<8x1xf32> to vector<8x8xf32>
    %121 = arith.divf %117, %120 : vector<8x8xf32>
    %122 = arith.truncf %121 : vector<8x8xf32> to vector<8x8xbf16>
    %123 = arith.truncf %90 : vector<8x64xf32> to vector<8x64xbf16>
    %cst_40 = arith.constant dense<0.000000e+00> : vector<8x64xf32>
    %124 = tpu.matmul %122, %123, %cst_40 {dimension_numbers = #tpu.dot_dimension_numbers<[1], [0], [0], [1], [0, 0, 1, 1], [], []>} : vector<8x8xbf16>, vector<8x64xbf16>, vector<8x64xf32> -> vector<8x64xf32>
    %c16 = arith.constant 16 : index
    %c0_41 = arith.constant 0 : index
    %125 = vector.load %arg10[%c16, %c0_41] : memref<32x64xf32, #tpu.memory_space<vmem>>, vector<8x64xf32>
    tpu.vector_store %arg10[%c16, %c0_41], %124 {strides = array<i32>} : memref<32x64xf32, #tpu.memory_space<vmem>>, vector<8x64xf32>,
    %126 = vector.extract_strided_slice %7 {offsets = [24, 0], sizes = [8, 64], strides = [1, 1]} : vector<32x64xf32> to vector<8x64xf32>
    %127 = vector.extract_strided_slice %10 {offsets = [24, 0], sizes = [8, 64], strides = [1, 1]} : vector<32x64xf32> to vector<8x64xf32>
    %128 = vector.extract_strided_slice %11 {offsets = [24, 0], sizes = [8, 64], strides = [1, 1]} : vector<32x64xf32> to vector<8x64xf32>
    %c0_42 = arith.constant 0 : index
    %c3 = arith.constant 3 : index
    %129 = memref.load %arg8[%c0_42, %c3] : memref<1x4xf32, #tpu.memory_space<smem>>
    %130 = arith.mulf %126, %126 : vector<8x64xf32>
    %cst_43 = arith.constant dense<0.000000e+00> : vector<8xf32>
    %131 = vector.multi_reduction <add>, %130, %cst_43 [1] : vector<8x64xf32> to vector<8xf32>
    %132 = vector.shape_cast %131 : vector<8xf32> to vector<8x1xf32>
    %133 = arith.mulf %127, %127 : vector<8x64xf32>
    %cst_44 = arith.constant dense<0.000000e+00> : vector<8xf32>
    %134 = vector.multi_reduction <add>, %133, %cst_44 [1] : vector<8x64xf32> to vector<8xf32>
    %135 = vector.shape_cast %134 : vector<8xf32> to vector<8x1xf32>
    %cst_45 = arith.constant 1.000000e-24 : f32
    %136 = vector.broadcast %cst_45 : f32 to vector<8x1xf32>
    %137 = arith.maximumf %135, %136 : vector<8x1xf32>
    %138 = math.rsqrt %137 : vector<8x1xf32>
    %139 = vector.broadcast %138 : vector<8x1xf32> to vector<8x64xf32>
    %140 = arith.mulf %127, %139 : vector<8x64xf32>
    %141 = arith.truncf %126 : vector<8x64xf32> to vector<8x64xbf16>
    %142 = arith.truncf %140 : vector<8x64xf32> to vector<8x64xbf16>
    %cst_46 = arith.constant dense<0.000000e+00> : vector<8x8xf32>
    %143 = tpu.matmul %141, %142, %cst_46 {dimension_numbers = #tpu.dot_dimension_numbers<[1], [1], [0], [0], [0, 0, 1, 0], [], []>} : vector<8x64xbf16>, vector<8x64xbf16>, vector<8x8xf32> -> vector<8x8xf32>
    %cst_47 = arith.constant 1.000000e-24 : f32
    %144 = vector.broadcast %cst_47 : f32 to vector<8x1xf32>
    %145 = arith.maximumf %132, %144 : vector<8x1xf32>
    %146 = math.rsqrt %145 : vector<8x1xf32>
    %147 = vector.broadcast %129 : f32 to vector<8x1xf32>
    %148 = arith.mulf %147, %146 : vector<8x1xf32>
    %149 = vector.broadcast %148 : vector<8x1xf32> to vector<8x8xf32>
    %150 = arith.mulf %143, %149 : vector<8x8xf32>
    %cst_48 = arith.constant dense<0xFF800000> : vector<8xf32>
    %151 = vector.multi_reduction <maximumf>, %150, %cst_48 [1] : vector<8x8xf32> to vector<8xf32>
    %152 = vector.shape_cast %151 : vector<8xf32> to vector<8x1xf32>
    %153 = vector.broadcast %152 : vector<8x1xf32> to vector<8x8xf32>
    %154 = arith.subf %150, %153 : vector<8x8xf32>
    %155 = math.exp %154 : vector<8x8xf32>
    %cst_49 = arith.constant dense<0.000000e+00> : vector<8xf32>
    %156 = vector.multi_reduction <add>, %155, %cst_49 [1] : vector<8x8xf32> to vector<8xf32>
    %157 = vector.shape_cast %156 : vector<8xf32> to vector<8x1xf32>
    %158 = vector.broadcast %157 : vector<8x1xf32> to vector<8x8xf32>
    %159 = arith.divf %155, %158 : vector<8x8xf32>
    %160 = arith.truncf %159 : vector<8x8xf32> to vector<8x8xbf16>
    %161 = arith.truncf %128 : vector<8x64xf32> to vector<8x64xbf16>
    %cst_50 = arith.constant dense<0.000000e+00> : vector<8x64xf32>
    %162 = tpu.matmul %160, %161, %cst_50 {dimension_numbers = #tpu.dot_dimension_numbers<[1], [0], [0], [1], [0, 0, 1, 1], [], []>} : vector<8x8xbf16>, vector<8x64xbf16>, vector<8x64xf32> -> vector<8x64xf32>
    %c24 = arith.constant 24 : index
    %c0_51 = arith.constant 0 : index
    %163 = vector.load %arg10[%c24, %c0_51] : memref<32x64xf32, #tpu.memory_space<vmem>>, vector<8x64xf32>
    tpu.vector_store %arg10[%c24, %c0_51], %162 {strides = array<i32>} : memref<32x64xf32, #tpu.memory_space<vmem>>, vector<8x64xf32>,
    %c0_52 = arith.constant 0 : index
    %c0_53 = arith.constant 0 : index
    %164 = vector.load %arg7[%c0_52, %c0_53] : memref<32x32xbf16, #tpu.memory_space<vmem>>, vector<32x32xbf16>
    %c0_54 = arith.constant 0 : index
    %c0_55 = arith.constant 0 : index
    %165 = vector.load %arg10[%c0_54, %c0_55] : memref<32x64xf32, #tpu.memory_space<vmem>>, vector<32x64xf32>
    %166 = arith.truncf %165 : vector<32x64xf32> to vector<32x64xbf16>
    %cst_56 = arith.constant dense<0.000000e+00> : vector<32x64xf32>
    %167 = tpu.matmul %164, %166, %cst_56 {dimension_numbers = #tpu.dot_dimension_numbers<[1], [0], [0], [1], [0, 0, 1, 1], [], []>} : vector<32x32xbf16>, vector<32x64xbf16>, vector<32x64xf32> -> vector<32x64xf32>
    %168 = arith.addf %1, %167 : vector<32x64xf32>
    %c0_57 = arith.constant 0 : index
    %c0_58 = arith.constant 0 : index
    %169 = vector.load %arg3[%c0_57, %c0_58] : memref<32x1xf32, #tpu.memory_space<vmem>>, vector<32x1xf32>
    %c0_59 = arith.constant 0 : index
    %c0_60 = arith.constant 0 : index
    %170 = vector.load %arg4[%c0_59, %c0_60] : memref<32x1xf32, #tpu.memory_space<vmem>>, vector<32x1xf32>
    %cst_61 = arith.constant dense<0.000000e+00> : vector<64xf32>
    %171 = vector.multi_reduction <add>, %168, %cst_61 [0] : vector<32x64xf32> to vector<64xf32>
    %172 = vector.shape_cast %171 : vector<64xf32> to vector<1x64xf32>
    %cst_62 = arith.constant 3.200000e+01 : f32
    %173 = vector.broadcast %cst_62 : f32 to vector<1x64xf32>
    %174 = arith.divf %172, %173 : vector<1x64xf32>
    %175 = vector.broadcast %174 : vector<1x64xf32> to vector<32x64xf32>
    %176 = arith.subf %168, %175 : vector<32x64xf32>
    %177 = arith.mulf %176, %176 : vector<32x64xf32>
    %cst_63 = arith.constant dense<0.000000e+00> : vector<64xf32>
    %178 = vector.multi_reduction <add>, %177, %cst_63 [0] : vector<32x64xf32> to vector<64xf32>
    %179 = vector.shape_cast %178 : vector<64xf32> to vector<1x64xf32>
    %cst_64 = arith.constant 3.200000e+01 : f32
    %180 = vector.broadcast %cst_64 : f32 to vector<1x64xf32>
    %181 = arith.divf %179, %180 : vector<1x64xf32>
    %cst_65 = arith.constant 9.99999974E-6 : f32
    %182 = vector.broadcast %cst_65 : f32 to vector<1x64xf32>
    %183 = arith.addf %181, %182 : vector<1x64xf32>
    %184 = math.rsqrt %183 : vector<1x64xf32>
    %185 = vector.broadcast %184 : vector<1x64xf32> to vector<32x64xf32>
    %186 = arith.mulf %176, %185 : vector<32x64xf32>
    %187 = vector.broadcast %169 : vector<32x1xf32> to vector<32x64xf32>
    %188 = arith.mulf %186, %187 : vector<32x64xf32>
    %189 = vector.broadcast %170 : vector<32x1xf32> to vector<32x64xf32>
    %190 = arith.addf %188, %189 : vector<32x64xf32>
    %c0_66 = arith.constant 0 : index
    %c0_67 = arith.constant 0 : index
    %c0_68 = arith.constant 0 : index
    %191 = vector.load %arg9[%c0_66, %c0_67, %c0_68] : memref<1x32x64xf32, #tpu.memory_space<vmem>>, vector<1x32x64xf32>
    %192 = vector.shape_cast %191 : vector<1x32x64xf32> to vector<32x64xf32>
    %193 = vector.shape_cast %190 : vector<32x64xf32> to vector<1x32x64xf32>
    tpu.vector_store %arg9[%c0_66, %c0_67, %c0_68], %193 {strides = array<i32>} : memref<1x32x64xf32, #tpu.memory_space<vmem>>, vector<1x32x64xf32>,
    return
  }
  func.func @transform_0(%arg0: i32) -> (i32, i32, i32) {
    %c0_i32 = arith.constant 0 : i32
    %c0_i32_0 = arith.constant 0 : i32
    %c0_i32_1 = arith.constant 0 : i32
    return %arg0, %c0_i32, %c0_i32_0 : i32, i32, i32
  }
  func.func @transform_1(%arg0: i32) -> (i32, i32, i32) {
    %c0_i32 = arith.constant 0 : i32
    %c0_i32_0 = arith.constant 0 : i32
    %c0_i32_1 = arith.constant 0 : i32
    return %arg0, %c0_i32, %c0_i32_0 : i32, i32, i32
  }
  func.func @transform_2(%arg0: i32) -> (i32, i32) {
    %c0_i32 = arith.constant 0 : i32
    %c0_i32_0 = arith.constant 0 : i32
    %c0_i32_1 = arith.constant 0 : i32
    return %c0_i32, %c0_i32_0 : i32, i32
  }
  func.func @transform_3(%arg0: i32) -> (i32, i32) {
    %c0_i32 = arith.constant 0 : i32
    %c0_i32_0 = arith.constant 0 : i32
    %c0_i32_1 = arith.constant 0 : i32
    return %c0_i32, %c0_i32_0 : i32, i32
  }
  func.func @transform_4(%arg0: i32) -> (i32, i32) {
    %c0_i32 = arith.constant 0 : i32
    %c0_i32_0 = arith.constant 0 : i32
    %c0_i32_1 = arith.constant 0 : i32
    return %c0_i32, %c0_i32_0 : i32, i32
  }
  func.func @transform_5(%arg0: i32) -> (i32, i32) {
    %c0_i32 = arith.constant 0 : i32
    %c0_i32_0 = arith.constant 0 : i32
    %c0_i32_1 = arith.constant 0 : i32
    return %c0_i32, %c0_i32_0 : i32, i32
  }
  func.func @transform_6(%arg0: i32) -> (i32, i32) {
    %c0_i32 = arith.constant 0 : i32
    %c0_i32_0 = arith.constant 0 : i32
    %c0_i32_1 = arith.constant 0 : i32
    return %c0_i32, %c0_i32_0 : i32, i32
  }
  func.func @transform_7(%arg0: i32) -> (i32, i32) {
    %c0_i32 = arith.constant 0 : i32
    %c0_i32_0 = arith.constant 0 : i32
    %c0_i32_1 = arith.constant 0 : i32
    return %c0_i32, %c0_i32_0 : i32, i32
  }
  func.func @transform_8(%arg0: i32) -> (i32, i32, i32) {
    %c0_i32 = arith.constant 0 : i32
    %c0_i32_0 = arith.constant 0 : i32
    %c0_i32_1 = arith.constant 0 : i32
    return %arg0, %c0_i32, %c0_i32_0 : i32, i32, i32
  }
}

module attributes {stable_mosaic.version = 11 : i64} {
  func.func @_attn_kernel(%arg0: i32, %arg1: i32, %arg2: memref<1x1x32x64xf32, #tpu.memory_space<vmem>>, %arg3: memref<1x32x1xf32, #tpu.memory_space<vmem>>, %arg4: memref<1x32x1xf32, #tpu.memory_space<vmem>>, %arg5: memref<1x32x1xf32, #tpu.memory_space<vmem>>, %arg6: memref<1x32x1xf32, #tpu.memory_space<vmem>>, %arg7: memref<1x96x32xbf16, #tpu.memory_space<vmem>>, %arg8: memref<1x32x32xbf16, #tpu.memory_space<vmem>>, %arg9: memref<2x4xf32, #tpu.memory_space<smem>>, %arg10: memref<1x1x32x64xf32, #tpu.memory_space<vmem>>, %arg11: memref<32x64xf32, #tpu.memory_space<vmem>>) attributes {dimension_semantics = [#tpu.dimension_semantics<parallel>, #tpu.dimension_semantics<parallel>], iteration_bounds = array<i64: 2, 2>, scalar_prefetch = 0 : i64, scratch_operands = 1 : i64, tpu.core_type = #tpu.core_type<tc>, window_params = [{transform_indices = @transform_0, window_bounds = array<i64: 1, 1, 32, 64>}, {transform_indices = @transform_1, window_bounds = array<i64: 1, 32, 1>}, {transform_indices = @transform_2, window_bounds = array<i64: 1, 32, 1>}, {transform_indices = @transform_3, window_bounds = array<i64: 1, 32, 1>}, {transform_indices = @transform_4, window_bounds = array<i64: 1, 32, 1>}, {transform_indices = @transform_5, window_bounds = array<i64: 1, 96, 32>}, {transform_indices = @transform_6, window_bounds = array<i64: 1, 32, 32>}, {transform_indices = @transform_7, window_bounds = array<i64: 2, 4>}, {transform_indices = @transform_8, window_bounds = array<i64: 1, 1, 32, 64>}]} {
    %c0 = arith.constant 0 : index
    %c0_0 = arith.constant 0 : index
    %c0_1 = arith.constant 0 : index
    %c0_2 = arith.constant 0 : index
    %0 = vector.load %arg2[%c0, %c0_0, %c0_1, %c0_2] : memref<1x1x32x64xf32, #tpu.memory_space<vmem>>, vector<1x1x32x64xf32>
    %1 = vector.shape_cast %0 : vector<1x1x32x64xf32> to vector<32x64xf32>
    %c0_3 = arith.constant 0 : index
    %c0_4 = arith.constant 0 : index
    %c0_5 = arith.constant 0 : index
    %2 = vector.load %arg3[%c0_3, %c0_4, %c0_5] : memref<1x32x1xf32, #tpu.memory_space<vmem>>, vector<1x32x1xf32>
    %3 = vector.shape_cast %2 : vector<1x32x1xf32> to vector<32x1xf32>
    %c0_6 = arith.constant 0 : index
    %c0_7 = arith.constant 0 : index
    %c0_8 = arith.constant 0 : index
    %4 = vector.load %arg4[%c0_6, %c0_7, %c0_8] : memref<1x32x1xf32, #tpu.memory_space<vmem>>, vector<1x32x1xf32>
    %5 = vector.shape_cast %4 : vector<1x32x1xf32> to vector<32x1xf32>
    %cst = arith.constant dense<0.000000e+00> : vector<64xf32>
    %6 = vector.multi_reduction <add>, %1, %cst [0] : vector<32x64xf32> to vector<64xf32>
    %7 = vector.shape_cast %6 : vector<64xf32> to vector<1x64xf32>
    %cst_9 = arith.constant 3.200000e+01 : f32
    %8 = vector.broadcast %cst_9 : f32 to vector<1x64xf32>
    %9 = arith.divf %7, %8 : vector<1x64xf32>
    %10 = vector.broadcast %9 : vector<1x64xf32> to vector<32x64xf32>
    %11 = arith.subf %1, %10 : vector<32x64xf32>
    %12 = arith.mulf %11, %11 : vector<32x64xf32>
    %cst_10 = arith.constant dense<0.000000e+00> : vector<64xf32>
    %13 = vector.multi_reduction <add>, %12, %cst_10 [0] : vector<32x64xf32> to vector<64xf32>
    %14 = vector.shape_cast %13 : vector<64xf32> to vector<1x64xf32>
    %cst_11 = arith.constant 3.200000e+01 : f32
    %15 = vector.broadcast %cst_11 : f32 to vector<1x64xf32>
    %16 = arith.divf %14, %15 : vector<1x64xf32>
    %cst_12 = arith.constant 9.99999974E-6 : f32
    %17 = vector.broadcast %cst_12 : f32 to vector<1x64xf32>
    %18 = arith.addf %16, %17 : vector<1x64xf32>
    %19 = math.rsqrt %18 : vector<1x64xf32>
    %20 = vector.broadcast %19 : vector<1x64xf32> to vector<32x64xf32>
    %21 = arith.mulf %11, %20 : vector<32x64xf32>
    %22 = vector.broadcast %3 : vector<32x1xf32> to vector<32x64xf32>
    %23 = arith.mulf %21, %22 : vector<32x64xf32>
    %24 = vector.broadcast %5 : vector<32x1xf32> to vector<32x64xf32>
    %25 = arith.addf %23, %24 : vector<32x64xf32>
    %26 = arith.truncf %25 : vector<32x64xf32> to vector<32x64xbf16>
    %c0_13 = arith.constant 0 : index
    %c0_14 = arith.constant 0 : index
    %c0_15 = arith.constant 0 : index
    %27 = vector.load %arg7[%c0_13, %c0_14, %c0_15] : memref<1x96x32xbf16, #tpu.memory_space<vmem>>, vector<1x96x32xbf16>
    %28 = vector.shape_cast %27 : vector<1x96x32xbf16> to vector<96x32xbf16>
    %cst_16 = arith.constant dense<0.000000e+00> : vector<96x64xf32>
    %29 = tpu.matmul %28, %26, %cst_16 {dimension_numbers = #tpu.dot_dimension_numbers<[1], [0], [0], [1], [0, 0, 1, 1], [], []>} : vector<96x32xbf16>, vector<32x64xbf16>, vector<96x64xf32> -> vector<96x64xf32>
    %30 = vector.extract_strided_slice %29 {offsets = [0, 0], sizes = [32, 64], strides = [1, 1]} : vector<96x64xf32> to vector<32x64xf32>
    %31 = vector.extract_strided_slice %29 {offsets = [32, 0], sizes = [32, 64], strides = [1, 1]} : vector<96x64xf32> to vector<32x64xf32>
    %32 = vector.extract_strided_slice %29 {offsets = [64, 0], sizes = [32, 64], strides = [1, 1]} : vector<96x64xf32> to vector<32x64xf32>
    %33 = vector.extract_strided_slice %30 {offsets = [0, 0], sizes = [8, 64], strides = [1, 1]} : vector<32x64xf32> to vector<8x64xf32>
    %34 = vector.extract_strided_slice %31 {offsets = [0, 0], sizes = [8, 64], strides = [1, 1]} : vector<32x64xf32> to vector<8x64xf32>
    %35 = vector.extract_strided_slice %32 {offsets = [0, 0], sizes = [8, 64], strides = [1, 1]} : vector<32x64xf32> to vector<8x64xf32>
    %36 = arith.index_cast %arg0 : i32 to index
    %c0_17 = arith.constant 0 : index
    %37 = memref.load %arg9[%36, %c0_17] : memref<2x4xf32, #tpu.memory_space<smem>>
    %38 = arith.mulf %33, %33 : vector<8x64xf32>
    %cst_18 = arith.constant dense<0.000000e+00> : vector<8xf32>
    %39 = vector.multi_reduction <add>, %38, %cst_18 [1] : vector<8x64xf32> to vector<8xf32>
    %40 = vector.shape_cast %39 : vector<8xf32> to vector<8x1xf32>
    %41 = arith.mulf %34, %34 : vector<8x64xf32>
    %cst_19 = arith.constant dense<0.000000e+00> : vector<8xf32>
    %42 = vector.multi_reduction <add>, %41, %cst_19 [1] : vector<8x64xf32> to vector<8xf32>
    %43 = vector.shape_cast %42 : vector<8xf32> to vector<8x1xf32>
    %cst_20 = arith.constant 1.000000e-24 : f32
    %44 = vector.broadcast %cst_20 : f32 to vector<8x1xf32>
    %45 = arith.maximumf %43, %44 : vector<8x1xf32>
    %46 = math.rsqrt %45 : vector<8x1xf32>
    %47 = vector.broadcast %46 : vector<8x1xf32> to vector<8x64xf32>
    %48 = arith.mulf %34, %47 : vector<8x64xf32>
    %49 = arith.truncf %33 : vector<8x64xf32> to vector<8x64xbf16>
    %50 = arith.truncf %48 : vector<8x64xf32> to vector<8x64xbf16>
    %cst_21 = arith.constant dense<0.000000e+00> : vector<8x8xf32>
    %51 = tpu.matmul %49, %50, %cst_21 {dimension_numbers = #tpu.dot_dimension_numbers<[1], [1], [0], [0], [0, 0, 1, 0], [], []>} : vector<8x64xbf16>, vector<8x64xbf16>, vector<8x8xf32> -> vector<8x8xf32>
    %cst_22 = arith.constant 1.000000e-24 : f32
    %52 = vector.broadcast %cst_22 : f32 to vector<8x1xf32>
    %53 = arith.maximumf %40, %52 : vector<8x1xf32>
    %54 = math.rsqrt %53 : vector<8x1xf32>
    %55 = vector.broadcast %37 : f32 to vector<8x1xf32>
    %56 = arith.mulf %55, %54 : vector<8x1xf32>
    %57 = vector.broadcast %56 : vector<8x1xf32> to vector<8x8xf32>
    %58 = arith.mulf %51, %57 : vector<8x8xf32>
    %cst_23 = arith.constant dense<0xFF800000> : vector<8xf32>
    %59 = vector.multi_reduction <maximumf>, %58, %cst_23 [1] : vector<8x8xf32> to vector<8xf32>
    %60 = vector.shape_cast %59 : vector<8xf32> to vector<8x1xf32>
    %61 = vector.broadcast %60 : vector<8x1xf32> to vector<8x8xf32>
    %62 = arith.subf %58, %61 : vector<8x8xf32>
    %63 = math.exp %62 : vector<8x8xf32>
    %cst_24 = arith.constant dense<0.000000e+00> : vector<8xf32>
    %64 = vector.multi_reduction <add>, %63, %cst_24 [1] : vector<8x8xf32> to vector<8xf32>
    %65 = vector.shape_cast %64 : vector<8xf32> to vector<8x1xf32>
    %66 = vector.broadcast %65 : vector<8x1xf32> to vector<8x8xf32>
    %67 = arith.divf %63, %66 : vector<8x8xf32>
    %68 = arith.truncf %67 : vector<8x8xf32> to vector<8x8xbf16>
    %69 = arith.truncf %35 : vector<8x64xf32> to vector<8x64xbf16>
    %cst_25 = arith.constant dense<0.000000e+00> : vector<8x64xf32>
    %70 = tpu.matmul %68, %69, %cst_25 {dimension_numbers = #tpu.dot_dimension_numbers<[1], [0], [0], [1], [0, 0, 1, 1], [], []>} : vector<8x8xbf16>, vector<8x64xbf16>, vector<8x64xf32> -> vector<8x64xf32>
    %c0_26 = arith.constant 0 : index
    %c0_27 = arith.constant 0 : index
    %71 = vector.load %arg11[%c0_26, %c0_27] : memref<32x64xf32, #tpu.memory_space<vmem>>, vector<8x64xf32>
    tpu.vector_store %arg11[%c0_26, %c0_27], %70 {strides = array<i32>} : memref<32x64xf32, #tpu.memory_space<vmem>>, vector<8x64xf32>,
    %72 = vector.extract_strided_slice %30 {offsets = [8, 0], sizes = [8, 64], strides = [1, 1]} : vector<32x64xf32> to vector<8x64xf32>
    %73 = vector.extract_strided_slice %31 {offsets = [8, 0], sizes = [8, 64], strides = [1, 1]} : vector<32x64xf32> to vector<8x64xf32>
    %74 = vector.extract_strided_slice %32 {offsets = [8, 0], sizes = [8, 64], strides = [1, 1]} : vector<32x64xf32> to vector<8x64xf32>
    %75 = arith.index_cast %arg0 : i32 to index
    %c1 = arith.constant 1 : index
    %76 = memref.load %arg9[%75, %c1] : memref<2x4xf32, #tpu.memory_space<smem>>
    %77 = arith.mulf %72, %72 : vector<8x64xf32>
    %cst_28 = arith.constant dense<0.000000e+00> : vector<8xf32>
    %78 = vector.multi_reduction <add>, %77, %cst_28 [1] : vector<8x64xf32> to vector<8xf32>
    %79 = vector.shape_cast %78 : vector<8xf32> to vector<8x1xf32>
    %80 = arith.mulf %73, %73 : vector<8x64xf32>
    %cst_29 = arith.constant dense<0.000000e+00> : vector<8xf32>
    %81 = vector.multi_reduction <add>, %80, %cst_29 [1] : vector<8x64xf32> to vector<8xf32>
    %82 = vector.shape_cast %81 : vector<8xf32> to vector<8x1xf32>
    %cst_30 = arith.constant 1.000000e-24 : f32
    %83 = vector.broadcast %cst_30 : f32 to vector<8x1xf32>
    %84 = arith.maximumf %82, %83 : vector<8x1xf32>
    %85 = math.rsqrt %84 : vector<8x1xf32>
    %86 = vector.broadcast %85 : vector<8x1xf32> to vector<8x64xf32>
    %87 = arith.mulf %73, %86 : vector<8x64xf32>
    %88 = arith.truncf %72 : vector<8x64xf32> to vector<8x64xbf16>
    %89 = arith.truncf %87 : vector<8x64xf32> to vector<8x64xbf16>
    %cst_31 = arith.constant dense<0.000000e+00> : vector<8x8xf32>
    %90 = tpu.matmul %88, %89, %cst_31 {dimension_numbers = #tpu.dot_dimension_numbers<[1], [1], [0], [0], [0, 0, 1, 0], [], []>} : vector<8x64xbf16>, vector<8x64xbf16>, vector<8x8xf32> -> vector<8x8xf32>
    %cst_32 = arith.constant 1.000000e-24 : f32
    %91 = vector.broadcast %cst_32 : f32 to vector<8x1xf32>
    %92 = arith.maximumf %79, %91 : vector<8x1xf32>
    %93 = math.rsqrt %92 : vector<8x1xf32>
    %94 = vector.broadcast %76 : f32 to vector<8x1xf32>
    %95 = arith.mulf %94, %93 : vector<8x1xf32>
    %96 = vector.broadcast %95 : vector<8x1xf32> to vector<8x8xf32>
    %97 = arith.mulf %90, %96 : vector<8x8xf32>
    %cst_33 = arith.constant dense<0xFF800000> : vector<8xf32>
    %98 = vector.multi_reduction <maximumf>, %97, %cst_33 [1] : vector<8x8xf32> to vector<8xf32>
    %99 = vector.shape_cast %98 : vector<8xf32> to vector<8x1xf32>
    %100 = vector.broadcast %99 : vector<8x1xf32> to vector<8x8xf32>
    %101 = arith.subf %97, %100 : vector<8x8xf32>
    %102 = math.exp %101 : vector<8x8xf32>
    %cst_34 = arith.constant dense<0.000000e+00> : vector<8xf32>
    %103 = vector.multi_reduction <add>, %102, %cst_34 [1] : vector<8x8xf32> to vector<8xf32>
    %104 = vector.shape_cast %103 : vector<8xf32> to vector<8x1xf32>
    %105 = vector.broadcast %104 : vector<8x1xf32> to vector<8x8xf32>
    %106 = arith.divf %102, %105 : vector<8x8xf32>
    %107 = arith.truncf %106 : vector<8x8xf32> to vector<8x8xbf16>
    %108 = arith.truncf %74 : vector<8x64xf32> to vector<8x64xbf16>
    %cst_35 = arith.constant dense<0.000000e+00> : vector<8x64xf32>
    %109 = tpu.matmul %107, %108, %cst_35 {dimension_numbers = #tpu.dot_dimension_numbers<[1], [0], [0], [1], [0, 0, 1, 1], [], []>} : vector<8x8xbf16>, vector<8x64xbf16>, vector<8x64xf32> -> vector<8x64xf32>
    %c8 = arith.constant 8 : index
    %c0_36 = arith.constant 0 : index
    %110 = vector.load %arg11[%c8, %c0_36] : memref<32x64xf32, #tpu.memory_space<vmem>>, vector<8x64xf32>
    tpu.vector_store %arg11[%c8, %c0_36], %109 {strides = array<i32>} : memref<32x64xf32, #tpu.memory_space<vmem>>, vector<8x64xf32>,
    %111 = vector.extract_strided_slice %30 {offsets = [16, 0], sizes = [8, 64], strides = [1, 1]} : vector<32x64xf32> to vector<8x64xf32>
    %112 = vector.extract_strided_slice %31 {offsets = [16, 0], sizes = [8, 64], strides = [1, 1]} : vector<32x64xf32> to vector<8x64xf32>
    %113 = vector.extract_strided_slice %32 {offsets = [16, 0], sizes = [8, 64], strides = [1, 1]} : vector<32x64xf32> to vector<8x64xf32>
    %114 = arith.index_cast %arg0 : i32 to index
    %c2 = arith.constant 2 : index
    %115 = memref.load %arg9[%114, %c2] : memref<2x4xf32, #tpu.memory_space<smem>>
    %116 = arith.mulf %111, %111 : vector<8x64xf32>
    %cst_37 = arith.constant dense<0.000000e+00> : vector<8xf32>
    %117 = vector.multi_reduction <add>, %116, %cst_37 [1] : vector<8x64xf32> to vector<8xf32>
    %118 = vector.shape_cast %117 : vector<8xf32> to vector<8x1xf32>
    %119 = arith.mulf %112, %112 : vector<8x64xf32>
    %cst_38 = arith.constant dense<0.000000e+00> : vector<8xf32>
    %120 = vector.multi_reduction <add>, %119, %cst_38 [1] : vector<8x64xf32> to vector<8xf32>
    %121 = vector.shape_cast %120 : vector<8xf32> to vector<8x1xf32>
    %cst_39 = arith.constant 1.000000e-24 : f32
    %122 = vector.broadcast %cst_39 : f32 to vector<8x1xf32>
    %123 = arith.maximumf %121, %122 : vector<8x1xf32>
    %124 = math.rsqrt %123 : vector<8x1xf32>
    %125 = vector.broadcast %124 : vector<8x1xf32> to vector<8x64xf32>
    %126 = arith.mulf %112, %125 : vector<8x64xf32>
    %127 = arith.truncf %111 : vector<8x64xf32> to vector<8x64xbf16>
    %128 = arith.truncf %126 : vector<8x64xf32> to vector<8x64xbf16>
    %cst_40 = arith.constant dense<0.000000e+00> : vector<8x8xf32>
    %129 = tpu.matmul %127, %128, %cst_40 {dimension_numbers = #tpu.dot_dimension_numbers<[1], [1], [0], [0], [0, 0, 1, 0], [], []>} : vector<8x64xbf16>, vector<8x64xbf16>, vector<8x8xf32> -> vector<8x8xf32>
    %cst_41 = arith.constant 1.000000e-24 : f32
    %130 = vector.broadcast %cst_41 : f32 to vector<8x1xf32>
    %131 = arith.maximumf %118, %130 : vector<8x1xf32>
    %132 = math.rsqrt %131 : vector<8x1xf32>
    %133 = vector.broadcast %115 : f32 to vector<8x1xf32>
    %134 = arith.mulf %133, %132 : vector<8x1xf32>
    %135 = vector.broadcast %134 : vector<8x1xf32> to vector<8x8xf32>
    %136 = arith.mulf %129, %135 : vector<8x8xf32>
    %cst_42 = arith.constant dense<0xFF800000> : vector<8xf32>
    %137 = vector.multi_reduction <maximumf>, %136, %cst_42 [1] : vector<8x8xf32> to vector<8xf32>
    %138 = vector.shape_cast %137 : vector<8xf32> to vector<8x1xf32>
    %139 = vector.broadcast %138 : vector<8x1xf32> to vector<8x8xf32>
    %140 = arith.subf %136, %139 : vector<8x8xf32>
    %141 = math.exp %140 : vector<8x8xf32>
    %cst_43 = arith.constant dense<0.000000e+00> : vector<8xf32>
    %142 = vector.multi_reduction <add>, %141, %cst_43 [1] : vector<8x8xf32> to vector<8xf32>
    %143 = vector.shape_cast %142 : vector<8xf32> to vector<8x1xf32>
    %144 = vector.broadcast %143 : vector<8x1xf32> to vector<8x8xf32>
    %145 = arith.divf %141, %144 : vector<8x8xf32>
    %146 = arith.truncf %145 : vector<8x8xf32> to vector<8x8xbf16>
    %147 = arith.truncf %113 : vector<8x64xf32> to vector<8x64xbf16>
    %cst_44 = arith.constant dense<0.000000e+00> : vector<8x64xf32>
    %148 = tpu.matmul %146, %147, %cst_44 {dimension_numbers = #tpu.dot_dimension_numbers<[1], [0], [0], [1], [0, 0, 1, 1], [], []>} : vector<8x8xbf16>, vector<8x64xbf16>, vector<8x64xf32> -> vector<8x64xf32>
    %c16 = arith.constant 16 : index
    %c0_45 = arith.constant 0 : index
    %149 = vector.load %arg11[%c16, %c0_45] : memref<32x64xf32, #tpu.memory_space<vmem>>, vector<8x64xf32>
    tpu.vector_store %arg11[%c16, %c0_45], %148 {strides = array<i32>} : memref<32x64xf32, #tpu.memory_space<vmem>>, vector<8x64xf32>,
    %150 = vector.extract_strided_slice %30 {offsets = [24, 0], sizes = [8, 64], strides = [1, 1]} : vector<32x64xf32> to vector<8x64xf32>
    %151 = vector.extract_strided_slice %31 {offsets = [24, 0], sizes = [8, 64], strides = [1, 1]} : vector<32x64xf32> to vector<8x64xf32>
    %152 = vector.extract_strided_slice %32 {offsets = [24, 0], sizes = [8, 64], strides = [1, 1]} : vector<32x64xf32> to vector<8x64xf32>
    %153 = arith.index_cast %arg0 : i32 to index
    %c3 = arith.constant 3 : index
    %154 = memref.load %arg9[%153, %c3] : memref<2x4xf32, #tpu.memory_space<smem>>
    %155 = arith.mulf %150, %150 : vector<8x64xf32>
    %cst_46 = arith.constant dense<0.000000e+00> : vector<8xf32>
    %156 = vector.multi_reduction <add>, %155, %cst_46 [1] : vector<8x64xf32> to vector<8xf32>
    %157 = vector.shape_cast %156 : vector<8xf32> to vector<8x1xf32>
    %158 = arith.mulf %151, %151 : vector<8x64xf32>
    %cst_47 = arith.constant dense<0.000000e+00> : vector<8xf32>
    %159 = vector.multi_reduction <add>, %158, %cst_47 [1] : vector<8x64xf32> to vector<8xf32>
    %160 = vector.shape_cast %159 : vector<8xf32> to vector<8x1xf32>
    %cst_48 = arith.constant 1.000000e-24 : f32
    %161 = vector.broadcast %cst_48 : f32 to vector<8x1xf32>
    %162 = arith.maximumf %160, %161 : vector<8x1xf32>
    %163 = math.rsqrt %162 : vector<8x1xf32>
    %164 = vector.broadcast %163 : vector<8x1xf32> to vector<8x64xf32>
    %165 = arith.mulf %151, %164 : vector<8x64xf32>
    %166 = arith.truncf %150 : vector<8x64xf32> to vector<8x64xbf16>
    %167 = arith.truncf %165 : vector<8x64xf32> to vector<8x64xbf16>
    %cst_49 = arith.constant dense<0.000000e+00> : vector<8x8xf32>
    %168 = tpu.matmul %166, %167, %cst_49 {dimension_numbers = #tpu.dot_dimension_numbers<[1], [1], [0], [0], [0, 0, 1, 0], [], []>} : vector<8x64xbf16>, vector<8x64xbf16>, vector<8x8xf32> -> vector<8x8xf32>
    %cst_50 = arith.constant 1.000000e-24 : f32
    %169 = vector.broadcast %cst_50 : f32 to vector<8x1xf32>
    %170 = arith.maximumf %157, %169 : vector<8x1xf32>
    %171 = math.rsqrt %170 : vector<8x1xf32>
    %172 = vector.broadcast %154 : f32 to vector<8x1xf32>
    %173 = arith.mulf %172, %171 : vector<8x1xf32>
    %174 = vector.broadcast %173 : vector<8x1xf32> to vector<8x8xf32>
    %175 = arith.mulf %168, %174 : vector<8x8xf32>
    %cst_51 = arith.constant dense<0xFF800000> : vector<8xf32>
    %176 = vector.multi_reduction <maximumf>, %175, %cst_51 [1] : vector<8x8xf32> to vector<8xf32>
    %177 = vector.shape_cast %176 : vector<8xf32> to vector<8x1xf32>
    %178 = vector.broadcast %177 : vector<8x1xf32> to vector<8x8xf32>
    %179 = arith.subf %175, %178 : vector<8x8xf32>
    %180 = math.exp %179 : vector<8x8xf32>
    %cst_52 = arith.constant dense<0.000000e+00> : vector<8xf32>
    %181 = vector.multi_reduction <add>, %180, %cst_52 [1] : vector<8x8xf32> to vector<8xf32>
    %182 = vector.shape_cast %181 : vector<8xf32> to vector<8x1xf32>
    %183 = vector.broadcast %182 : vector<8x1xf32> to vector<8x8xf32>
    %184 = arith.divf %180, %183 : vector<8x8xf32>
    %185 = arith.truncf %184 : vector<8x8xf32> to vector<8x8xbf16>
    %186 = arith.truncf %152 : vector<8x64xf32> to vector<8x64xbf16>
    %cst_53 = arith.constant dense<0.000000e+00> : vector<8x64xf32>
    %187 = tpu.matmul %185, %186, %cst_53 {dimension_numbers = #tpu.dot_dimension_numbers<[1], [0], [0], [1], [0, 0, 1, 1], [], []>} : vector<8x8xbf16>, vector<8x64xbf16>, vector<8x64xf32> -> vector<8x64xf32>
    %c24 = arith.constant 24 : index
    %c0_54 = arith.constant 0 : index
    %188 = vector.load %arg11[%c24, %c0_54] : memref<32x64xf32, #tpu.memory_space<vmem>>, vector<8x64xf32>
    tpu.vector_store %arg11[%c24, %c0_54], %187 {strides = array<i32>} : memref<32x64xf32, #tpu.memory_space<vmem>>, vector<8x64xf32>,
    %c0_55 = arith.constant 0 : index
    %c0_56 = arith.constant 0 : index
    %c0_57 = arith.constant 0 : index
    %189 = vector.load %arg8[%c0_55, %c0_56, %c0_57] : memref<1x32x32xbf16, #tpu.memory_space<vmem>>, vector<1x32x32xbf16>
    %190 = vector.shape_cast %189 : vector<1x32x32xbf16> to vector<32x32xbf16>
    %c0_58 = arith.constant 0 : index
    %c0_59 = arith.constant 0 : index
    %191 = vector.load %arg11[%c0_58, %c0_59] : memref<32x64xf32, #tpu.memory_space<vmem>>, vector<32x64xf32>
    %192 = arith.truncf %191 : vector<32x64xf32> to vector<32x64xbf16>
    %cst_60 = arith.constant dense<0.000000e+00> : vector<32x64xf32>
    %193 = tpu.matmul %190, %192, %cst_60 {dimension_numbers = #tpu.dot_dimension_numbers<[1], [0], [0], [1], [0, 0, 1, 1], [], []>} : vector<32x32xbf16>, vector<32x64xbf16>, vector<32x64xf32> -> vector<32x64xf32>
    %194 = arith.addf %25, %193 : vector<32x64xf32>
    %c0_61 = arith.constant 0 : index
    %c0_62 = arith.constant 0 : index
    %c0_63 = arith.constant 0 : index
    %195 = vector.load %arg5[%c0_61, %c0_62, %c0_63] : memref<1x32x1xf32, #tpu.memory_space<vmem>>, vector<1x32x1xf32>
    %196 = vector.shape_cast %195 : vector<1x32x1xf32> to vector<32x1xf32>
    %c0_64 = arith.constant 0 : index
    %c0_65 = arith.constant 0 : index
    %c0_66 = arith.constant 0 : index
    %197 = vector.load %arg6[%c0_64, %c0_65, %c0_66] : memref<1x32x1xf32, #tpu.memory_space<vmem>>, vector<1x32x1xf32>
    %198 = vector.shape_cast %197 : vector<1x32x1xf32> to vector<32x1xf32>
    %cst_67 = arith.constant dense<0.000000e+00> : vector<64xf32>
    %199 = vector.multi_reduction <add>, %194, %cst_67 [0] : vector<32x64xf32> to vector<64xf32>
    %200 = vector.shape_cast %199 : vector<64xf32> to vector<1x64xf32>
    %cst_68 = arith.constant 3.200000e+01 : f32
    %201 = vector.broadcast %cst_68 : f32 to vector<1x64xf32>
    %202 = arith.divf %200, %201 : vector<1x64xf32>
    %203 = vector.broadcast %202 : vector<1x64xf32> to vector<32x64xf32>
    %204 = arith.subf %194, %203 : vector<32x64xf32>
    %205 = arith.mulf %204, %204 : vector<32x64xf32>
    %cst_69 = arith.constant dense<0.000000e+00> : vector<64xf32>
    %206 = vector.multi_reduction <add>, %205, %cst_69 [0] : vector<32x64xf32> to vector<64xf32>
    %207 = vector.shape_cast %206 : vector<64xf32> to vector<1x64xf32>
    %cst_70 = arith.constant 3.200000e+01 : f32
    %208 = vector.broadcast %cst_70 : f32 to vector<1x64xf32>
    %209 = arith.divf %207, %208 : vector<1x64xf32>
    %cst_71 = arith.constant 9.99999974E-6 : f32
    %210 = vector.broadcast %cst_71 : f32 to vector<1x64xf32>
    %211 = arith.addf %209, %210 : vector<1x64xf32>
    %212 = math.rsqrt %211 : vector<1x64xf32>
    %213 = vector.broadcast %212 : vector<1x64xf32> to vector<32x64xf32>
    %214 = arith.mulf %204, %213 : vector<32x64xf32>
    %215 = vector.broadcast %196 : vector<32x1xf32> to vector<32x64xf32>
    %216 = arith.mulf %214, %215 : vector<32x64xf32>
    %217 = vector.broadcast %198 : vector<32x1xf32> to vector<32x64xf32>
    %218 = arith.addf %216, %217 : vector<32x64xf32>
    %c0_72 = arith.constant 0 : index
    %c0_73 = arith.constant 0 : index
    %c0_74 = arith.constant 0 : index
    %c0_75 = arith.constant 0 : index
    %219 = vector.load %arg10[%c0_72, %c0_73, %c0_74, %c0_75] : memref<1x1x32x64xf32, #tpu.memory_space<vmem>>, vector<1x1x32x64xf32>
    %220 = vector.shape_cast %219 : vector<1x1x32x64xf32> to vector<32x64xf32>
    %221 = vector.shape_cast %218 : vector<32x64xf32> to vector<1x1x32x64xf32>
    tpu.vector_store %arg10[%c0_72, %c0_73, %c0_74, %c0_75], %221 {strides = array<i32>} : memref<1x1x32x64xf32, #tpu.memory_space<vmem>>, vector<1x1x32x64xf32>,
    return
  }
  func.func @transform_0(%arg0: i32, %arg1: i32) -> (i32, i32, i32, i32) {
    %c0_i32 = arith.constant 0 : i32
    %c0_i32_0 = arith.constant 0 : i32
    %c0_i32_1 = arith.constant 0 : i32
    return %arg0, %arg1, %c0_i32, %c0_i32_0 : i32, i32, i32, i32
  }
  func.func @transform_1(%arg0: i32, %arg1: i32) -> (i32, i32, i32) {
    %c0_i32 = arith.constant 0 : i32
    %c0_i32_0 = arith.constant 0 : i32
    %c0_i32_1 = arith.constant 0 : i32
    return %arg0, %c0_i32, %c0_i32_0 : i32, i32, i32
  }
  func.func @transform_2(%arg0: i32, %arg1: i32) -> (i32, i32, i32) {
    %c0_i32 = arith.constant 0 : i32
    %c0_i32_0 = arith.constant 0 : i32
    %c0_i32_1 = arith.constant 0 : i32
    return %arg0, %c0_i32, %c0_i32_0 : i32, i32, i32
  }
  func.func @transform_3(%arg0: i32, %arg1: i32) -> (i32, i32, i32) {
    %c0_i32 = arith.constant 0 : i32
    %c0_i32_0 = arith.constant 0 : i32
    %c0_i32_1 = arith.constant 0 : i32
    return %arg0, %c0_i32, %c0_i32_0 : i32, i32, i32
  }
  func.func @transform_4(%arg0: i32, %arg1: i32) -> (i32, i32, i32) {
    %c0_i32 = arith.constant 0 : i32
    %c0_i32_0 = arith.constant 0 : i32
    %c0_i32_1 = arith.constant 0 : i32
    return %arg0, %c0_i32, %c0_i32_0 : i32, i32, i32
  }
  func.func @transform_5(%arg0: i32, %arg1: i32) -> (i32, i32, i32) {
    %c0_i32 = arith.constant 0 : i32
    %c0_i32_0 = arith.constant 0 : i32
    %c0_i32_1 = arith.constant 0 : i32
    return %arg0, %c0_i32, %c0_i32_0 : i32, i32, i32
  }
  func.func @transform_6(%arg0: i32, %arg1: i32) -> (i32, i32, i32) {
    %c0_i32 = arith.constant 0 : i32
    %c0_i32_0 = arith.constant 0 : i32
    %c0_i32_1 = arith.constant 0 : i32
    return %arg0, %c0_i32, %c0_i32_0 : i32, i32, i32
  }
  func.func @transform_7(%arg0: i32, %arg1: i32) -> (i32, i32) {
    %c0_i32 = arith.constant 0 : i32
    %c0_i32_0 = arith.constant 0 : i32
    %c0_i32_1 = arith.constant 0 : i32
    return %c0_i32, %c0_i32_0 : i32, i32
  }
  func.func @transform_8(%arg0: i32, %arg1: i32) -> (i32, i32, i32, i32) {
    %c0_i32 = arith.constant 0 : i32
    %c0_i32_0 = arith.constant 0 : i32
    %c0_i32_1 = arith.constant 0 : i32
    return %arg0, %arg1, %c0_i32, %c0_i32_0 : i32, i32, i32, i32
  }
}

module attributes {stable_mosaic.version = 11 : i64} {
  func.func @_mlp_kernel(%arg0: i32, %arg1: i32, %arg2: memref<1x1x32x64xf32, #tpu.memory_space<vmem>>, %arg3: memref<2x64xf32, #tpu.memory_space<vmem>>, %arg4: memref<1x32x1xf32, #tpu.memory_space<vmem>>, %arg5: memref<1x32x1xf32, #tpu.memory_space<vmem>>, %arg6: memref<1x64x32xbf16, #tpu.memory_space<vmem>>, %arg7: memref<1x64x1xf32, #tpu.memory_space<vmem>>, %arg8: memref<1x64x9xf32, #tpu.memory_space<vmem>>, %arg9: memref<1x64x1xf32, #tpu.memory_space<vmem>>, %arg10: memref<1x32x64xbf16, #tpu.memory_space<vmem>>, %arg11: memref<1x32x1xf32, #tpu.memory_space<vmem>>, %arg12: memref<1x1x32x64xf32, #tpu.memory_space<vmem>>) attributes {dimension_semantics = [#tpu.dimension_semantics<parallel>, #tpu.dimension_semantics<parallel>], iteration_bounds = array<i64: 2, 2>, scalar_prefetch = 0 : i64, scratch_operands = 0 : i64, tpu.core_type = #tpu.core_type<tc>, window_params = [{transform_indices = @transform_0, window_bounds = array<i64: 1, 1, 32, 64>}, {pipeline_mode = #tpu.pipeline_mode<synchronous>, transform_indices = @transform_1, window_bounds = array<i64: 2, 64>}, {transform_indices = @transform_2, window_bounds = array<i64: 1, 32, 1>}, {transform_indices = @transform_3, window_bounds = array<i64: 1, 32, 1>}, {transform_indices = @transform_4, window_bounds = array<i64: 1, 64, 32>}, {transform_indices = @transform_5, window_bounds = array<i64: 1, 64, 1>}, {transform_indices = @transform_6, window_bounds = array<i64: 1, 64, 9>}, {transform_indices = @transform_7, window_bounds = array<i64: 1, 64, 1>}, {transform_indices = @transform_8, window_bounds = array<i64: 1, 32, 64>}, {transform_indices = @transform_9, window_bounds = array<i64: 1, 32, 1>}, {transform_indices = @transform_10, window_bounds = array<i64: 1, 1, 32, 64>}]} {
    %c0 = arith.constant 0 : index
    %c0_0 = arith.constant 0 : index
    %c0_1 = arith.constant 0 : index
    %c0_2 = arith.constant 0 : index
    %0 = vector.load %arg2[%c0, %c0_0, %c0_1, %c0_2] : memref<1x1x32x64xf32, #tpu.memory_space<vmem>>, vector<1x1x32x64xf32>
    %1 = vector.shape_cast %0 : vector<1x1x32x64xf32> to vector<32x64xf32>
    %c0_3 = arith.constant 0 : index
    %c0_4 = arith.constant 0 : index
    %c0_5 = arith.constant 0 : index
    %2 = vector.load %arg4[%c0_3, %c0_4, %c0_5] : memref<1x32x1xf32, #tpu.memory_space<vmem>>, vector<1x32x1xf32>
    %3 = vector.shape_cast %2 : vector<1x32x1xf32> to vector<32x1xf32>
    %c0_6 = arith.constant 0 : index
    %c0_7 = arith.constant 0 : index
    %c0_8 = arith.constant 0 : index
    %4 = vector.load %arg5[%c0_6, %c0_7, %c0_8] : memref<1x32x1xf32, #tpu.memory_space<vmem>>, vector<1x32x1xf32>
    %5 = vector.shape_cast %4 : vector<1x32x1xf32> to vector<32x1xf32>
    %cst = arith.constant dense<0.000000e+00> : vector<64xf32>
    %6 = vector.multi_reduction <add>, %1, %cst [0] : vector<32x64xf32> to vector<64xf32>
    %7 = vector.shape_cast %6 : vector<64xf32> to vector<1x64xf32>
    %cst_9 = arith.constant 3.200000e+01 : f32
    %8 = vector.broadcast %cst_9 : f32 to vector<1x64xf32>
    %9 = arith.divf %7, %8 : vector<1x64xf32>
    %10 = vector.broadcast %9 : vector<1x64xf32> to vector<32x64xf32>
    %11 = arith.subf %1, %10 : vector<32x64xf32>
    %12 = arith.mulf %11, %11 : vector<32x64xf32>
    %cst_10 = arith.constant dense<0.000000e+00> : vector<64xf32>
    %13 = vector.multi_reduction <add>, %12, %cst_10 [0] : vector<32x64xf32> to vector<64xf32>
    %14 = vector.shape_cast %13 : vector<64xf32> to vector<1x64xf32>
    %cst_11 = arith.constant 3.200000e+01 : f32
    %15 = vector.broadcast %cst_11 : f32 to vector<1x64xf32>
    %16 = arith.divf %14, %15 : vector<1x64xf32>
    %cst_12 = arith.constant 9.99999974E-6 : f32
    %17 = vector.broadcast %cst_12 : f32 to vector<1x64xf32>
    %18 = arith.addf %16, %17 : vector<1x64xf32>
    %19 = math.rsqrt %18 : vector<1x64xf32>
    %20 = vector.broadcast %19 : vector<1x64xf32> to vector<32x64xf32>
    %21 = arith.mulf %11, %20 : vector<32x64xf32>
    %22 = vector.broadcast %3 : vector<32x1xf32> to vector<32x64xf32>
    %23 = arith.mulf %21, %22 : vector<32x64xf32>
    %24 = vector.broadcast %5 : vector<32x1xf32> to vector<32x64xf32>
    %25 = arith.addf %23, %24 : vector<32x64xf32>
    %c0_13 = arith.constant 0 : index
    %c0_14 = arith.constant 0 : index
    %c0_15 = arith.constant 0 : index
    %26 = vector.load %arg6[%c0_13, %c0_14, %c0_15] : memref<1x64x32xbf16, #tpu.memory_space<vmem>>, vector<1x64x32xbf16>
    %27 = vector.shape_cast %26 : vector<1x64x32xbf16> to vector<64x32xbf16>
    %28 = arith.truncf %25 : vector<32x64xf32> to vector<32x64xbf16>
    %cst_16 = arith.constant dense<0.000000e+00> : vector<64x64xf32>
    %29 = tpu.matmul %27, %28, %cst_16 {dimension_numbers = #tpu.dot_dimension_numbers<[1], [0], [0], [1], [0, 0, 1, 1], [], []>} : vector<64x32xbf16>, vector<32x64xbf16>, vector<64x64xf32> -> vector<64x64xf32>
    %c0_17 = arith.constant 0 : index
    %c0_18 = arith.constant 0 : index
    %c0_19 = arith.constant 0 : index
    %30 = vector.load %arg7[%c0_17, %c0_18, %c0_19] : memref<1x64x1xf32, #tpu.memory_space<vmem>>, vector<1x64x1xf32>
    %31 = vector.shape_cast %30 : vector<1x64x1xf32> to vector<64x1xf32>
    %32 = vector.broadcast %31 : vector<64x1xf32> to vector<64x64xf32>
    %33 = arith.addf %29, %32 : vector<64x64xf32>
    %cst_20 = arith.constant 5.000000e-01 : f32
    %34 = vector.broadcast %cst_20 : f32 to vector<64x64xf32>
    %35 = arith.mulf %34, %33 : vector<64x64xf32>
    %cst_21 = arith.constant 0.707106769 : f32
    %36 = vector.broadcast %cst_21 : f32 to vector<64x64xf32>
    %37 = arith.mulf %33, %36 : vector<64x64xf32>
    %38 = math.erf %37 : vector<64x64xf32>
    %cst_22 = arith.constant 1.000000e+00 : f32
    %39 = vector.broadcast %cst_22 : f32 to vector<64x64xf32>
    %40 = arith.addf %39, %38 : vector<64x64xf32>
    %41 = arith.mulf %35, %40 : vector<64x64xf32>
    %c0_23 = arith.constant 0 : index
    %c0_24 = arith.constant 0 : index
    %42 = vector.load %arg3[%c0_23, %c0_24] : memref<2x64xf32, #tpu.memory_space<vmem>>, vector<2x64xf32>
    %43 = vector.extract_strided_slice %42 {offsets = [0, 0], sizes = [1, 64], strides = [1, 1]} : vector<2x64xf32> to vector<1x64xf32>
    %44 = vector.extract_strided_slice %42 {offsets = [1, 0], sizes = [1, 64], strides = [1, 1]} : vector<2x64xf32> to vector<1x64xf32>
    %c0_25 = arith.constant 0 : index
    %c0_26 = arith.constant 0 : index
    %c0_27 = arith.constant 0 : index
    %45 = vector.load %arg8[%c0_25, %c0_26, %c0_27] : memref<1x64x9xf32, #tpu.memory_space<vmem>>, vector<1x64x9xf32>
    %46 = vector.shape_cast %45 : vector<1x64x9xf32> to vector<64x9xf32>
    %cst_28 = arith.constant 0.000000e+00 : f32
    %47 = vector.broadcast %cst_28 : f32 to vector<64x64xf32>
    %c9_i32 = arith.constant 9 : i32
    %48 = tpu.dynamic_rotate %41 by %c9_i32 dim 1 : vector<64x64xf32>, i32 -> vector<64x64xf32>
    %cst_29 = arith.constant 1.000000e+00 : f32
    %49 = vector.broadcast %cst_29 : f32 to vector<1x64xf32>
    %50 = arith.cmpf oge, %43, %49 : vector<1x64xf32>
    %cst_30 = arith.constant 8.000000e+00 : f32
    %51 = vector.broadcast %cst_30 : f32 to vector<1x64xf32>
    %52 = arith.cmpf ole, %43, %51 : vector<1x64xf32>
    %53 = arith.andi %50, %52 : vector<1x64xi1>
    %cst_31 = arith.constant 1.000000e+00 : f32
    %54 = vector.broadcast %cst_31 : f32 to vector<1x64xf32>
    %55 = arith.cmpf oge, %44, %54 : vector<1x64xf32>
    %56 = arith.andi %53, %55 : vector<1x64xi1>
    %cst_32 = arith.constant 8.000000e+00 : f32
    %57 = vector.broadcast %cst_32 : f32 to vector<1x64xf32>
    %58 = arith.cmpf ole, %44, %57 : vector<1x64xf32>
    %59 = arith.andi %56, %58 : vector<1x64xi1>
    %cst_33 = arith.constant 0.000000e+00 : f32
    %60 = vector.shape_cast %59 : vector<1x64xi1> to vector<1x64xi1>
    %61 = vector.broadcast %60 : vector<1x64xi1> to vector<64x64xi1>
    %62 = vector.broadcast %cst_33 : f32 to vector<64x64xf32>
    %63 = arith.select %61, %48, %62 : vector<64x64xi1>, vector<64x64xf32>
    %64 = vector.extract_strided_slice %46 {offsets = [0, 0], sizes = [64, 1], strides = [1, 1]} : vector<64x9xf32> to vector<64x1xf32>
    %65 = vector.broadcast %64 : vector<64x1xf32> to vector<64x64xf32>
    %66 = arith.mulf %63, %65 : vector<64x64xf32>
    %67 = arith.addf %47, %66 : vector<64x64xf32>
    %c8_i32 = arith.constant 8 : i32
    %68 = tpu.dynamic_rotate %41 by %c8_i32 dim 1 : vector<64x64xf32>, i32 -> vector<64x64xf32>
    %cst_34 = arith.constant 1.000000e+00 : f32
    %69 = vector.broadcast %cst_34 : f32 to vector<1x64xf32>
    %70 = arith.cmpf oge, %43, %69 : vector<1x64xf32>
    %cst_35 = arith.constant 8.000000e+00 : f32
    %71 = vector.broadcast %cst_35 : f32 to vector<1x64xf32>
    %72 = arith.cmpf ole, %43, %71 : vector<1x64xf32>
    %73 = arith.andi %70, %72 : vector<1x64xi1>
    %cst_36 = arith.constant 0.000000e+00 : f32
    %74 = vector.broadcast %cst_36 : f32 to vector<1x64xf32>
    %75 = arith.cmpf oge, %44, %74 : vector<1x64xf32>
    %76 = arith.andi %73, %75 : vector<1x64xi1>
    %cst_37 = arith.constant 7.000000e+00 : f32
    %77 = vector.broadcast %cst_37 : f32 to vector<1x64xf32>
    %78 = arith.cmpf ole, %44, %77 : vector<1x64xf32>
    %79 = arith.andi %76, %78 : vector<1x64xi1>
    %cst_38 = arith.constant 0.000000e+00 : f32
    %80 = vector.shape_cast %79 : vector<1x64xi1> to vector<1x64xi1>
    %81 = vector.broadcast %80 : vector<1x64xi1> to vector<64x64xi1>
    %82 = vector.broadcast %cst_38 : f32 to vector<64x64xf32>
    %83 = arith.select %81, %68, %82 : vector<64x64xi1>, vector<64x64xf32>
    %84 = vector.extract_strided_slice %46 {offsets = [0, 1], sizes = [64, 1], strides = [1, 1]} : vector<64x9xf32> to vector<64x1xf32>
    %85 = vector.broadcast %84 : vector<64x1xf32> to vector<64x64xf32>
    %86 = arith.mulf %83, %85 : vector<64x64xf32>
    %87 = arith.addf %67, %86 : vector<64x64xf32>
    %c7_i32 = arith.constant 7 : i32
    %88 = tpu.dynamic_rotate %41 by %c7_i32 dim 1 : vector<64x64xf32>, i32 -> vector<64x64xf32>
    %cst_39 = arith.constant 1.000000e+00 : f32
    %89 = vector.broadcast %cst_39 : f32 to vector<1x64xf32>
    %90 = arith.cmpf oge, %43, %89 : vector<1x64xf32>
    %cst_40 = arith.constant 8.000000e+00 : f32
    %91 = vector.broadcast %cst_40 : f32 to vector<1x64xf32>
    %92 = arith.cmpf ole, %43, %91 : vector<1x64xf32>
    %93 = arith.andi %90, %92 : vector<1x64xi1>
    %cst_41 = arith.constant -1.000000e+00 : f32
    %94 = vector.broadcast %cst_41 : f32 to vector<1x64xf32>
    %95 = arith.cmpf oge, %44, %94 : vector<1x64xf32>
    %96 = arith.andi %93, %95 : vector<1x64xi1>
    %cst_42 = arith.constant 6.000000e+00 : f32
    %97 = vector.broadcast %cst_42 : f32 to vector<1x64xf32>
    %98 = arith.cmpf ole, %44, %97 : vector<1x64xf32>
    %99 = arith.andi %96, %98 : vector<1x64xi1>
    %cst_43 = arith.constant 0.000000e+00 : f32
    %100 = vector.shape_cast %99 : vector<1x64xi1> to vector<1x64xi1>
    %101 = vector.broadcast %100 : vector<1x64xi1> to vector<64x64xi1>
    %102 = vector.broadcast %cst_43 : f32 to vector<64x64xf32>
    %103 = arith.select %101, %88, %102 : vector<64x64xi1>, vector<64x64xf32>
    %104 = vector.extract_strided_slice %46 {offsets = [0, 2], sizes = [64, 1], strides = [1, 1]} : vector<64x9xf32> to vector<64x1xf32>
    %105 = vector.broadcast %104 : vector<64x1xf32> to vector<64x64xf32>
    %106 = arith.mulf %103, %105 : vector<64x64xf32>
    %107 = arith.addf %87, %106 : vector<64x64xf32>
    %c1_i32 = arith.constant 1 : i32
    %108 = tpu.dynamic_rotate %41 by %c1_i32 dim 1 : vector<64x64xf32>, i32 -> vector<64x64xf32>
    %cst_44 = arith.constant 0.000000e+00 : f32
    %109 = vector.broadcast %cst_44 : f32 to vector<1x64xf32>
    %110 = arith.cmpf oge, %43, %109 : vector<1x64xf32>
    %cst_45 = arith.constant 7.000000e+00 : f32
    %111 = vector.broadcast %cst_45 : f32 to vector<1x64xf32>
    %112 = arith.cmpf ole, %43, %111 : vector<1x64xf32>
    %113 = arith.andi %110, %112 : vector<1x64xi1>
    %cst_46 = arith.constant 1.000000e+00 : f32
    %114 = vector.broadcast %cst_46 : f32 to vector<1x64xf32>
    %115 = arith.cmpf oge, %44, %114 : vector<1x64xf32>
    %116 = arith.andi %113, %115 : vector<1x64xi1>
    %cst_47 = arith.constant 8.000000e+00 : f32
    %117 = vector.broadcast %cst_47 : f32 to vector<1x64xf32>
    %118 = arith.cmpf ole, %44, %117 : vector<1x64xf32>
    %119 = arith.andi %116, %118 : vector<1x64xi1>
    %cst_48 = arith.constant 0.000000e+00 : f32
    %120 = vector.shape_cast %119 : vector<1x64xi1> to vector<1x64xi1>
    %121 = vector.broadcast %120 : vector<1x64xi1> to vector<64x64xi1>
    %122 = vector.broadcast %cst_48 : f32 to vector<64x64xf32>
    %123 = arith.select %121, %108, %122 : vector<64x64xi1>, vector<64x64xf32>
    %124 = vector.extract_strided_slice %46 {offsets = [0, 3], sizes = [64, 1], strides = [1, 1]} : vector<64x9xf32> to vector<64x1xf32>
    %125 = vector.broadcast %124 : vector<64x1xf32> to vector<64x64xf32>
    %126 = arith.mulf %123, %125 : vector<64x64xf32>
    %127 = arith.addf %107, %126 : vector<64x64xf32>
    %cst_49 = arith.constant 0.000000e+00 : f32
    %128 = vector.broadcast %cst_49 : f32 to vector<1x64xf32>
    %129 = arith.cmpf oge, %43, %128 : vector<1x64xf32>
    %cst_50 = arith.constant 7.000000e+00 : f32
    %130 = vector.broadcast %cst_50 : f32 to vector<1x64xf32>
    %131 = arith.cmpf ole, %43, %130 : vector<1x64xf32>
    %132 = arith.andi %129, %131 : vector<1x64xi1>
    %cst_51 = arith.constant 0.000000e+00 : f32
    %133 = vector.broadcast %cst_51 : f32 to vector<1x64xf32>
    %134 = arith.cmpf oge, %44, %133 : vector<1x64xf32>
    %135 = arith.andi %132, %134 : vector<1x64xi1>
    %cst_52 = arith.constant 7.000000e+00 : f32
    %136 = vector.broadcast %cst_52 : f32 to vector<1x64xf32>
    %137 = arith.cmpf ole, %44, %136 : vector<1x64xf32>
    %138 = arith.andi %135, %137 : vector<1x64xi1>
    %cst_53 = arith.constant 0.000000e+00 : f32
    %139 = vector.shape_cast %138 : vector<1x64xi1> to vector<1x64xi1>
    %140 = vector.broadcast %139 : vector<1x64xi1> to vector<64x64xi1>
    %141 = vector.broadcast %cst_53 : f32 to vector<64x64xf32>
    %142 = arith.select %140, %41, %141 : vector<64x64xi1>, vector<64x64xf32>
    %143 = vector.extract_strided_slice %46 {offsets = [0, 4], sizes = [64, 1], strides = [1, 1]} : vector<64x9xf32> to vector<64x1xf32>
    %144 = vector.broadcast %143 : vector<64x1xf32> to vector<64x64xf32>
    %145 = arith.mulf %142, %144 : vector<64x64xf32>
    %146 = arith.addf %127, %145 : vector<64x64xf32>
    %c63_i32 = arith.constant 63 : i32
    %147 = tpu.dynamic_rotate %41 by %c63_i32 dim 1 : vector<64x64xf32>, i32 -> vector<64x64xf32>
    %cst_54 = arith.constant 0.000000e+00 : f32
    %148 = vector.broadcast %cst_54 : f32 to vector<1x64xf32>
    %149 = arith.cmpf oge, %43, %148 : vector<1x64xf32>
    %cst_55 = arith.constant 7.000000e+00 : f32
    %150 = vector.broadcast %cst_55 : f32 to vector<1x64xf32>
    %151 = arith.cmpf ole, %43, %150 : vector<1x64xf32>
    %152 = arith.andi %149, %151 : vector<1x64xi1>
    %cst_56 = arith.constant -1.000000e+00 : f32
    %153 = vector.broadcast %cst_56 : f32 to vector<1x64xf32>
    %154 = arith.cmpf oge, %44, %153 : vector<1x64xf32>
    %155 = arith.andi %152, %154 : vector<1x64xi1>
    %cst_57 = arith.constant 6.000000e+00 : f32
    %156 = vector.broadcast %cst_57 : f32 to vector<1x64xf32>
    %157 = arith.cmpf ole, %44, %156 : vector<1x64xf32>
    %158 = arith.andi %155, %157 : vector<1x64xi1>
    %cst_58 = arith.constant 0.000000e+00 : f32
    %159 = vector.shape_cast %158 : vector<1x64xi1> to vector<1x64xi1>
    %160 = vector.broadcast %159 : vector<1x64xi1> to vector<64x64xi1>
    %161 = vector.broadcast %cst_58 : f32 to vector<64x64xf32>
    %162 = arith.select %160, %147, %161 : vector<64x64xi1>, vector<64x64xf32>
    %163 = vector.extract_strided_slice %46 {offsets = [0, 5], sizes = [64, 1], strides = [1, 1]} : vector<64x9xf32> to vector<64x1xf32>
    %164 = vector.broadcast %163 : vector<64x1xf32> to vector<64x64xf32>
    %165 = arith.mulf %162, %164 : vector<64x64xf32>
    %166 = arith.addf %146, %165 : vector<64x64xf32>
    %c57_i32 = arith.constant 57 : i32
    %167 = tpu.dynamic_rotate %41 by %c57_i32 dim 1 : vector<64x64xf32>, i32 -> vector<64x64xf32>
    %cst_59 = arith.constant -1.000000e+00 : f32
    %168 = vector.broadcast %cst_59 : f32 to vector<1x64xf32>
    %169 = arith.cmpf oge, %43, %168 : vector<1x64xf32>
    %cst_60 = arith.constant 6.000000e+00 : f32
    %170 = vector.broadcast %cst_60 : f32 to vector<1x64xf32>
    %171 = arith.cmpf ole, %43, %170 : vector<1x64xf32>
    %172 = arith.andi %169, %171 : vector<1x64xi1>
    %cst_61 = arith.constant 1.000000e+00 : f32
    %173 = vector.broadcast %cst_61 : f32 to vector<1x64xf32>
    %174 = arith.cmpf oge, %44, %173 : vector<1x64xf32>
    %175 = arith.andi %172, %174 : vector<1x64xi1>
    %cst_62 = arith.constant 8.000000e+00 : f32
    %176 = vector.broadcast %cst_62 : f32 to vector<1x64xf32>
    %177 = arith.cmpf ole, %44, %176 : vector<1x64xf32>
    %178 = arith.andi %175, %177 : vector<1x64xi1>
    %cst_63 = arith.constant 0.000000e+00 : f32
    %179 = vector.shape_cast %178 : vector<1x64xi1> to vector<1x64xi1>
    %180 = vector.broadcast %179 : vector<1x64xi1> to vector<64x64xi1>
    %181 = vector.broadcast %cst_63 : f32 to vector<64x64xf32>
    %182 = arith.select %180, %167, %181 : vector<64x64xi1>, vector<64x64xf32>
    %183 = vector.extract_strided_slice %46 {offsets = [0, 6], sizes = [64, 1], strides = [1, 1]} : vector<64x9xf32> to vector<64x1xf32>
    %184 = vector.broadcast %183 : vector<64x1xf32> to vector<64x64xf32>
    %185 = arith.mulf %182, %184 : vector<64x64xf32>
    %186 = arith.addf %166, %185 : vector<64x64xf32>
    %c56_i32 = arith.constant 56 : i32
    %187 = tpu.dynamic_rotate %41 by %c56_i32 dim 1 : vector<64x64xf32>, i32 -> vector<64x64xf32>
    %cst_64 = arith.constant -1.000000e+00 : f32
    %188 = vector.broadcast %cst_64 : f32 to vector<1x64xf32>
    %189 = arith.cmpf oge, %43, %188 : vector<1x64xf32>
    %cst_65 = arith.constant 6.000000e+00 : f32
    %190 = vector.broadcast %cst_65 : f32 to vector<1x64xf32>
    %191 = arith.cmpf ole, %43, %190 : vector<1x64xf32>
    %192 = arith.andi %189, %191 : vector<1x64xi1>
    %cst_66 = arith.constant 0.000000e+00 : f32
    %193 = vector.broadcast %cst_66 : f32 to vector<1x64xf32>
    %194 = arith.cmpf oge, %44, %193 : vector<1x64xf32>
    %195 = arith.andi %192, %194 : vector<1x64xi1>
    %cst_67 = arith.constant 7.000000e+00 : f32
    %196 = vector.broadcast %cst_67 : f32 to vector<1x64xf32>
    %197 = arith.cmpf ole, %44, %196 : vector<1x64xf32>
    %198 = arith.andi %195, %197 : vector<1x64xi1>
    %cst_68 = arith.constant 0.000000e+00 : f32
    %199 = vector.shape_cast %198 : vector<1x64xi1> to vector<1x64xi1>
    %200 = vector.broadcast %199 : vector<1x64xi1> to vector<64x64xi1>
    %201 = vector.broadcast %cst_68 : f32 to vector<64x64xf32>
    %202 = arith.select %200, %187, %201 : vector<64x64xi1>, vector<64x64xf32>
    %203 = vector.extract_strided_slice %46 {offsets = [0, 7], sizes = [64, 1], strides = [1, 1]} : vector<64x9xf32> to vector<64x1xf32>
    %204 = vector.broadcast %203 : vector<64x1xf32> to vector<64x64xf32>
    %205 = arith.mulf %202, %204 : vector<64x64xf32>
    %206 = arith.addf %186, %205 : vector<64x64xf32>
    %c55_i32 = arith.constant 55 : i32
    %207 = tpu.dynamic_rotate %41 by %c55_i32 dim 1 : vector<64x64xf32>, i32 -> vector<64x64xf32>
    %cst_69 = arith.constant -1.000000e+00 : f32
    %208 = vector.broadcast %cst_69 : f32 to vector<1x64xf32>
    %209 = arith.cmpf oge, %43, %208 : vector<1x64xf32>
    %cst_70 = arith.constant 6.000000e+00 : f32
    %210 = vector.broadcast %cst_70 : f32 to vector<1x64xf32>
    %211 = arith.cmpf ole, %43, %210 : vector<1x64xf32>
    %212 = arith.andi %209, %211 : vector<1x64xi1>
    %cst_71 = arith.constant -1.000000e+00 : f32
    %213 = vector.broadcast %cst_71 : f32 to vector<1x64xf32>
    %214 = arith.cmpf oge, %44, %213 : vector<1x64xf32>
    %215 = arith.andi %212, %214 : vector<1x64xi1>
    %cst_72 = arith.constant 6.000000e+00 : f32
    %216 = vector.broadcast %cst_72 : f32 to vector<1x64xf32>
    %217 = arith.cmpf ole, %44, %216 : vector<1x64xf32>
    %218 = arith.andi %215, %217 : vector<1x64xi1>
    %cst_73 = arith.constant 0.000000e+00 : f32
    %219 = vector.shape_cast %218 : vector<1x64xi1> to vector<1x64xi1>
    %220 = vector.broadcast %219 : vector<1x64xi1> to vector<64x64xi1>
    %221 = vector.broadcast %cst_73 : f32 to vector<64x64xf32>
    %222 = arith.select %220, %207, %221 : vector<64x64xi1>, vector<64x64xf32>
    %223 = vector.extract_strided_slice %46 {offsets = [0, 8], sizes = [64, 1], strides = [1, 1]} : vector<64x9xf32> to vector<64x1xf32>
    %224 = vector.broadcast %223 : vector<64x1xf32> to vector<64x64xf32>
    %225 = arith.mulf %222, %224 : vector<64x64xf32>
    %226 = arith.addf %206, %225 : vector<64x64xf32>
    %c0_74 = arith.constant 0 : index
    %c0_75 = arith.constant 0 : index
    %c0_76 = arith.constant 0 : index
    %227 = vector.load %arg9[%c0_74, %c0_75, %c0_76] : memref<1x64x1xf32, #tpu.memory_space<vmem>>, vector<1x64x1xf32>
    %228 = vector.shape_cast %227 : vector<1x64x1xf32> to vector<64x1xf32>
    %229 = vector.broadcast %228 : vector<64x1xf32> to vector<64x64xf32>
    %230 = arith.addf %226, %229 : vector<64x64xf32>
    %cst_77 = arith.constant 5.000000e-01 : f32
    %231 = vector.broadcast %cst_77 : f32 to vector<64x64xf32>
    %232 = arith.mulf %231, %230 : vector<64x64xf32>
    %cst_78 = arith.constant 0.707106769 : f32
    %233 = vector.broadcast %cst_78 : f32 to vector<64x64xf32>
    %234 = arith.mulf %230, %233 : vector<64x64xf32>
    %235 = math.erf %234 : vector<64x64xf32>
    %cst_79 = arith.constant 1.000000e+00 : f32
    %236 = vector.broadcast %cst_79 : f32 to vector<64x64xf32>
    %237 = arith.addf %236, %235 : vector<64x64xf32>
    %238 = arith.mulf %232, %237 : vector<64x64xf32>
    %c0_80 = arith.constant 0 : index
    %c0_81 = arith.constant 0 : index
    %c0_82 = arith.constant 0 : index
    %239 = vector.load %arg10[%c0_80, %c0_81, %c0_82] : memref<1x32x64xbf16, #tpu.memory_space<vmem>>, vector<1x32x64xbf16>
    %240 = vector.shape_cast %239 : vector<1x32x64xbf16> to vector<32x64xbf16>
    %241 = arith.truncf %238 : vector<64x64xf32> to vector<64x64xbf16>
    %cst_83 = arith.constant dense<0.000000e+00> : vector<32x64xf32>
    %242 = tpu.matmul %240, %241, %cst_83 {dimension_numbers = #tpu.dot_dimension_numbers<[1], [0], [0], [1], [0, 0, 1, 1], [], []>} : vector<32x64xbf16>, vector<64x64xbf16>, vector<32x64xf32> -> vector<32x64xf32>
    %c0_84 = arith.constant 0 : index
    %c0_85 = arith.constant 0 : index
    %c0_86 = arith.constant 0 : index
    %243 = vector.load %arg11[%c0_84, %c0_85, %c0_86] : memref<1x32x1xf32, #tpu.memory_space<vmem>>, vector<1x32x1xf32>
    %244 = vector.shape_cast %243 : vector<1x32x1xf32> to vector<32x1xf32>
    %245 = vector.broadcast %244 : vector<32x1xf32> to vector<32x64xf32>
    %246 = arith.addf %242, %245 : vector<32x64xf32>
    %247 = arith.addf %25, %246 : vector<32x64xf32>
    %c0_87 = arith.constant 0 : index
    %c0_88 = arith.constant 0 : index
    %c0_89 = arith.constant 0 : index
    %c0_90 = arith.constant 0 : index
    %248 = vector.load %arg12[%c0_87, %c0_88, %c0_89, %c0_90] : memref<1x1x32x64xf32, #tpu.memory_space<vmem>>, vector<1x1x32x64xf32>
    %249 = vector.shape_cast %248 : vector<1x1x32x64xf32> to vector<32x64xf32>
    %250 = vector.shape_cast %247 : vector<32x64xf32> to vector<1x1x32x64xf32>
    tpu.vector_store %arg12[%c0_87, %c0_88, %c0_89, %c0_90], %250 {strides = array<i32>} : memref<1x1x32x64xf32, #tpu.memory_space<vmem>>, vector<1x1x32x64xf32>,
    return
  }
  func.func @transform_0(%arg0: i32, %arg1: i32) -> (i32, i32, i32, i32) {
    %c0_i32 = arith.constant 0 : i32
    %c0_i32_0 = arith.constant 0 : i32
    %c0_i32_1 = arith.constant 0 : i32
    return %arg0, %arg1, %c0_i32, %c0_i32_0 : i32, i32, i32, i32
  }
  func.func @transform_1(%arg0: i32, %arg1: i32) -> (i32, i32) {
    %c0_i32 = arith.constant 0 : i32
    %c0_i32_0 = arith.constant 0 : i32
    %c0_i32_1 = arith.constant 0 : i32
    return %c0_i32, %c0_i32_0 : i32, i32
  }
  func.func @transform_2(%arg0: i32, %arg1: i32) -> (i32, i32, i32) {
    %c0_i32 = arith.constant 0 : i32
    %c0_i32_0 = arith.constant 0 : i32
    %c0_i32_1 = arith.constant 0 : i32
    return %arg0, %c0_i32, %c0_i32_0 : i32, i32, i32
  }
  func.func @transform_3(%arg0: i32, %arg1: i32) -> (i32, i32, i32) {
    %c0_i32 = arith.constant 0 : i32
    %c0_i32_0 = arith.constant 0 : i32
    %c0_i32_1 = arith.constant 0 : i32
    return %arg0, %c0_i32, %c0_i32_0 : i32, i32, i32
  }
  func.func @transform_4(%arg0: i32, %arg1: i32) -> (i32, i32, i32) {
    %c0_i32 = arith.constant 0 : i32
    %c0_i32_0 = arith.constant 0 : i32
    %c0_i32_1 = arith.constant 0 : i32
    return %arg0, %c0_i32, %c0_i32_0 : i32, i32, i32
  }
  func.func @transform_5(%arg0: i32, %arg1: i32) -> (i32, i32, i32) {
    %c0_i32 = arith.constant 0 : i32
    %c0_i32_0 = arith.constant 0 : i32
    %c0_i32_1 = arith.constant 0 : i32
    return %arg0, %c0_i32, %c0_i32_0 : i32, i32, i32
  }
  func.func @transform_6(%arg0: i32, %arg1: i32) -> (i32, i32, i32) {
    %c0_i32 = arith.constant 0 : i32
    %c0_i32_0 = arith.constant 0 : i32
    %c0_i32_1 = arith.constant 0 : i32
    return %arg0, %c0_i32, %c0_i32_0 : i32, i32, i32
  }
  func.func @transform_7(%arg0: i32, %arg1: i32) -> (i32, i32, i32) {
    %c0_i32 = arith.constant 0 : i32
    %c0_i32_0 = arith.constant 0 : i32
    %c0_i32_1 = arith.constant 0 : i32
    return %arg0, %c0_i32, %c0_i32_0 : i32, i32, i32
  }
  func.func @transform_8(%arg0: i32, %arg1: i32) -> (i32, i32, i32) {
    %c0_i32 = arith.constant 0 : i32
    %c0_i32_0 = arith.constant 0 : i32
    %c0_i32_1 = arith.constant 0 : i32
    return %arg0, %c0_i32, %c0_i32_0 : i32, i32, i32
  }
  func.func @transform_9(%arg0: i32, %arg1: i32) -> (i32, i32, i32) {
    %c0_i32 = arith.constant 0 : i32
    %c0_i32_0 = arith.constant 0 : i32
    %c0_i32_1 = arith.constant 0 : i32
    return %arg0, %c0_i32, %c0_i32_0 : i32, i32, i32
  }
  func.func @transform_10(%arg0: i32, %arg1: i32) -> (i32, i32, i32, i32) {
    %c0_i32 = arith.constant 0 : i32
    %c0_i32_0 = arith.constant 0 : i32
    %c0_i32_1 = arith.constant 0 : i32
    return %arg0, %arg1, %c0_i32, %c0_i32_0 : i32, i32, i32, i32
  }
}

</mosaic_0001>

<bundles_post_ra>
// kernel: dual_channel_block.4
= control target key start
LH: loop header
LB: loop body
LE: loop exit
PB: predicated region body
PF: predicated region fallthrough
CT: control target
= control target key end

     0   :  { %13 = vsyncpa [#allocation4], 0  ;;  %s1957_s27 = smov 0   ;;  %s1959_s28 = smov 0   ;;  %s2229_s0 = inlined_call_operand.vmem [shape: f32[2,2,32,64], index: 0, kind: input, shape index: {}]   ;;  %s2230_s1 = inlined_call_operand.vmem [shape: f32[2,32,1], index: 1, kind: input, shape index: {}]   ;;  %s2231_s2 = inlined_call_operand.vmem [shape: f32[2,32,1], index: 2, kind: input, shape index: {}]   ;;  %s2232_s3 = inlined_call_operand.vmem [shape: f32[2,32,1], index: 3, kind: input, shape index: {}]   ;;  %s2233_s4 = inlined_call_operand.vmem [shape: f32[2,32,1], index: 4, kind: input, shape index: {}]   ;;  %s2234_s5 = inlined_call_operand.vmem [shape: bf16[2,96,32], index: 5, kind: input, shape index: {}]   ;;  %s2235_s6 = inlined_call_operand.vmem [shape: bf16[2,32,32], index: 6, kind: input, shape index: {}]   ;;  %s2236_s7 = inlined_call_operand.vmem [shape: f32[2,4], index: 7, kind: input, shape index: {}]   ;;  %s2237_s8 = inlined_call_operand.vmem [shape: f32[2,2,32,64], index: 8, kind: output, shape index: {}]  }
   0x1   :  { %s1961_s29 = smov 0   ;;  %s1963_s30 = smov 0  }
   0x2   :  { %s1965_s9 = smov 0  }
   0x3 LB: > { %s1592_s10 = sadd.s32 4294967295, %s1906_s9   ;;  %s28_s11 = sadd.s32 1, %s1898_s29  ;;  %s1906_s9 = sphi %s1965_s9, %s19_s9   ;;  %s1902_s30 = sphi %s1963_s30, %s2243_s30   ;;  %s1898_s29 = sphi %s1961_s29, %s2242_s29   ;;  %s1894_s28 = sphi %s1959_s28, %s2241_s28   ;;  %s1890_s27 = sphi %s1957_s27, %s2240_s27  }
   0x4   : > { %p29_p0 = scmp.ge.s32.totalorder %s28_s11, 2  ;;  %s31_s12 = sadd.s32 1, %s1902_s30 }
   0x5   : > { %p1594_p1 = scmp.ge.s32.totalorder %s1906_s9, 1  ;;  %p269_p2 = scmp.lt.s32.totalorder %s1906_s9, 5 }
   0x6   : > { %s2245_s11 = smov (%p29_p0, %s28_s11), 0  ;;  %s2247_s12 = smov (!%p29_p0, %s31_s12), %s1902_s30 }
   0x7   : > { %p1990_p3 = pnand %p1594_p1, %p269_p2  ;;  %p33_p4 = scmp.ge.s32.totalorder %s2247_s12, 2 }
   0x8   : > { %p1994_p5 = scmp.eq.s32.totalorder %s1592_s10, 0  ;;  %s282_s17 = sshll.u32 %s2236_s7, 4  ;;  %s283_s17 = int_to_ptr.vmem [resolvable:$true] %s282_s17 }
   0x9   : > { %p1753_p6 = pneg %p1990_p3  ;;  %s2249_s12 = smov (%p33_p4, %s2247_s12), 0 }
   0xa   : > { %s1849_s18 = scalar_lea.vmem %s283_s17, 32  ;;  %p1857_p12 = scmp.lt.s32.totalorder %s283_s17, %s283_s17 }
   0xb   : > { %p1754_p7 = pnand %p1994_p5, %p1753_p6  ;;  %p1850_p8 = scmp.ne.s32.totalorder %s283_s17, %s1849_s18 }
   0xc   : > { %p1858_p13 = scmp.lt.s32.totalorder %s1849_s18, %s1849_s18 }
   0xd   : > { %p1851_p9 = pneg %p1754_p7 }
   0xe   : > { %p1859_p0 = por %p1858_p13, %p1857_p12 }
   0xf   : > { %p1852_p10 = pnand %p1851_p9, %p1850_p8 }
  0x11   : > { %p1853_p11 = pneg %p1852_p10 }
  0x13   : > { %p1860_p1 = pnand %p1859_p0, %p1853_p11 }
  0x15   : > { %1863 = shalt.err (!%p1860_p1)
}
  0x16   : > { %s1908_s19 = smov [#allocation3]   ;;  %355 = sbr.rel (%p1990_p3) target bundleno = 2173 (0x87d), region = 52 }
  0x17   : > { %1756 = dma.vmem_to_smem (!%p1754_p7), %s283_s17, 32, %s1908_s19, [#allocation4]  }
  0x1d   : > { %1885 = dma.done.wait (%p1994_p5), [#allocation4], 32  }
  0x1e   : > { %1887 = vsyncadd (%p1994_p5), [#allocation4], 4294967264 }
  0x1f   : > { %361 = sfence }
  0x20   : > { %p428_p2 = scmp.lt.s32.totalorder %s1894_s28, 1  ;;  %p430_p4 = scmp.lt.s32.totalorder %s1890_s27, 1  ;;  %v1909_v0 = vmov 0   ;;  %vm489_vm0 = vcmask 523264   ;;  %vm625_vm1 = vcmask 261120   ;;  %vm1911_vm2 = vmmov 0  }
  0x21   : > { %1804 = vset.pattern.permute.xlu1 %v1909_v0  ;;  %1803 = vset.pattern.permute.xlu0 %v1909_v0  ;;  %vm791_vm3 = vcmask 64512   ;;  %vm808_vm4 = vcmask 1043456  }
  0x22   : > { %s2016_s20 = scalar_select %p428_p2, %s1894_s28, 1 }
  0x23   : > { %s2251_s27 = smov (!%p430_p4, %s1890_s27), 1 }
  0x24   : > { %s2020_s21 = sshll.u32 %s2016_s20, 5  ;;  %s1748_s22 = smul.u32 48, %s2016_s20 }
  0x25   : > { %s446_s25 = scalar_lea.vmem %s2231_s2, %s2020_s21  ;;  %s441_s13 = scalar_lea.vmem %s2230_s1, %s2020_s21 }
  0x26   : > { %s2034_s16 = scalar_lea.vmem %s2234_s5, %s1748_s22  ;;  %v485_v1 = vld [vmem:[%s446_s25] sm:$0xff]  ;;  %s1599_s17 = sshll.u32 %s2251_s27, 2  ;;  %v486_v3 = vld [vmem:[%s446_s25 + $0x8] sm:$0xff]  ;;  %v484_v5 = vld [vmem:[%s441_s13 + $0x18] sm:$0xff] }
  0x27   : > { %v481_v2 = vld [vmem:[%s441_s13] sm:$0xff]  ;;  %559 = vperm.xlu1 %1804, %v485_v1   ;;  %s1600_s18 = sshll.u32 %s2016_s20, 3  ;;  %v482_v4 = vld [vmem:[%s441_s13 + $0x8] sm:$0xff]  ;;  %v483_v6 = vld [vmem:[%s441_s13 + $0x10] sm:$0xff]  ;;  %s451_s22 = scalar_lea.vmem %s2232_s3, %s2020_s21 }
  0x28   : > { %535 = vperm.xlu0 %1803, %v481_v2   ;;  %s2037_s19 = sadd.s32 %s1600_s18, %s1599_s17  ;;  %v488_v7 = vld [vmem:[%s446_s25 + $0x18] sm:$0xff]  ;;  %v487_v8 = vld [vmem:[%s446_s25 + $0x10] sm:$0xff]  ;;  %v1805_v14 = vld [vmem:[%s2034_s16] sm:$0xff]   ;;  %s2103_s25 = sshll.u32 %s1894_s28, 7 }
  0x29   : > { %s1601_s23 = sshll.u32 %s2037_s19, 3  ;;  %1680 = vmatprep.mubr.msk.bf16.mxu0 %vm625_vm1, %v1805_v14  ;;  %s726_s26 = sld [smem:[#allocation3 + %s2103_s25]] }
  0x2a   : > { %s436_s24 = scalar_lea.vmem %s2229_s0, %s1601_s23  ;;  %s853_s28 = sadd.s32 1, %s2103_s25 }
  0x2b   : > { %564 = vperm.xlu1 %1804, %v486_v3   ;;  %v477_v9 = vld [vmem:[%s436_s24] sm:$0xff]  ;;  %v478_v10 = vld [vmem:[%s436_s24 + $0x8] sm:$0xff]  ;;  %v479_v13 = vld [vmem:[%s436_s24 + $0x10] sm:$0xff]  ;;  %s854_s10 = sld [smem:[#allocation3 + %s853_s28]]  ;;  %s979_s13 = sadd.s32 2, %s2103_s25 }
  0x2c   : > { %540 = vperm.xlu0 %1803, %v482_v4   ;;  %v490_v11 = vsel %vm489_vm0, %v477_v9, 0.0  ;;  %v491_v12 = vsel %vm489_vm0, %v478_v10, 0.0  ;;  %v493_v16 = vsel %vm489_vm0, %v479_v13, 0.0  ;;  %v480_v17 = vld [vmem:[%s436_s24 + $0x18] sm:$0xff]  ;;  %s980_s14 = sld [smem:[#allocation3 + %s979_s13]]  ;;  %s1105_s15 = sadd.s32 3, %s2103_s25 }
  0x2d   : > { %v492_v15 = vadd.f32 %v491_v12, %v490_v11  ;;  %v495_v19 = vsel %vm489_vm0, %v480_v17, 0.0  ;;  %v1807_v11 = vld [vmem:[%s2034_s16 + $0x10] sm:$0xff]   ;;  %v1808_v12 = vld [vmem:[%s2034_s16 + $0x18] sm:$0xff]   ;;  %s456_s25 = scalar_lea.vmem %s2233_s4, %s2020_s21  ;;  %s1647_s21 = sshll.u32 %s2016_s20, 4 }
  0x2f   : > { %550 = vperm.xlu1 %1804, %v484_v5   ;;  %v494_v18 = vadd.f32 %v493_v16, %v492_v15 }
  0x30   : > { %545 = vperm.xlu0 %1803, %v483_v6  }
  0x31   : > { %v496_v20 = vadd.f32 %v495_v19, %v494_v18 }
  0x33   : > { %574 = vperm.xlu1 %1804, %v488_v7   ;;  %v497_v21 = vrot.slane %v496_v20, 4 }
  0x34   : > { %569 = vperm.xlu0 %1803, %v487_v8  }
  0x35   : > { %v498_v22 = vadd.f32 %v497_v21, %v496_v20 }
  0x37   : > { %v499_v23 = vrot.slane %v498_v22, 2 }
  0x39   : > { %v500_v24 = vadd.f32 %v499_v23, %v498_v22 }
  0x3b   : > { %v501_v25 = vrot.slane %v500_v24, 1 }
  0x3d   : > { %v502_v26 = vadd.f32 %v501_v25, %v500_v24  ;;  %v1910_v25 = vmov 0.0  }
  0x3e   : > { %1692 = vmatprep.subr.bf16.mxu1 %v1910_v25  ;;  %1694 = vmatprep.mubr.msk.bf16.mxu1 %vm1911_vm2, %v1910_v25 }
  0x3f   : > { %v504_v27 = vmul.f32 0.03125, %v502_v26 }
  0x41   : > { %v505_v28 = vsub.f32 %v477_v9, %v504_v27  ;;  %v506_v29 = vsub.f32 %v478_v10, %v504_v27  ;;  %v507_v30 = vsub.f32 %v479_v13, %v504_v27  ;;  %v508_v33 = vsub.f32 %v480_v17, %v504_v27  ;;  %v1806_v10 = vld [vmem:[%s2034_s16 + $0x8] sm:$0xff]  }
  0x43   : > { %v509_v31 = vmul.f32 %v505_v28, %v505_v28  ;;  %v510_v32 = vmul.f32 %v506_v29, %v506_v29  ;;  %v511_v34 = vmul.f32 %v507_v30, %v507_v30  ;;  %v512_v38 = vmul.f32 %v508_v33, %v508_v33 }
  0x45   : > { %v513_v35 = vsel %vm489_vm0, %v509_v31, 0.0  ;;  %v514_v36 = vsel %vm489_vm0, %v510_v32, 0.0  ;;  %v516_v39 = vsel %vm489_vm0, %v511_v34, 0.0  ;;  %v518_v41 = vsel %vm489_vm0, %v512_v38, 0.0  ;;  %v1810_v34 = vld [vmem:[%s2034_s16 + $0x28] sm:$0xff]  }
  0x46   : > { %v515_v37 = vadd.f32 %v514_v36, %v513_v35  ;;  %v788_v38 = vstv %s726_s26 }
  0x48   : > { %v517_v40 = vadd.f32 %v516_v39, %v515_v37 }
  0x4a   : > { %v519_v42 = vadd.f32 %v518_v41, %v517_v40 }
  0x4c   : > { %v520_v43 = vrot.slane %v519_v42, 4 }
  0x4e   : > { %v521_v44 = vadd.f32 %v520_v43, %v519_v42 }
  0x50   : > { %v522_v45 = vrot.slane %v521_v44, 2 }
  0x52   : > { %v523_v46 = vadd.f32 %v522_v45, %v521_v44 }
  0x54   : > { %v524_v47 = vrot.slane %v523_v46, 1 }
  0x56   : > { %v525_v48 = vadd.f32 %v524_v47, %v523_v46 }
  0x58   : > { %v526_v49 = vmul.f32 0.03125, %v525_v48 }
  0x5a   : > { %v527_v50 = vadd.f32 1e-05, %v526_v49 }
  0x5c   : > { %1813 = vrsqrt.f32 %v527_v50 }
  0x66   : > { %v1814_v51 = vpop.eup %1813 }
  0x67   : > { %v529_v52 = vmul.f32 %v1814_v51, %v505_v28  ;;  %v530_v55 = vmul.f32 %v1814_v51, %v506_v29  ;;  %v532_v62 = vmul.f32 %v1814_v51, %v508_v33  ;;  %v531_v63 = vmul.f32 %v1814_v51, %v507_v30  ;;  %v1809_v33 = vld [vmem:[%s2034_s16 + $0x20] sm:$0xff]   ;;  %s1106_s16 = sld [smem:[#allocation3 + %s1105_s15]] }
  0xa6   : > { %v560_v53 = vpop.permute.xlu1 %559 }
  0xa7   : > { %v536_v54 = vpop.permute.xlu0 %535 }
  0xa8   : > { %v553_v56 = vmul.f32 %v536_v54, %v529_v52 }
  0xaa   : > { %v565_v57 = vpop.permute.xlu1 %564  ;;  %v2055_v60 = vadd.f32 %v560_v53, %v553_v56 }
  0xab   : > { %v541_v58 = vpop.permute.xlu0 %540 }
  0xac   : > { %v554_v59 = vmul.f32 %v541_v58, %v530_v55 }
  0xae   : > { %v2057_v61 = vadd.f32 %v565_v57, %v554_v59  ;;  %v551_v0 = vpop.permute.xlu1 %550 }
  0xaf   : > { %v546_v1 = vpop.permute.xlu0 %545  ;;  %v556_v3 = vmul.f32 %v551_v0, %v532_v62 }
  0xb0   : > { %v581_v2 = vpack.c.bf16 %v2057_v61, %v2055_v60  ;;  %v555_v4 = vmul.f32 %v546_v1, %v531_v63 }
  0xb2   : > { %1676 = vmatprep.subr.bf16.mxu0 %v581_v2  ;;  %v575_v5 = vpop.permute.xlu1 %574 }
  0xb3   : > { %v570_v6 = vpop.permute.xlu0 %569  ;;  %1677 = vmatpush3.bf16.msra.mxu0 %v581_v2  ;;  %v2061_v7 = vadd.f32 %v575_v5, %v556_v3 }
  0xb4   : > { %v2063_v8 = vadd.f32 %v570_v6, %v555_v4 }
  0xb6   : > { %v582_v9 = vpack.c.bf16 %v2061_v7, %v2063_v8 }
  0xb8   : > { %1678 = vmatprep.subr.bf16.mxu0 %v582_v9 }
  0xb9   : > { %1679 = vmatpush3.bf16.msra.mxu0 %v582_v9 }
  0xba   : > { %1710 = vmatprep.subr.bf16.mxu0 %v1910_v25 }
  0xbc   : > { %1681 = vmatmul.mubr.msk.bf16.vlgmr.msra.gmra.mrb[0].mxu0 %vm625_vm1, %v1806_v10 }
  0xbd   : > { %1684 = vmatprep.mubr.msk.bf16.mxu0 %vm625_vm1, %v1807_v11 }
  0xc4   : > { %1685 = vmatmul.mubr.msk.bf16.gmra.mrb[4].mxu0 %vm625_vm1, %v1808_v12 }
  0xc5   : > { %1688 = vmatprep.mubr.msk.bf16.mxu0 %vm625_vm1, %v1809_v33 }
  0xcc   : > { %1689 = vmatmul.mubr.msk.bf16.gmra.mrb[8].mxu0 %vm625_vm1, %v1810_v34 }
  0xcd   : > { %1712 = vmatprep.mubr.msk.bf16.mxu0 %vm1911_vm2, %v1910_v25 }
 0x18f   : > { %v2073_v13 = vpop.f32.mrb[0].mxu0 }
 0x190   : > { %v678_v14 = vpop.f32.mrb[1].mxu0  ;;  %v981_v62 = vmul.f32 %v2073_v13, %v2073_v13 }
 0x191   : > { %v727_v15 = vmul.f32 %v678_v14, %v678_v14  ;;  %v2075_v16 = vpop.f32.mrb[2].mxu0  ;;  %v738_v32 = vpack.c.bf16 %v678_v14, %v678_v14 }
 0x192   : > { %v2077_v17 = vpop.f32.mrb[3].mxu0  ;;  %v1107_v51 = vmul.f32 %v2075_v16, %v2075_v16  ;;  %v982_v0 = vsel %vm489_vm0, %v981_v62, 0.0 }
 0x193   : > { %v728_v18 = vsel %vm489_vm0, %v727_v15, 0.0  ;;  %v855_v49 = vmul.f32 %v2077_v17, %v2077_v17 }
 0x194   : > { %729 = vadd.xlane.f32.xlu1 %v728_v18  ;;  %v1108_v53 = vsel %vm489_vm0, %v1107_v51, 0.0  ;;  %v916_v51 = vstv %s854_s10  ;;  %s466_s10 = scalar_lea.vmem %s2235_s6, %s1647_s21 }
 0x195   : > { %v856_v52 = vsel %vm489_vm0, %v855_v49, 0.0 }
 0x197   : > { %v2080_v19 = vpop.f32.mrb[4].mxu0 }
 0x198   : > { %v694_v20 = vpop.f32.mrb[5].mxu0  ;;  %v985_v47 = vmul.f32 %v2080_v19, %v2080_v19 }
 0x199   : > { %v731_v21 = vmul.f32 %v694_v20, %v694_v20  ;;  %v2082_v22 = vpop.f32.mrb[6].mxu0 }
 0x19a   : > { %v2084_v23 = vpop.f32.mrb[7].mxu0  ;;  %v986_v50 = vsel %vm489_vm0, %v985_v47, 0.0  ;;  %v1111_v58 = vmul.f32 %v2082_v22, %v2082_v22 }
 0x19b   : > { %v732_v24 = vsel %vm489_vm0, %v731_v21, 0.0  ;;  %v859_v44 = vmul.f32 %v2084_v23, %v2084_v23 }
 0x19c   : > { %733 = vadd.xlane.f32.xlu0 %v732_v24  ;;  %v1112_v63 = vsel %vm489_vm0, %v1111_v58, 0.0 }
 0x19d   : > { %v860_v48 = vsel %vm489_vm0, %v859_v44, 0.0 }
 0x19f   : > { %v1690_v1 = vpop.f32.mrb[8].mxu0 }
 0x1a0   : > { %v710_v2 = vpop.f32.mrb[9].mxu0  ;;  %v1057_v5 = vpack.c.bf16 %v1690_v1, %v1690_v1 }
 0x1a1   : > { %v1691_v3 = vpop.f32.mrb[10].mxu0  ;;  %v804_v6 = vpack.c.bf16 %v710_v2, %v710_v2 }
 0x1a2   : > { %v713_v4 = vpop.f32.mrb[11].mxu0  ;;  %v1183_v9 = vpack.c.bf16 %v1691_v3, %v1691_v3  ;;  %v2126_v11 = vsel %vm808_vm4, %v1057_v5, 0 }
 0x1a3   : > { %v931_v10 = vpack.c.bf16 %v713_v4, %v713_v4  ;;  %v810_v12 = vsel %vm808_vm4, %v804_v6, 0 }
 0x1a4   : > { %v2128_v14 = vsel %vm808_vm4, %v1183_v9, 0 }
 0x1a5   : > { %v936_v15 = vsel %vm808_vm4, %v931_v10, 0  ;;  %v1168_v10 = vstv %s1106_s16 }
 0x1a6   : > { %1711 = vmatpush3.bf16.msra.mxu0 %v936_v15 }
 0x1a7   : > { %1722 = vmatprep.subr.bf16.mxu0 %v1910_v25 }
 0x221   : > { %v730_v35 = vpop.xlane.xlu1 %729 }
 0x222   : > { %v786_v36 = vmax.f32 %v730_v35, 1e-24 }
 0x229   : > { %v734_v26 = vpop.xlane.xlu0 %733 }
 0x22a   : > { %v735_v27 = vmax.f32 %v734_v26, 1e-24 }
 0x22c   : > { %1815 = vrsqrt.f32 %v735_v27 }
 0x22d   : > { %1817 = vrsqrt.f32 %v786_v36 }
 0x236   : > { %v1816_v28 = vpop.eup %1815 }
 0x237   : > { %v737_v29 = vmul.f32 %v1816_v28, %v694_v20  ;;  %v1818_v37 = vpop.eup %1817 }
 0x238   : > { %v789_v39 = vmul.f32 %v1818_v37, %v788_v38 }
 0x239   : > { %v739_v30 = vpack.c.bf16 %v737_v29, %v737_v29 }
 0x23b   : > { %v744_v31 = vsel %vm489_vm0, %v739_v30, 0 }
 0x23c   : > { %1693 = vmatpush3.bf16.xpose.msra.mxu1 %v744_v31 }
 0x23d   : > { %1698 = vmatprep.subr.bf16.mxu1 %v1910_v25 }
 0x243   : > { %1695 = vmatmul.mubr.msk.bf16.vlgmr.msra.gmra.mrb[0].mxu1 %vm489_vm0, %v738_v32 }
 0x244   : > { %1700 = vmatprep.mubr.msk.bf16.mxu1 %vm1911_vm2, %v1910_v25  ;;  %1699 = vmatpush3.bf16.msra.mxu1 %v810_v12 }
 0x245   : > { %1704 = vmatprep.subr.bf16.mxu1 %v1910_v25 }
 0x316   : > { %v780_v40 = vpop.f32.mrb[0].mxu1 }
 0x317   : > { %v790_v41 = vmul.f32 %v789_v39, %v780_v40  ;;  %v1696_v42 = vpop.f32.mrb[1].mxu1  ;;  %v866_v39 = vpack.c.bf16 %v2077_v17, %v2077_v17 }
 0x318   : > { %v783_v43 = vpop.f32.mrb[2].mxu1  ;;  %v992_v42 = vpack.c.bf16 %v2073_v13, %v2073_v13 }
 0x319   : > { %v1697_v45 = vpop.f32.mrb[3].mxu1  ;;  %v792_v46 = vsel %vm791_vm3, %v790_v41, -inf }
 0x31a   : > { %793 = vmax.xlane.f32.xlu0 %v792_v46 }
 0x31e   : > { %861 = vadd.xlane.f32.xlu0 %v860_v48 }
 0x322   : > { %987 = vadd.xlane.f32.xlu0 %v986_v50 }
 0x326   : > { %857 = vadd.xlane.f32.xlu0 %v856_v52 }
 0x32a   : > { %1109 = vadd.xlane.f32.xlu0 %v1108_v53 }
 0x3a7   : > { %v794_v54 = vpop.xlane.xlu0 %793 }
 0x3a8   : > { %v795_v55 = vsub.f32 %v790_v41, %v794_v54 }
 0x3aa   : > { %v796_v56 = vmul.f32 1.442695, %v795_v55 }
 0x3ab   : > { %v862_v18 = vpop.xlane.xlu0 %861 }
 0x3ac   : > { %1819 = vpow2.f32 %v796_v56  ;;  %v863_v20 = vmax.f32 %v862_v18, 1e-24 }
 0x3ae   : > { %1821 = vrsqrt.f32 %v863_v20 }
 0x3af   : > { %v988_v21 = vpop.xlane.xlu0 %987 }
 0x3b0   : > { %v989_v24 = vmax.f32 %v988_v21, 1e-24 }
 0x3b3   : > { %v858_v43 = vpop.xlane.xlu0 %857 }
 0x3b4   : > { %v914_v44 = vmax.f32 %v858_v43, 1e-24  ;;  %v1317_v43 = vld [vmem:[%s456_s25 + $0x18] sm:$0xff] }
 0x3b6   : > { %v1820_v57 = vpop.eup %1819 }
 0x3b7   : > { %v798_v59 = vsel %vm791_vm3, %v1820_v57, 0.0  ;;  %v1110_v49 = vpop.xlane.xlu0 %1109 }
 0x3b8   : > { %799 = vadd.xlane.f32.xlu1 %v798_v59  ;;  %v1822_v28 = vpop.eup %1821  ;;  %v1166_v52 = vmax.f32 %v1110_v49, 1e-24 }
 0x3b9   : > { %v865_v30 = vmul.f32 %v1822_v28, %v2084_v23 }
 0x3bb   : > { %v867_v33 = vpack.c.bf16 %v865_v30, %v865_v30 }
 0x3bc   : > { %1113 = vadd.xlane.f32.xlu1 %v1112_v63  ;;  %v1042_v63 = vstv %s980_s14  ;;  %s475_s14 = scalar_lea.vmem %s2237_s8, %s1601_s23 }
 0x3bd   : > { %v872_v36 = vsel %vm489_vm0, %v867_v33, 0 }
 0x3c0   : > { %983 = vadd.xlane.f32.xlu1 %v982_v0 }
 0x445   : > { %v800_v26 = vpop.xlane.xlu1 %799 }
 0x446   : > { %1823 = vrcp.f32 %v800_v26 }
 0x447   : > { %1825 = vrsqrt.f32 %v989_v24 }
 0x449   : > { %v1114_v27 = vpop.xlane.xlu1 %1113 }
 0x44a   : > { %v1115_v29 = vmax.f32 %v1114_v27, 1e-24 }
 0x44c   : > { %1827 = vrsqrt.f32 %v1115_v29 }
 0x44d   : > { %1829 = vrsqrt.f32 %v914_v44  ;;  %v984_v45 = vpop.xlane.xlu1 %983  ;;  %v1314_v44 = vld [vmem:[%s456_s25] sm:$0xff] }
 0x44e   : > { %v1040_v13 = vmax.f32 %v984_v45, 1e-24  ;;  %v1316_v45 = vld [vmem:[%s456_s25 + $0x10] sm:$0xff] }
 0x450   : > { %v1824_v31 = vpop.eup %1823  ;;  %1831 = vrsqrt.f32 %v1040_v13 }
 0x451   : > { %v802_v32 = vmul.f32 %v1824_v31, %v1820_v57  ;;  %v1826_v34 = vpop.eup %1825  ;;  %1833 = vrsqrt.f32 %v1166_v52 }
 0x452   : > { %v991_v37 = vmul.f32 %v1826_v34, %v2080_v19 }
 0x453   : > { %v803_v35 = vpack.c.bf16 %v802_v32, %v802_v32 }
 0x454   : > { %v993_v38 = vpack.c.bf16 %v991_v37, %v991_v37 }
 0x455   : > { %1701 = vmatmul.mubr.msk.bf16.vlgmr.msra.gmra.mrb[4].mxu1 %vm791_vm3, %v803_v35 }
 0x456   : > { %1705 = vmatpush3.bf16.xpose.msra.mxu1 %v872_v36  ;;  %1706 = vmatprep.mubr.msk.bf16.mxu1 %vm1911_vm2, %v1910_v25  ;;  %v1828_v23 = vpop.eup %1827  ;;  %v998_v40 = vsel %vm489_vm0, %v993_v38, 0 }
 0x457   : > { %1716 = vmatprep.subr.bf16.mxu1 %v1910_v25  ;;  %v1117_v41 = vmul.f32 %v1828_v23, %v2082_v22  ;;  %v1118_v22 = vpack.c.bf16 %v2075_v16, %v2075_v16  ;;  %v1830_v16 = vpop.eup %1829 }
 0x458   : > { %v917_v53 = vmul.f32 %v1830_v16, %v916_v51 }
 0x459   : > { %v1119_v19 = vpack.c.bf16 %v1117_v41, %v1117_v41  ;;  %v1310_v41 = vld [vmem:[%s451_s22] sm:$0xff] }
 0x45a   : > { %v1832_v62 = vpop.eup %1831 }
 0x45b   : > { %v1124_v17 = vsel %vm489_vm0, %v1119_v19, 0  ;;  %v1043_v0 = vmul.f32 %v1832_v62, %v1042_v63  ;;  %v1834_v9 = vpop.eup %1833  ;;  %v1312_v19 = vld [vmem:[%s451_s22 + $0x10] sm:$0xff] }
 0x45c   : > { %v1169_v12 = vmul.f32 %v1834_v9, %v1168_v10 }
 0x45d   : > { %1707 = vmatmul.mubr.msk.bf16.vlgmr.msra.gmra.mrb[8].mxu1 %vm489_vm0, %v866_v39 }
 0x45e   : > { %1717 = vmatpush3.bf16.xpose.msra.mxu1 %v998_v40  ;;  %1718 = vmatprep.mubr.msk.bf16.mxu1 %vm1911_vm2, %v1910_v25 }
 0x45f   : > { %1728 = vmatprep.subr.bf16.mxu1 %v1910_v25 }
 0x465   : > { %1719 = vmatmul.mubr.msk.bf16.vlgmr.msra.gmra.mrb[12].mxu1 %vm489_vm0, %v992_v42  ;;  %v1313_v42 = vld [vmem:[%s451_s22 + $0x18] sm:$0xff] }
 0x466   : > { %1729 = vmatpush3.bf16.xpose.msra.mxu1 %v1124_v17  ;;  %1730 = vmatprep.mubr.msk.bf16.mxu1 %vm1911_vm2, %v1910_v25  ;;  %v1315_v17 = vld [vmem:[%s456_s25 + $0x8] sm:$0xff] }
 0x46d   : > { %1731 = vmatmul.mubr.msk.bf16.vlgmr.msra.gmra.mrb[16].mxu1 %vm489_vm0, %v1118_v22  ;;  %v1311_v22 = vld [vmem:[%s451_s22 + $0x8] sm:$0xff] }
 0x528   : > { %v846_v46 = vpop.f32.mrb[4].mxu1 }
 0x529   : > { %852 = vst.msk [vmem:[#allocation2] sm:$0xff] %vm489_vm0, %v846_v46  ;;  %v1702_v47 = vpop.f32.mrb[5].mxu1 }
 0x52a   : > { %v849_v48 = vpop.f32.mrb[6].mxu1 }
 0x52b   : > { %v1703_v50 = vpop.f32.mrb[7].mxu1 }
 0x530   : > { %v908_v54 = vpop.f32.mrb[8].mxu1 }
 0x531   : > { %v918_v55 = vmul.f32 %v917_v53, %v908_v54  ;;  %v1708_v56 = vpop.f32.mrb[9].mxu1 }
 0x532   : > { %v911_v57 = vpop.f32.mrb[10].mxu1 }
 0x533   : > { %v1709_v58 = vpop.f32.mrb[11].mxu1  ;;  %v919_v59 = vsel %vm791_vm3, %v918_v55, -inf }
 0x534   : > { %920 = vmax.xlane.f32.xlu1 %v919_v59  ;;  %v1235_v59 = vld [vmem:[#allocation2] sm:$0xff] }
 0x538   : > { %v1034_v1 = vpop.f32.mrb[12].mxu1 }
 0x539   : > { %v1044_v2 = vmul.f32 %v1043_v0, %v1034_v1  ;;  %v1720_v3 = vpop.f32.mrb[13].mxu1 }
 0x53a   : > { %v1037_v4 = vpop.f32.mrb[14].mxu1 }
 0x53b   : > { %v1721_v5 = vpop.f32.mrb[15].mxu1  ;;  %v1045_v6 = vsel %vm791_vm3, %v1044_v2, -inf }
 0x53c   : > { %1046 = vmax.xlane.f32.xlu0 %v1045_v6 }
 0x540   : > { %v1160_v15 = vpop.f32.mrb[16].mxu1 }
 0x541   : > { %v1170_v18 = vmul.f32 %v1169_v12, %v1160_v15  ;;  %v1732_v20 = vpop.f32.mrb[17].mxu1  ;;  %v1812_v15 = vld [vmem:[%s466_s10 + $0x8] sm:$0xff]  }
 0x542   : > { %v1163_v21 = vpop.f32.mrb[18].mxu1 }
 0x543   : > { %v1733_v24 = vpop.f32.mrb[19].mxu1  ;;  %v1171_v26 = vsel %vm791_vm3, %v1170_v18, -inf }
 0x544   : > { %1172 = vmax.xlane.f32.xlu1 %v1171_v26 }
 0x5c1   : > { %v921_v27 = vpop.xlane.xlu1 %920 }
 0x5c2   : > { %v922_v28 = vsub.f32 %v918_v55, %v921_v27 }
 0x5c4   : > { %v923_v29 = vmul.f32 1.442695, %v922_v28 }
 0x5c6   : > { %1835 = vpow2.f32 %v923_v29 }
 0x5c9   : > { %v1047_v30 = vpop.xlane.xlu0 %1046 }
 0x5ca   : > { %v1048_v31 = vsub.f32 %v1044_v2, %v1047_v30 }
 0x5cc   : > { %v1049_v32 = vmul.f32 1.442695, %v1048_v31 }
 0x5ce   : > { %1837 = vpow2.f32 %v1049_v32 }
 0x5d0   : > { %v1836_v33 = vpop.eup %1835 }
 0x5d1   : > { %v1173_v34 = vpop.xlane.xlu1 %1172  ;;  %v925_v35 = vsel %vm791_vm3, %v1836_v33, 0.0 }
 0x5d2   : > { %v1174_v36 = vsub.f32 %v1170_v18, %v1173_v34  ;;  %926 = vadd.xlane.f32.xlu0 %v925_v35 }
 0x5d4   : > { %v1175_v37 = vmul.f32 1.442695, %v1174_v36 }
 0x5d6   : > { %1839 = vpow2.f32 %v1175_v37 }
 0x5d8   : > { %v1838_v38 = vpop.eup %1837 }
 0x5d9   : > { %v1051_v23 = vsel %vm791_vm3, %v1838_v38, 0.0 }
 0x5da   : > { %1052 = vadd.xlane.f32.xlu1 %v1051_v23 }
 0x5e0   : > { %v1840_v39 = vpop.eup %1839 }
 0x5e1   : > { %v1177_v40 = vsel %vm791_vm3, %v1840_v39, 0.0 }
 0x5e2   : > { %1178 = vadd.xlane.f32.xlu0 %v1177_v40 }
 0x5eb   : > { %1362 = vperm.xlu1 %1804, %v1310_v41  }
 0x5ef   : > { %1372 = vperm.xlu1 %1804, %v1312_v19  }
 0x5f3   : > { %1377 = vperm.xlu1 %1804, %v1313_v42  }
 0x5f7   : > { %1391 = vperm.xlu1 %1804, %v1315_v17  }
 0x5f8   : > { %1367 = vperm.xlu0 %1803, %v1311_v22  }
 0x5fb   : > { %1401 = vperm.xlu1 %1804, %v1317_v43  }
 0x5fc   : > { %1386 = vperm.xlu0 %1803, %v1314_v44  }
 0x600   : > { %1396 = vperm.xlu0 %1803, %v1316_v45  }
 0x65f   : > { %v927_v13 = vpop.xlane.xlu0 %926 }
 0x660   : > { %1841 = vrcp.f32 %v927_v13 }
 0x667   : > { %v1053_v46 = vpop.xlane.xlu1 %1052 }
 0x668   : > { %1843 = vrcp.f32 %v1053_v46 }
 0x66a   : > { %v1842_v47 = vpop.eup %1841 }
 0x66b   : > { %v929_v48 = vmul.f32 %v1842_v47, %v1836_v33 }
 0x66d   : > { %v930_v49 = vpack.c.bf16 %v929_v48, %v929_v48 }
 0x66f   : > { %v1179_v50 = vpop.xlane.xlu0 %1178  ;;  %1713 = vmatmul.mubr.msk.bf16.vlgmr.msra.gmra.mrb[12].mxu0 %vm791_vm3, %v930_v49 }
 0x670   : > { %1845 = vrcp.f32 %v1179_v50  ;;  %1723 = vmatpush3.bf16.msra.mxu0 %v2126_v11  ;;  %1724 = vmatprep.mubr.msk.bf16.mxu0 %vm1911_vm2, %v1910_v25  ;;  %v1811_v11 = vld [vmem:[%s466_s10] sm:$0xff]  }
 0x671   : > { %1734 = vmatprep.subr.bf16.mxu0 %v1910_v25  ;;  %1744 = vmatprep.mubr.msk.bf16.mxu1 %vm625_vm1, %v1811_v11 }
 0x672   : > { %v1844_v16 = vpop.eup %1843 }
 0x673   : > { %v1055_v51 = vmul.f32 %v1844_v16, %v1838_v38 }
 0x675   : > { %v1056_v52 = vpack.c.bf16 %v1055_v51, %v1055_v51 }
 0x677   : > { %1725 = vmatmul.mubr.msk.bf16.vlgmr.msra.gmra.mrb[16].mxu0 %vm791_vm3, %v1056_v52  ;;  %v1363_v52 = vpop.permute.xlu1 %1362 }
 0x678   : > { %1735 = vmatpush3.bf16.msra.mxu0 %v2128_v14  ;;  %1736 = vmatprep.mubr.msk.bf16.mxu0 %vm1911_vm2, %v1910_v25 }
 0x67a   : > { %v1846_v53 = vpop.eup %1845 }
 0x67b   : > { %v1181_v54 = vmul.f32 %v1846_v53, %v1840_v39  ;;  %v1373_v11 = vpop.permute.xlu1 %1372 }
 0x67d   : > { %v1182_v55 = vpack.c.bf16 %v1181_v54, %v1181_v54 }
 0x67f   : > { %1737 = vmatmul.mubr.msk.bf16.vlgmr.msra.gmra.mrb[20].mxu0 %vm791_vm3, %v1182_v55 }
 0x742   : > { %v972_v56 = vpop.f32.mrb[12].mxu0 }
 0x743   : > { %978 = vst.msk [vmem:[#allocation2 + $0x8] sm:$0xff] %vm489_vm0, %v972_v56  ;;  %v1714_v14 = vpop.f32.mrb[13].mxu0 }
 0x744   : > { %v975_v57 = vpop.f32.mrb[14].mxu0 }
 0x745   : > { %v1715_v58 = vpop.f32.mrb[15].mxu0  ;;  %v1378_v57 = vpop.permute.xlu1 %1377 }
 0x746   : > { %v1368_v58 = vpop.permute.xlu0 %1367 }
 0x74a   : > { %v1098_v25 = vpop.f32.mrb[16].mxu0  ;;  %v1236_v62 = vld [vmem:[#allocation2 + $0x8] sm:$0xff] }
 0x74b   : > { %1104 = vst.msk [vmem:[#allocation2 + $0x10] sm:$0xff] %vm489_vm0, %v1098_v25  ;;  %v1726_v63 = vpop.f32.mrb[17].mxu0  ;;  %v1239_v0 = vpack.c.bf16 %v1236_v62, %v1235_v59  ;;  %v1392_v25 = vpop.permute.xlu1 %1391 }
 0x74c   : > { %v1101_v1 = vpop.f32.mrb[18].mxu0  ;;  %v1387_v59 = vpop.permute.xlu0 %1386 }
 0x74d   : > { %v1727_v2 = vpop.f32.mrb[19].mxu0  ;;  %1740 = vmatprep.subr.bf16.mxu1 %v1239_v0 }
 0x74e   : > { %1741 = vmatpush3.bf16.msra.mxu1 %v1239_v0 }
 0x752   : > { %v1224_v3 = vpop.f32.mrb[20].mxu0  ;;  %v1237_v9 = vld [vmem:[#allocation2 + $0x10] sm:$0xff] }
 0x753   : > { %1230 = vst.msk [vmem:[#allocation2 + $0x18] sm:$0xff] %vm489_vm0, %v1224_v3  ;;  %v1738_v4 = vpop.f32.mrb[21].mxu0 }
 0x754   : > { %v1227_v5 = vpop.f32.mrb[22].mxu0 }
 0x755   : > { %v1739_v6 = vpop.f32.mrb[23].mxu0 }
 0x75a   : > { %v1238_v10 = vld [vmem:[#allocation2 + $0x18] sm:$0xff] }
 0x75b   : > { %v1240_v12 = vpack.c.bf16 %v1238_v10, %v1237_v9  ;;  %v1402_v9 = vpop.permute.xlu1 %1401  ;;  %v1397_v10 = vpop.permute.xlu0 %1396 }
 0x75d   : > { %1742 = vmatprep.subr.bf16.mxu1 %v1240_v12 }
 0x75e   : > { %1743 = vmatpush3.bf16.msra.mxu1 %v1240_v12 }
 0x761   : > { %1745 = vmatmul.mubr.msk.bf16.vlgmr.msra.gmra.mrb[20].mxu1 %vm625_vm1, %v1812_v15 }
 0x834   : > { %v1746_v18 = vpop.f32.mrb[20].mxu1 }
 0x835   : > { %v1291_v20 = vpop.f32.mrb[21].mxu1  ;;  %v1308_v27 = vadd.f32 %v1746_v18, %v2063_v8 }
 0x836   : > { %v1306_v21 = vadd.f32 %v1291_v20, %v2055_v60  ;;  %v1747_v24 = vpop.f32.mrb[22].mxu1 }
 0x837   : > { %v1294_v26 = vpop.f32.mrb[23].mxu1  ;;  %v1309_v30 = vadd.f32 %v1747_v24, %v2061_v7  ;;  %v1321_v33 = vsel %vm489_vm0, %v1308_v27, 0.0 }
 0x838   : > { %v1307_v28 = vadd.f32 %v1294_v26, %v2057_v61  ;;  %v1318_v29 = vsel %vm489_vm0, %v1306_v21, 0.0 }
 0x839   : > { %v1323_v35 = vsel %vm489_vm0, %v1309_v30, 0.0 }
 0x83a   : > { %v1319_v31 = vsel %vm489_vm0, %v1307_v28, 0.0 }
 0x83b   : > { %v1320_v32 = vadd.f32 %v1319_v31, %v1318_v29 }
 0x83d   : > { %v1322_v34 = vadd.f32 %v1321_v33, %v1320_v32 }
 0x83f   : > { %v1324_v36 = vadd.f32 %v1323_v35, %v1322_v34 }
 0x841   : > { %v1325_v60 = vrot.slane %v1324_v36, 4 }
 0x843   : > { %v1326_v37 = vadd.f32 %v1325_v60, %v1324_v36 }
 0x845   : > { %v1327_v38 = vrot.slane %v1326_v37, 2 }
 0x847   : > { %v1328_v23 = vadd.f32 %v1327_v38, %v1326_v37 }
 0x849   : > { %v1329_v8 = vrot.slane %v1328_v23, 1 }
 0x84b   : > { %v1330_v39 = vadd.f32 %v1329_v8, %v1328_v23 }
 0x84d   : > { %v1331_v61 = vmul.f32 0.03125, %v1330_v39 }
 0x84f   : > { %v1332_v40 = vsub.f32 %v1306_v21, %v1331_v61  ;;  %v1333_v41 = vsub.f32 %v1307_v28, %v1331_v61  ;;  %v1334_v19 = vsub.f32 %v1308_v27, %v1331_v61  ;;  %v1335_v7 = vsub.f32 %v1309_v30, %v1331_v61 }
 0x851   : > { %v1336_v42 = vmul.f32 %v1332_v40, %v1332_v40  ;;  %v1337_v17 = vmul.f32 %v1333_v41, %v1333_v41  ;;  %v1338_v22 = vmul.f32 %v1334_v19, %v1334_v19  ;;  %v1339_v43 = vmul.f32 %v1335_v7, %v1335_v7 }
 0x853   : > { %v1340_v44 = vsel %vm489_vm0, %v1336_v42, 0.0  ;;  %v1341_v45 = vsel %vm489_vm0, %v1337_v17, 0.0  ;;  %v1343_v46 = vsel %vm489_vm0, %v1338_v22, 0.0  ;;  %v1345_v48 = vsel %vm489_vm0, %v1339_v43, 0.0 }
 0x854   : > { %v1342_v13 = vadd.f32 %v1341_v45, %v1340_v44 }
 0x856   : > { %v1344_v47 = vadd.f32 %v1343_v46, %v1342_v13 }
 0x858   : > { %v1346_v49 = vadd.f32 %v1345_v48, %v1344_v47 }
 0x85a   : > { %v1347_v50 = vrot.slane %v1346_v49, 4 }
 0x85c   : > { %v1348_v16 = vadd.f32 %v1347_v50, %v1346_v49 }
 0x85e   : > { %v1349_v51 = vrot.slane %v1348_v16, 2 }
 0x860   : > { %v1350_v53 = vadd.f32 %v1349_v51, %v1348_v16 }
 0x862   : > { %v1351_v54 = vrot.slane %v1350_v53, 1 }
 0x864   : > { %v1352_v55 = vadd.f32 %v1351_v54, %v1350_v53 }
 0x866   : > { %v1353_v56 = vmul.f32 0.03125, %v1352_v55 }
 0x868   : > { %v1354_v14 = vadd.f32 1e-05, %v1353_v56 }
 0x86a   : > { %1847 = vrsqrt.f32 %v1354_v14 }
 0x874   : > { %v1848_v62 = vpop.eup %1847 }
 0x875   : > { %v1356_v63 = vmul.f32 %v1848_v62, %v1332_v40  ;;  %v1357_v0 = vmul.f32 %v1848_v62, %v1333_v41  ;;  %v1358_v1 = vmul.f32 %v1848_v62, %v1334_v19  ;;  %v1359_v2 = vmul.f32 %v1848_v62, %v1335_v7 }
 0x877   : > { %v1380_v3 = vmul.f32 %v1363_v52, %v1356_v63  ;;  %v1381_v4 = vmul.f32 %v1368_v58, %v1357_v0  ;;  %v1382_v5 = vmul.f32 %v1373_v11, %v1358_v1  ;;  %v1383_v6 = vmul.f32 %v1378_v57, %v1359_v2 }
 0x879   : > { %v1404_v12 = vadd.f32 %v1387_v59, %v1380_v3  ;;  %v1405_v15 = vadd.f32 %v1392_v25, %v1381_v4  ;;  %v1406_v18 = vadd.f32 %v1397_v10, %v1382_v5  ;;  %v1407_v20 = vadd.f32 %v1402_v9, %v1383_v6 }
 0x87b   : > { %1408 = vst.msk [vmem:[%s475_s14] sm:$0xff] %vm489_vm0, %v1404_v12  ;;  %1409 = vst.msk [vmem:[%s475_s14 + $0x8] sm:$0xff] %vm489_vm0, %v1405_v15 }
 0x87c   : > { %1410 = vst.msk [vmem:[%s475_s14 + $0x10] sm:$0xff] %vm489_vm0, %v1406_v18  ;;  %1411 = vst.msk [vmem:[%s475_s14 + $0x18] sm:$0xff] %vm489_vm0, %v1407_v20 }
 0x87d PF: > { %s19_s9 = sadd.s32 1, %s1906_s9   ;;  %s2240_s27 = smov %s1898_s29 }
 0x87e   : > { %p16_p3 = scmp.ge.s32.totalorder %s19_s9, 6   ;;  %s2241_s28 = smov %s1902_s30 }
 0x87f   : > { %s2242_s29 = smov %s2245_s11  ;;  %s2243_s30 = smov %s2249_s12 }
 0x880   :  { %18 = sbr.rel (!%p16_p3) target bundleno = 3 (0x3), region = 105 }
 0x887   :  { %1441 = vsyncpa [#allocation4], 1 }
 0x888   :  { %1443 = vsyncpa [#allocation4 + $0x1], 1 }

// kernel: dual_channel_block.6
= control target key start
LH: loop header
LB: loop body
LE: loop exit
PB: predicated region body
PF: predicated region fallthrough
CT: control target
= control target key end

     0   :  { %11 = vsyncpa [#allocation4], 0  ;;  %s1416_s21 = smov 0   ;;  %s1594_s0 = inlined_call_operand.vmem [shape: f32[2,32,64], index: 0, kind: input, shape index: {}]   ;;  %s1595_s1 = inlined_call_operand.vmem [shape: f32[2,32,64], index: 1, kind: input, shape index: {}]   ;;  %s1596_s2 = inlined_call_operand.vmem [shape: bf16[32,32], index: 2, kind: input, shape index: {}]   ;;  %s1597_s3 = inlined_call_operand.vmem [shape: bf16[64,32], index: 3, kind: input, shape index: {}]   ;;  %s1598_s4 = inlined_call_operand.vmem [shape: bf16[32,32], index: 4, kind: input, shape index: {}]   ;;  %s1599_s5 = inlined_call_operand.vmem [shape: f32[1,4], index: 5, kind: input, shape index: {}]   ;;  %s1600_s6 = inlined_call_operand.vmem [shape: f32[2,32,64], index: 6, kind: output, shape index: {}]  }
   0x1 LB: > { %s1139_s22 = sadd.s32 4294967295, %s1376_s21   ;;  %p1141_p0 = scmp.ge.s32.totalorder %s1376_s21, 1  ;;  %s1376_s21 = sphi %s1416_s21, %s17_s21  }
   0x2   : > { %p184_p1 = scmp.lt.s32.totalorder %s1376_s21, 3  ;;  %s206_s25 = sshll.u32 %s1599_s5, 4  ;;  %s207_s25 = int_to_ptr.vmem [resolvable:$true] %s206_s25 }
   0x3   : > { %p1298_p3 = scmp.eq.s32.totalorder %s1139_s22, 0  ;;  %s1351_s27 = scalar_lea.vmem %s207_s25, 16 }
   0x4   : > { %p1427_p2 = pnand %p1141_p0, %p184_p1  ;;  %p1352_p6 = scmp.ne.s32.totalorder %s207_s25, %s1351_s27 }
   0x5   : > { %p1359_p10 = scmp.lt.s32.totalorder %s207_s25, %s207_s25  ;;  %p1360_p11 = scmp.lt.s32.totalorder %s1351_s27, %s1351_s27 }
   0x6   : > { %p1294_p4 = pneg %p1427_p2 }
   0x7   : > { %p1361_p12 = por %p1360_p11, %p1359_p10 }
   0x8   : > { %p1295_p5 = pnand %p1298_p3, %p1294_p4 }
   0xa   : > { %p1353_p7 = pneg %p1295_p5 }
   0xc   : > { %p1354_p8 = pnand %p1353_p7, %p1352_p6 }
   0xe   : > { %p1355_p9 = pneg %p1354_p8 }
  0x10   : > { %p1362_p13 = pnand %p1361_p12, %p1355_p9 }
  0x12   : > { %1365 = shalt.err (!%p1362_p13)
}
  0x13   : > { %s1378_s28 = smov [#allocation3]   ;;  %235 = sbr.rel (%p1427_p2) target bundleno = 1426 (0x592), region = 44 }
  0x14   : > { %1297 = dma.vmem_to_smem (!%p1295_p5), %s207_s25, 16, %s1378_s28, [#allocation4]  }
  0x1a   : > { %1371 = dma.done.wait (%p1298_p3), [#allocation4], 16  }
  0x1b   : > { %1373 = vsyncadd (%p1298_p3), [#allocation4], 4294967280 }
  0x1c   : > { %241 = sfence }
  0x1d   : > { %p271_p0 = scmp.lt.s32.totalorder %s1139_s22, 1  ;;  %vm313_vm0 = vcmask 261120   ;;  %v1311_v0 = vld [vmem:[%s1597_s3] sm:$0xff]   ;;  %v1312_v14 = vld [vmem:[%s1597_s3 + $0x8] sm:$0xff]   ;;  %vm476_vm1 = vcmask 523264   ;;  %v1379_v29 = vmov 0.0  }
  0x1e   : > { %1226 = vmatprep.mubr.msk.bf16.mxu1 %vm313_vm0, %v1311_v0  ;;  %v1313_v1 = vld [vmem:[%s1596_s2] sm:$0xff]   ;;  %v1314_v15 = vld [vmem:[%s1596_s2 + $0x8] sm:$0xff]   ;;  %v1315_v34 = vld [vmem:[%s1597_s3 + $0x10] sm:$0xff]   ;;  %vm1380_vm2 = vmmov 0   ;;  %vm557_vm3 = vcmask 1043456   ;;  %s474_s25 = sld [smem:[#allocation3]] }
  0x1f   : > { %s1603_s22 = smov (!%p271_p0, %s1139_s22), 1  ;;  %1218 = vmatprep.mubr.msk.bf16.mxu0 %vm313_vm0, %v1313_v1  ;;  %v1316_v35 = vld [vmem:[%s1597_s3 + $0x18] sm:$0xff]   ;;  %s1166_s26 = sld [smem:[#allocation3 + $0x1]]  ;;  %vm540_vm4 = vcmask 64512  }
  0x20   : > { %s1445_s9 = sshll.u32 %s1603_s22, 5  ;;  %s1169_s27 = sld [smem:[#allocation3 + $0x2]] }
  0x21   : > { %s280_s12 = scalar_lea.vmem %s1595_s1, %s1445_s9  ;;  %s275_s15 = scalar_lea.vmem %s1594_s0, %s1445_s9 }
  0x22   : > { %v293_v2 = vld [vmem:[%s280_s12] sm:$0xff]  ;;  %v294_v3 = vld [vmem:[%s280_s12 + $0x8] sm:$0xff]  ;;  %v295_v4 = vld [vmem:[%s280_s12 + $0x10] sm:$0xff]  ;;  %s1172_s28 = sld [smem:[#allocation3 + $0x3]] }
  0x23   : > { %v297_v5 = vpack.c.bf16 %v294_v3, %v293_v2  ;;  %v296_v6 = vld [vmem:[%s280_s12 + $0x18] sm:$0xff]  ;;  %v1456_v7 = vld [vmem:[%s275_s15] sm:$0xff]  ;;  %v1458_v8 = vld [vmem:[%s275_s15 + $0x8] sm:$0xff]  ;;  %s285_s12 = scalar_lea.vmem %s1600_s6, %s1445_s9 }
  0x24   : > { %v298_v9 = vpack.c.bf16 %v296_v6, %v295_v4  ;;  %v291_v10 = vpack.c.bf16 %v1458_v8, %v1456_v7  ;;  %v1462_v11 = vld [vmem:[%s275_s15 + $0x10] sm:$0xff]  ;;  %v1464_v12 = vld [vmem:[%s275_s15 + $0x18] sm:$0xff] }
  0x25   : > { %1222 = vmatprep.subr.bf16.mxu1 %v297_v5  ;;  %v292_v13 = vpack.c.bf16 %v1464_v12, %v1462_v11 }
  0x26   : > { %1223 = vmatpush3.bf16.msra.mxu1 %v297_v5  ;;  %1214 = vmatprep.subr.bf16.mxu0 %v291_v10 }
  0x27   : > { %1224 = vmatprep.subr.bf16.mxu1 %v298_v9  ;;  %1215 = vmatpush3.bf16.msra.mxu0 %v291_v10 }
  0x28   : > { %1216 = vmatprep.subr.bf16.mxu0 %v292_v13 }
  0x2a   : > { %1225 = vmatpush3.bf16.msra.mxu1 %v298_v9 }
  0x2b   : > { %1217 = vmatpush3.bf16.msra.mxu0 %v292_v13  ;;  %1246 = vmatprep.subr.bf16.mxu1 %v1379_v29 }
  0x2c   : > { %1234 = vmatprep.subr.bf16.mxu0 %v1379_v29 }
  0x2d   : > { %1227 = vmatmul.mubr.msk.bf16.vlgmr.msra.gmra.mrb[0].mxu1 %vm313_vm0, %v1312_v14 }
  0x2e   : > { %1219 = vmatmul.mubr.msk.bf16.vlgmr.msra.gmra.mrb[0].mxu0 %vm313_vm0, %v1314_v15  ;;  %1230 = vmatprep.mubr.msk.bf16.mxu1 %vm313_vm0, %v1315_v34 }
  0x2f   : > { %1236 = vmatprep.mubr.msk.bf16.mxu0 %vm1380_vm2, %v1379_v29 }
  0x35   : > { %1231 = vmatmul.mubr.msk.bf16.gmra.mrb[4].mxu1 %vm313_vm0, %v1316_v35 }
  0x36   : > { %1248 = vmatprep.mubr.msk.bf16.mxu1 %vm1380_vm2, %v1379_v29 }
 0x100   : > { %v1476_v16 = vpop.f32.mrb[0].mxu1 }
 0x101   : > { %v443_v17 = vpop.f32.mrb[1].mxu1  ;;  %v732_v18 = vmul.f32 %v1476_v16, %v1476_v16  ;;  %v1488_v28 = vpop.f32.mrb[0].mxu0 }
 0x102   : > { %v1480_v19 = vpop.f32.mrb[2].mxu1  ;;  %v480_v20 = vmul.f32 %v443_v17, %v443_v17  ;;  %v354_v30 = vpop.f32.mrb[1].mxu0  ;;  %v728_v37 = vmul.f32 %v1488_v28, %v1488_v28  ;;  %v739_v4 = vpack.c.bf16 %v1488_v28, %v1488_v28 }
 0x103   : > { %v857_v21 = vmul.f32 %v1480_v19, %v1480_v19  ;;  %v446_v22 = vpop.f32.mrb[3].mxu1  ;;  %v733_v23 = vsel %vm476_vm1, %v732_v18, 0.0  ;;  %v1492_v31 = vpop.f32.mrb[2].mxu0  ;;  %v475_v33 = vmul.f32 %v354_v30, %v354_v30  ;;  %v487_v59 = vpack.c.bf16 %v354_v30, %v354_v30 }
 0x104   : > { %v607_v24 = vmul.f32 %v446_v22, %v446_v22  ;;  %734 = vadd.xlane.f32.xlu1 %v733_v23  ;;  %v481_v25 = vsel %vm476_vm1, %v480_v20, 0.0  ;;  %v357_v32 = vpop.f32.mrb[3].mxu0  ;;  %v853_v38 = vmul.f32 %v1492_v31, %v1492_v31  ;;  %v729_v41 = vsel %vm476_vm1, %v728_v37, 0.0 }
 0x105   : > { %482 = vadd.xlane.f32.xlu0 %v481_v25  ;;  %v858_v26 = vsel %vm476_vm1, %v857_v21, 0.0  ;;  %v603_v36 = vmul.f32 %v357_v32, %v357_v32  ;;  %v477_v39 = vsel %vm476_vm1, %v475_v33, 0.0  ;;  %v614_v0 = vpack.c.bf16 %v357_v32, %v357_v32 }
 0x106   : > { %v608_v27 = vsel %vm476_vm1, %v607_v24, 0.0  ;;  %v854_v42 = vsel %vm476_vm1, %v853_v38, 0.0  ;;  %v864_v6 = vpack.c.bf16 %v1492_v31, %v1492_v31  ;;  %v537_v31 = vstv %s474_s25 }
 0x107   : > { %v604_v40 = vsel %vm476_vm1, %v603_v36, 0.0  ;;  %v664_v36 = vstv %s1166_s26 }
 0x108   : > { %859 = vadd.xlane.f32.xlu1 %v858_v26  ;;  %v1232_v9 = vpop.f32.mrb[4].mxu1 }
 0x109   : > { %609 = vadd.xlane.f32.xlu0 %v608_v27  ;;  %v804_v10 = vpack.c.bf16 %v1232_v9, %v1232_v9  ;;  %v459_v13 = vpop.f32.mrb[5].mxu1 }
 0x10a   : > { %v1233_v15 = vpop.f32.mrb[6].mxu1 }
 0x10b   : > { %v1537_v14 = vsel %vm557_vm3, %v804_v10, 0  ;;  %v929_v18 = vpack.c.bf16 %v1233_v15, %v1233_v15 }
 0x10c   : > { %605 = vadd.xlane.f32.xlu1 %v604_v40 }
 0x10d   : > { %478 = vadd.xlane.f32.xlu0 %v477_v39  ;;  %v1539_v21 = vsel %vm557_vm3, %v929_v18, 0 }
 0x110   : > { %855 = vadd.xlane.f32.xlu1 %v854_v42 }
 0x111   : > { %730 = vadd.xlane.f32.xlu0 %v729_v41 }
 0x191   : > { %v735_v45 = vpop.xlane.xlu1 %734 }
 0x192   : > { %v483_v43 = vpop.xlane.xlu0 %482  ;;  %v736_v47 = vmax.f32 %v735_v45, 1e-24 }
 0x193   : > { %v484_v44 = vmax.f32 %v483_v43, 1e-24 }
 0x195   : > { %1319 = vrsqrt.f32 %v484_v44  ;;  %v860_v49 = vpop.xlane.xlu1 %859 }
 0x196   : > { %v610_v46 = vpop.xlane.xlu0 %609  ;;  %v861_v51 = vmax.f32 %v860_v49, 1e-24 }
 0x197   : > { %v611_v48 = vmax.f32 %v610_v46, 1e-24 }
 0x199   : > { %1321 = vrsqrt.f32 %v611_v48  ;;  %v606_v25 = vpop.xlane.xlu1 %605 }
 0x19a   : > { %1323 = vrsqrt.f32 %v736_v47  ;;  %v479_v23 = vpop.xlane.xlu0 %478  ;;  %v662_v26 = vmax.f32 %v606_v25, 1e-24 }
 0x19b   : > { %1325 = vrsqrt.f32 %v861_v51  ;;  %v535_v24 = vmax.f32 %v479_v23, 1e-24  ;;  %v789_v51 = vstv %s1169_s27 }
 0x19d   : > { %1327 = vrsqrt.f32 %v535_v24  ;;  %v856_v32 = vpop.xlane.xlu1 %855 }
 0x19e   : > { %1329 = vrsqrt.f32 %v662_v26  ;;  %v731_v27 = vpop.xlane.xlu0 %730  ;;  %v912_v39 = vmax.f32 %v856_v32, 1e-24 }
 0x19f   : > { %v1320_v50 = vpop.eup %1319  ;;  %v787_v28 = vmax.f32 %v731_v27, 1e-24 }
 0x1a0   : > { %v486_v52 = vmul.f32 %v1320_v50, %v443_v17  ;;  %v553_v17 = vpack.c.bf16 %v459_v13, %v459_v13 }
 0x1a1   : > { %1331 = vrsqrt.f32 %v787_v28 }
 0x1a2   : > { %v488_v53 = vpack.c.bf16 %v486_v52, %v486_v52  ;;  %v559_v20 = vsel %vm557_vm3, %v553_v17, 0  ;;  %1333 = vrsqrt.f32 %v912_v39 }
 0x1a3   : > { %v1322_v54 = vpop.eup %1321 }
 0x1a4   : > { %v493_v55 = vsel %vm476_vm1, %v488_v53, 0  ;;  %v613_v56 = vmul.f32 %v1322_v54, %v446_v22  ;;  %v1324_v57 = vpop.eup %1323 }
 0x1a5   : > { %1235 = vmatpush3.bf16.xpose.msra.mxu0 %v493_v55  ;;  %v738_v61 = vmul.f32 %v1324_v57, %v1476_v16  ;;  %v1326_v63 = vpop.eup %1325  ;;  %v462_v16 = vpop.f32.mrb[7].mxu1 }
 0x1a6   : > { %v615_v58 = vpack.c.bf16 %v613_v56, %v613_v56  ;;  %1240 = vmatprep.subr.bf16.mxu0 %v1379_v29  ;;  %v863_v2 = vmul.f32 %v1326_v63, %v1480_v19  ;;  %v679_v19 = vpack.c.bf16 %v462_v16, %v462_v16 }
 0x1a7   : > { %v740_v62 = vpack.c.bf16 %v738_v61, %v738_v61  ;;  %v1328_v30 = vpop.eup %1327 }
 0x1a8   : > { %v620_v60 = vsel %vm476_vm1, %v615_v58, 0  ;;  %v865_v3 = vpack.c.bf16 %v863_v2, %v863_v2  ;;  %v1541_v22 = vsel %vm557_vm3, %v679_v19, 0  ;;  %v538_v33 = vmul.f32 %v1328_v30, %v537_v31  ;;  %v1330_v34 = vpop.eup %1329 }
 0x1a9   : > { %1247 = vmatpush3.bf16.xpose.msra.mxu1 %v620_v60  ;;  %v745_v1 = vsel %vm476_vm1, %v740_v62, 0  ;;  %v665_v42 = vmul.f32 %v1330_v34, %v664_v36  ;;  %v914_v60 = vstv %s1172_s28 }
 0x1aa   : > { %1258 = vmatprep.subr.bf16.mxu1 %v1379_v29  ;;  %v870_v5 = vsel %vm476_vm1, %v865_v3, 0 }
 0x1ab   : > { %v1332_v50 = vpop.eup %1331 }
 0x1ac   : > { %1237 = vmatmul.mubr.msk.bf16.vlgmr.msra.gmra.mrb[4].mxu0 %vm476_vm1, %v487_v59  ;;  %v790_v52 = vmul.f32 %v1332_v50, %v789_v51  ;;  %v1334_v59 = vpop.eup %1333 }
 0x1ad   : > { %1242 = vmatprep.mubr.msk.bf16.mxu0 %vm1380_vm2, %v1379_v29  ;;  %1241 = vmatpush3.bf16.msra.mxu0 %v559_v20  ;;  %v915_v61 = vmul.f32 %v1334_v59, %v914_v60 }
 0x1ae   : > { %1252 = vmatprep.subr.bf16.mxu0 %v1379_v29 }
 0x1b0   : > { %1249 = vmatmul.mubr.msk.bf16.vlgmr.msra.gmra.mrb[8].mxu1 %vm476_vm1, %v614_v0 }
 0x1b1   : > { %1259 = vmatpush3.bf16.xpose.msra.mxu1 %v745_v1  ;;  %1260 = vmatprep.mubr.msk.bf16.mxu1 %vm1380_vm2, %v1379_v29 }
 0x1b2   : > { %1270 = vmatprep.subr.bf16.mxu1 %v1379_v29 }
 0x1b8   : > { %1261 = vmatmul.mubr.msk.bf16.vlgmr.msra.gmra.mrb[12].mxu1 %vm476_vm1, %v739_v4 }
 0x1b9   : > { %1271 = vmatpush3.bf16.xpose.msra.mxu1 %v870_v5  ;;  %1272 = vmatprep.mubr.msk.bf16.mxu1 %vm1380_vm2, %v1379_v29 }
 0x1c0   : > { %1273 = vmatmul.mubr.msk.bf16.vlgmr.msra.gmra.mrb[16].mxu1 %vm476_vm1, %v864_v6 }
 0x27f   : > { %v529_v35 = vpop.f32.mrb[4].mxu0 }
 0x280   : > { %v539_v37 = vmul.f32 %v538_v33, %v529_v35  ;;  %v1238_v38 = vpop.f32.mrb[5].mxu0 }
 0x281   : > { %v532_v40 = vpop.f32.mrb[6].mxu0 }
 0x282   : > { %v1239_v41 = vpop.f32.mrb[7].mxu0  ;;  %v541_v43 = vsel %vm540_vm4, %v539_v37, -inf }
 0x283   : > { %v656_v44 = vpop.f32.mrb[8].mxu1  ;;  %542 = vmax.xlane.f32.xlu0 %v541_v43 }
 0x284   : > { %v666_v45 = vmul.f32 %v665_v42, %v656_v44  ;;  %v1250_v46 = vpop.f32.mrb[9].mxu1 }
 0x285   : > { %v659_v47 = vpop.f32.mrb[10].mxu1 }
 0x286   : > { %v1251_v48 = vpop.f32.mrb[11].mxu1  ;;  %v667_v49 = vsel %vm540_vm4, %v666_v45, -inf }
 0x287   : > { %668 = vmax.xlane.f32.xlu1 %v667_v49 }
 0x28b   : > { %v781_v53 = vpop.f32.mrb[12].mxu1 }
 0x28c   : > { %v791_v54 = vmul.f32 %v790_v52, %v781_v53  ;;  %v1262_v55 = vpop.f32.mrb[13].mxu1 }
 0x28d   : > { %v784_v56 = vpop.f32.mrb[14].mxu1 }
 0x28e   : > { %v1263_v57 = vpop.f32.mrb[15].mxu1  ;;  %v792_v58 = vsel %vm540_vm4, %v791_v54, -inf }
 0x28f   : > { %793 = vmax.xlane.f32.xlu0 %v792_v58 }
 0x293   : > { %v906_v62 = vpop.f32.mrb[16].mxu1 }
 0x294   : > { %v916_v63 = vmul.f32 %v915_v61, %v906_v62  ;;  %v1274_v0 = vpop.f32.mrb[17].mxu1 }
 0x295   : > { %v909_v1 = vpop.f32.mrb[18].mxu1 }
 0x296   : > { %v1275_v2 = vpop.f32.mrb[19].mxu1  ;;  %v917_v3 = vsel %vm540_vm4, %v916_v63, -inf }
 0x297   : > { %918 = vmax.xlane.f32.xlu1 %v917_v3  ;;  %v1318_v3 = vld [vmem:[%s1598_s4 + $0x8] sm:$0xff]  }
 0x310   : > { %v543_v4 = vpop.xlane.xlu0 %542 }
 0x311   : > { %v544_v5 = vsub.f32 %v539_v37, %v543_v4 }
 0x313   : > { %v545_v6 = vmul.f32 1.442695, %v544_v5 }
 0x314   : > { %v669_v9 = vpop.xlane.xlu1 %668 }
 0x315   : > { %1335 = vpow2.f32 %v545_v6  ;;  %v670_v10 = vsub.f32 %v666_v45, %v669_v9 }
 0x317   : > { %v671_v13 = vmul.f32 1.442695, %v670_v10 }
 0x319   : > { %1337 = vpow2.f32 %v671_v13 }
 0x31c   : > { %v794_v15 = vpop.xlane.xlu0 %793 }
 0x31d   : > { %v795_v16 = vsub.f32 %v791_v54, %v794_v15 }
 0x31f   : > { %v1336_v17 = vpop.eup %1335  ;;  %v796_v18 = vmul.f32 1.442695, %v795_v16 }
 0x320   : > { %v547_v19 = vsel %vm540_vm4, %v1336_v17, 0.0 }
 0x321   : > { %1339 = vpow2.f32 %v796_v18  ;;  %548 = vadd.xlane.f32.xlu0 %v547_v19 }
 0x323   : > { %v1338_v20 = vpop.eup %1337 }
 0x324   : > { %v919_v23 = vpop.xlane.xlu1 %918  ;;  %v673_v24 = vsel %vm540_vm4, %v1338_v20, 0.0 }
 0x325   : > { %v920_v25 = vsub.f32 %v916_v63, %v919_v23  ;;  %674 = vadd.xlane.f32.xlu1 %v673_v24 }
 0x327   : > { %v921_v26 = vmul.f32 1.442695, %v920_v25 }
 0x329   : > { %1341 = vpow2.f32 %v921_v26 }
 0x32b   : > { %v1340_v27 = vpop.eup %1339 }
 0x32c   : > { %v798_v28 = vsel %vm540_vm4, %v1340_v27, 0.0 }
 0x32d   : > { %799 = vadd.xlane.f32.xlu0 %v798_v28 }
 0x333   : > { %v1342_v30 = vpop.eup %1341 }
 0x334   : > { %v923_v31 = vsel %vm540_vm4, %v1342_v30, 0.0 }
 0x335   : > { %924 = vadd.xlane.f32.xlu1 %v923_v31 }
 0x3ae   : > { %v549_v32 = vpop.xlane.xlu0 %548 }
 0x3af   : > { %1343 = vrcp.f32 %v549_v32 }
 0x3b2   : > { %v675_v33 = vpop.xlane.xlu1 %674 }
 0x3b3   : > { %1345 = vrcp.f32 %v675_v33 }
 0x3b9   : > { %v1344_v34 = vpop.eup %1343 }
 0x3ba   : > { %v551_v35 = vmul.f32 %v1344_v34, %v1336_v17  ;;  %v800_v36 = vpop.xlane.xlu0 %799 }
 0x3bb   : > { %1347 = vrcp.f32 %v800_v36 }
 0x3bc   : > { %v552_v37 = vpack.c.bf16 %v551_v35, %v551_v35 }
 0x3bd   : > { %v1346_v38 = vpop.eup %1345 }
 0x3be   : > { %1243 = vmatmul.mubr.msk.bf16.vlgmr.msra.gmra.mrb[8].mxu0 %vm540_vm4, %v552_v37  ;;  %v677_v39 = vmul.f32 %v1346_v38, %v1338_v20 }
 0x3bf   : > { %1253 = vmatpush3.bf16.msra.mxu0 %v1541_v22  ;;  %1254 = vmatprep.mubr.msk.bf16.mxu0 %vm1380_vm2, %v1379_v29 }
 0x3c0   : > { %1264 = vmatprep.subr.bf16.mxu0 %v1379_v29  ;;  %v678_v41 = vpack.c.bf16 %v677_v39, %v677_v39 }
 0x3c2   : > { %v925_v40 = vpop.xlane.xlu1 %924 }
 0x3c3   : > { %1349 = vrcp.f32 %v925_v40 }
 0x3c5   : > { %v1348_v42 = vpop.eup %1347 }
 0x3c6   : > { %1255 = vmatmul.mubr.msk.bf16.vlgmr.msra.gmra.mrb[12].mxu0 %vm540_vm4, %v678_v41  ;;  %v802_v43 = vmul.f32 %v1348_v42, %v1340_v27 }
 0x3c7   : > { %1265 = vmatpush3.bf16.msra.mxu0 %v1537_v14  ;;  %1266 = vmatprep.mubr.msk.bf16.mxu0 %vm1380_vm2, %v1379_v29  ;;  %v1317_v14 = vld [vmem:[%s1598_s4] sm:$0xff]  }
 0x3c8   : > { %1276 = vmatprep.subr.bf16.mxu0 %v1379_v29  ;;  %v803_v22 = vpack.c.bf16 %v802_v43, %v802_v43  ;;  %1286 = vmatprep.mubr.msk.bf16.mxu1 %vm313_vm0, %v1317_v14 }
 0x3cd   : > { %v1350_v44 = vpop.eup %1349 }
 0x3ce   : > { %1267 = vmatmul.mubr.msk.bf16.vlgmr.msra.gmra.mrb[16].mxu0 %vm540_vm4, %v803_v22  ;;  %v927_v45 = vmul.f32 %v1350_v44, %v1342_v30 }
 0x3cf   : > { %1277 = vmatpush3.bf16.msra.mxu0 %v1539_v21  ;;  %1278 = vmatprep.mubr.msk.bf16.mxu0 %vm1380_vm2, %v1379_v29 }
 0x3d0   : > { %v928_v46 = vpack.c.bf16 %v927_v45, %v927_v45 }
 0x3d6   : > { %1279 = vmatmul.mubr.msk.bf16.vlgmr.msra.gmra.mrb[20].mxu0 %vm540_vm4, %v928_v46 }
 0x491   : > { %v595_v47 = vpop.f32.mrb[8].mxu0 }
 0x492   : > { %601 = vst.msk [vmem:[#allocation2] sm:$0xff] %vm476_vm1, %v595_v47  ;;  %v1244_v48 = vpop.f32.mrb[9].mxu0 }
 0x493   : > { %v598_v49 = vpop.f32.mrb[10].mxu0 }
 0x494   : > { %v1245_v50 = vpop.f32.mrb[11].mxu0 }
 0x499   : > { %v720_v21 = vpop.f32.mrb[12].mxu0  ;;  %v981_v54 = vld [vmem:[#allocation2] sm:$0xff] }
 0x49a   : > { %726 = vst.msk [vmem:[#allocation2 + $0x8] sm:$0xff] %vm476_vm1, %v720_v21  ;;  %v1256_v29 = vpop.f32.mrb[13].mxu0 }
 0x49b   : > { %v723_v51 = vpop.f32.mrb[14].mxu0 }
 0x49c   : > { %v1257_v52 = vpop.f32.mrb[15].mxu0 }
 0x4a1   : > { %v845_v53 = vpop.f32.mrb[16].mxu0  ;;  %v982_v55 = vld [vmem:[#allocation2 + $0x8] sm:$0xff] }
 0x4a2   : > { %851 = vst.msk [vmem:[#allocation2 + $0x10] sm:$0xff] %vm476_vm1, %v845_v53  ;;  %v1268_v56 = vpop.f32.mrb[17].mxu0  ;;  %v985_v57 = vpack.c.bf16 %v982_v55, %v981_v54 }
 0x4a3   : > { %v848_v58 = vpop.f32.mrb[18].mxu0 }
 0x4a4   : > { %v1269_v59 = vpop.f32.mrb[19].mxu0  ;;  %1282 = vmatprep.subr.bf16.mxu1 %v985_v57 }
 0x4a5   : > { %1283 = vmatpush3.bf16.msra.mxu1 %v985_v57 }
 0x4a9   : > { %v970_v60 = vpop.f32.mrb[20].mxu0  ;;  %v983_v0 = vld [vmem:[#allocation2 + $0x10] sm:$0xff] }
 0x4aa   : > { %976 = vst.msk [vmem:[#allocation2 + $0x18] sm:$0xff] %vm476_vm1, %v970_v60  ;;  %v1280_v61 = vpop.f32.mrb[21].mxu0 }
 0x4ab   : > { %v973_v62 = vpop.f32.mrb[22].mxu0 }
 0x4ac   : > { %v1281_v63 = vpop.f32.mrb[23].mxu0 }
 0x4b1   : > { %v984_v1 = vld [vmem:[#allocation2 + $0x18] sm:$0xff] }
 0x4b2   : > { %v986_v2 = vpack.c.bf16 %v984_v1, %v983_v0 }
 0x4b4   : > { %1284 = vmatprep.subr.bf16.mxu1 %v986_v2 }
 0x4b5   : > { %1285 = vmatpush3.bf16.msra.mxu1 %v986_v2 }
 0x4b8   : > { %1287 = vmatmul.mubr.msk.bf16.vlgmr.msra.gmra.mrb[20].mxu1 %vm313_vm0, %v1318_v3 }
 0x58b   : > { %v1288_v4 = vpop.f32.mrb[20].mxu1 }
 0x58c   : > { %v1054_v5 = vadd.f32 %v1288_v4, %v1462_v11  ;;  %v1037_v6 = vpop.f32.mrb[21].mxu1 }
 0x58d   : > { %v1052_v9 = vadd.f32 %v1037_v6, %v1456_v7  ;;  %v1289_v10 = vpop.f32.mrb[22].mxu1 }
 0x58e   : > { %1058 = vst.msk [vmem:[%s285_s12 + $0x10] sm:$0xff] %vm476_vm1, %v1054_v5  ;;  %v1055_v13 = vadd.f32 %v1289_v10, %v1464_v12  ;;  %v1040_v15 = vpop.f32.mrb[23].mxu1 }
 0x58f   : > { %1056 = vst.msk [vmem:[%s285_s12] sm:$0xff] %vm476_vm1, %v1052_v9  ;;  %v1053_v16 = vadd.f32 %v1040_v15, %v1458_v8 }
 0x590   : > { %1059 = vst.msk [vmem:[%s285_s12 + $0x18] sm:$0xff] %vm476_vm1, %v1055_v13 }
 0x591   : > { %1057 = vst.msk [vmem:[%s285_s12 + $0x8] sm:$0xff] %vm476_vm1, %v1053_v16 }
 0x592 PF: > { %s17_s21 = sadd.s32 1, %s1376_s21  }
 0x593   : > { %p14_p1 = scmp.ge.s32.totalorder %s17_s21, 4  }
 0x595   :  { %16 = sbr.rel (!%p14_p1) target bundleno = 1 (0x1), region = 82 }
 0x59c   :  { %1081 = vsyncpa [#allocation4], 1 }
 0x59d   :  { %1083 = vsyncpa [#allocation4 + $0x1], 1 }

// kernel: dual_channel_block.5
= control target key start
LH: loop header
LB: loop body
LE: loop exit
PB: predicated region body
PF: predicated region fallthrough
CT: control target
= control target key end

     0   :  { %13 = vsyncpa [#allocation4], 0  ;;  %s1585_s27 = smov 0   ;;  %s1795_s0 = inlined_call_operand.vmem [shape: f32[2,32,64], index: 0, kind: input, shape index: {}]   ;;  %s1796_s1 = inlined_call_operand.vmem [shape: f32[2,32,64], index: 1, kind: input, shape index: {}]   ;;  %s1797_s2 = inlined_call_operand.vmem [shape: f32[32,1], index: 2, kind: input, shape index: {}]   ;;  %s1798_s3 = inlined_call_operand.vmem [shape: f32[32,1], index: 3, kind: input, shape index: {}]   ;;  %s1799_s4 = inlined_call_operand.vmem [shape: bf16[32,32], index: 4, kind: input, shape index: {}]   ;;  %s1800_s5 = inlined_call_operand.vmem [shape: bf16[64,32], index: 5, kind: input, shape index: {}]   ;;  %s1801_s6 = inlined_call_operand.vmem [shape: bf16[32,32], index: 6, kind: input, shape index: {}]   ;;  %s1802_s7 = inlined_call_operand.vmem [shape: f32[1,4], index: 7, kind: input, shape index: {}]   ;;  %s1803_s8 = inlined_call_operand.vmem [shape: f32[2,32,64], index: 8, kind: output, shape index: {}]  }
   0x1 LB: > { %s1292_s28 = sadd.s32 4294967295, %s1534_s27   ;;  %p1294_p0 = scmp.ge.s32.totalorder %s1534_s27, 1  ;;  %s1534_s27 = sphi %s1585_s27, %s19_s27  }
   0x2   : > { %p228_p1 = scmp.lt.s32.totalorder %s1534_s27, 3  ;;  %s256_s9 = sshll.u32 %s1802_s7, 4  ;;  %s257_s9 = int_to_ptr.vmem [resolvable:$true] %s256_s9 }
   0x3   : > { %p1451_p3 = scmp.eq.s32.totalorder %s1292_s28, 0  ;;  %s1509_s11 = scalar_lea.vmem %s257_s9, 16 }
   0x4   : > { %p1596_p2 = pnand %p1294_p0, %p228_p1  ;;  %p1510_p6 = scmp.ne.s32.totalorder %s257_s9, %s1509_s11 }
   0x5   : > { %p1517_p10 = scmp.lt.s32.totalorder %s257_s9, %s257_s9  ;;  %p1518_p11 = scmp.lt.s32.totalorder %s1509_s11, %s1509_s11 }
   0x6   : > { %p1447_p4 = pneg %p1596_p2 }
   0x7   : > { %p1519_p12 = por %p1518_p11, %p1517_p10 }
   0x8   : > { %p1448_p5 = pnand %p1451_p3, %p1447_p4 }
   0xa   : > { %p1511_p7 = pneg %p1448_p5 }
   0xc   : > { %p1512_p8 = pnand %p1511_p7, %p1510_p6 }
   0xe   : > { %p1513_p9 = pneg %p1512_p8 }
  0x10   : > { %p1520_p13 = pnand %p1519_p12, %p1513_p9 }
  0x12   : > { %1523 = shalt.err (!%p1520_p13)
}
  0x13   : > { %s1536_s12 = smov [#allocation3]   ;;  %285 = sbr.rel (%p1596_p2) target bundleno = 1492 (0x5d4), region = 52 }
  0x14   : > { %1450 = dma.vmem_to_smem (!%p1448_p5), %s257_s9, 16, %s1536_s12, [#allocation4]  }
  0x1a   : > { %1529 = dma.done.wait (%p1451_p3), [#allocation4], 16  }
  0x1b   : > { %1531 = vsyncadd (%p1451_p3), [#allocation4], 4294967280 }
  0x1c   : > { %291 = sfence }
  0x1d   : > { %p325_p0 = scmp.lt.s32.totalorder %s1292_s28, 1  ;;  %vm367_vm0 = vcmask 261120   ;;  %v1467_v0 = vld [vmem:[%s1800_s5] sm:$0xff]   ;;  %v1468_v14 = vld [vmem:[%s1800_s5 + $0x8] sm:$0xff]   ;;  %vm530_vm1 = vcmask 523264   ;;  %v1537_v29 = vmov 0.0  }
  0x1e   : > { %1379 = vmatprep.mubr.msk.bf16.mxu1 %vm367_vm0, %v1467_v0  ;;  %v1469_v1 = vld [vmem:[%s1799_s4] sm:$0xff]   ;;  %v1470_v15 = vld [vmem:[%s1799_s4 + $0x8] sm:$0xff]   ;;  %v1471_v34 = vld [vmem:[%s1800_s5 + $0x10] sm:$0xff]   ;;  %vm1538_vm2 = vmmov 0   ;;  %vm611_vm3 = vcmask 1043456   ;;  %s528_s11 = sld [smem:[#allocation3]] }
  0x1f   : > { %s1806_s28 = smov (!%p325_p0, %s1292_s28), 1  ;;  %1371 = vmatprep.mubr.msk.bf16.mxu0 %vm367_vm0, %v1469_v1  ;;  %v1472_v35 = vld [vmem:[%s1800_s5 + $0x18] sm:$0xff]   ;;  %s1319_s12 = sld [smem:[#allocation3 + $0x1]]  ;;  %vm594_vm4 = vcmask 64512  }
  0x20   : > { %s1614_s17 = sshll.u32 %s1806_s28, 5  ;;  %s1322_s13 = sld [smem:[#allocation3 + $0x2]] }
  0x21   : > { %s334_s20 = scalar_lea.vmem %s1796_s1, %s1614_s17  ;;  %s329_s23 = scalar_lea.vmem %s1795_s0, %s1614_s17 }
  0x22   : > { %v347_v2 = vld [vmem:[%s334_s20] sm:$0xff]  ;;  %v348_v3 = vld [vmem:[%s334_s20 + $0x8] sm:$0xff]  ;;  %v349_v4 = vld [vmem:[%s334_s20 + $0x10] sm:$0xff]  ;;  %s1325_s14 = sld [smem:[#allocation3 + $0x3]]  ;;  %s339_s18 = scalar_lea.vmem %s1803_s8, %s1614_s17 }
  0x23   : > { %v351_v5 = vpack.c.bf16 %v348_v3, %v347_v2  ;;  %v350_v6 = vld [vmem:[%s334_s20 + $0x18] sm:$0xff]  ;;  %v1625_v7 = vld [vmem:[%s329_s23] sm:$0xff]  ;;  %v1627_v8 = vld [vmem:[%s329_s23 + $0x8] sm:$0xff] }
  0x24   : > { %v352_v9 = vpack.c.bf16 %v350_v6, %v349_v4  ;;  %v345_v10 = vpack.c.bf16 %v1627_v8, %v1625_v7  ;;  %v1631_v11 = vld [vmem:[%s329_s23 + $0x10] sm:$0xff]  ;;  %v1633_v12 = vld [vmem:[%s329_s23 + $0x18] sm:$0xff] }
  0x25   : > { %1375 = vmatprep.subr.bf16.mxu1 %v351_v5  ;;  %v346_v13 = vpack.c.bf16 %v1633_v12, %v1631_v11 }
  0x26   : > { %1376 = vmatpush3.bf16.msra.mxu1 %v351_v5  ;;  %1367 = vmatprep.subr.bf16.mxu0 %v345_v10 }
  0x27   : > { %1377 = vmatprep.subr.bf16.mxu1 %v352_v9  ;;  %1368 = vmatpush3.bf16.msra.mxu0 %v345_v10 }
  0x28   : > { %1369 = vmatprep.subr.bf16.mxu0 %v346_v13 }
  0x2a   : > { %1378 = vmatpush3.bf16.msra.mxu1 %v352_v9 }
  0x2b   : > { %1370 = vmatpush3.bf16.msra.mxu0 %v346_v13  ;;  %1399 = vmatprep.subr.bf16.mxu1 %v1537_v29 }
  0x2c   : > { %1387 = vmatprep.subr.bf16.mxu0 %v1537_v29 }
  0x2d   : > { %1380 = vmatmul.mubr.msk.bf16.vlgmr.msra.gmra.mrb[0].mxu1 %vm367_vm0, %v1468_v14 }
  0x2e   : > { %1372 = vmatmul.mubr.msk.bf16.vlgmr.msra.gmra.mrb[0].mxu0 %vm367_vm0, %v1470_v15  ;;  %1383 = vmatprep.mubr.msk.bf16.mxu1 %vm367_vm0, %v1471_v34 }
  0x2f   : > { %1389 = vmatprep.mubr.msk.bf16.mxu0 %vm1538_vm2, %v1537_v29 }
  0x35   : > { %1384 = vmatmul.mubr.msk.bf16.gmra.mrb[4].mxu1 %vm367_vm0, %v1472_v35 }
  0x36   : > { %1401 = vmatprep.mubr.msk.bf16.mxu1 %vm1538_vm2, %v1537_v29 }
 0x100   : > { %v1645_v16 = vpop.f32.mrb[0].mxu1 }
 0x101   : > { %v497_v17 = vpop.f32.mrb[1].mxu1  ;;  %v786_v18 = vmul.f32 %v1645_v16, %v1645_v16  ;;  %v1657_v28 = vpop.f32.mrb[0].mxu0 }
 0x102   : > { %v1649_v19 = vpop.f32.mrb[2].mxu1  ;;  %v534_v20 = vmul.f32 %v497_v17, %v497_v17  ;;  %v408_v30 = vpop.f32.mrb[1].mxu0  ;;  %v782_v37 = vmul.f32 %v1657_v28, %v1657_v28  ;;  %v793_v4 = vpack.c.bf16 %v1657_v28, %v1657_v28 }
 0x103   : > { %v911_v21 = vmul.f32 %v1649_v19, %v1649_v19  ;;  %v500_v22 = vpop.f32.mrb[3].mxu1  ;;  %v787_v23 = vsel %vm530_vm1, %v786_v18, 0.0  ;;  %v1661_v31 = vpop.f32.mrb[2].mxu0  ;;  %v529_v33 = vmul.f32 %v408_v30, %v408_v30  ;;  %v541_v59 = vpack.c.bf16 %v408_v30, %v408_v30 }
 0x104   : > { %v661_v24 = vmul.f32 %v500_v22, %v500_v22  ;;  %788 = vadd.xlane.f32.xlu1 %v787_v23  ;;  %v535_v25 = vsel %vm530_vm1, %v534_v20, 0.0  ;;  %v411_v32 = vpop.f32.mrb[3].mxu0  ;;  %v907_v38 = vmul.f32 %v1661_v31, %v1661_v31  ;;  %v783_v41 = vsel %vm530_vm1, %v782_v37, 0.0 }
 0x105   : > { %536 = vadd.xlane.f32.xlu0 %v535_v25  ;;  %v912_v26 = vsel %vm530_vm1, %v911_v21, 0.0  ;;  %v657_v36 = vmul.f32 %v411_v32, %v411_v32  ;;  %v531_v39 = vsel %vm530_vm1, %v529_v33, 0.0  ;;  %v668_v0 = vpack.c.bf16 %v411_v32, %v411_v32 }
 0x106   : > { %v662_v27 = vsel %vm530_vm1, %v661_v24, 0.0  ;;  %v908_v42 = vsel %vm530_vm1, %v907_v38, 0.0  ;;  %v918_v6 = vpack.c.bf16 %v1661_v31, %v1661_v31  ;;  %v591_v31 = vstv %s528_s11 }
 0x107   : > { %v658_v40 = vsel %vm530_vm1, %v657_v36, 0.0  ;;  %v718_v36 = vstv %s1319_s12 }
 0x108   : > { %913 = vadd.xlane.f32.xlu1 %v912_v26  ;;  %v1385_v9 = vpop.f32.mrb[4].mxu1 }
 0x109   : > { %663 = vadd.xlane.f32.xlu0 %v662_v27  ;;  %v858_v10 = vpack.c.bf16 %v1385_v9, %v1385_v9  ;;  %v513_v13 = vpop.f32.mrb[5].mxu1 }
 0x10a   : > { %v1386_v15 = vpop.f32.mrb[6].mxu1 }
 0x10b   : > { %v1706_v14 = vsel %vm611_vm3, %v858_v10, 0  ;;  %v983_v18 = vpack.c.bf16 %v1386_v15, %v1386_v15 }
 0x10c   : > { %659 = vadd.xlane.f32.xlu1 %v658_v40 }
 0x10d   : > { %532 = vadd.xlane.f32.xlu0 %v531_v39  ;;  %v1708_v21 = vsel %vm611_vm3, %v983_v18, 0 }
 0x110   : > { %909 = vadd.xlane.f32.xlu1 %v908_v42 }
 0x111   : > { %784 = vadd.xlane.f32.xlu0 %v783_v41 }
 0x191   : > { %v789_v45 = vpop.xlane.xlu1 %788 }
 0x192   : > { %v537_v43 = vpop.xlane.xlu0 %536  ;;  %v790_v47 = vmax.f32 %v789_v45, 1e-24 }
 0x193   : > { %v538_v44 = vmax.f32 %v537_v43, 1e-24 }
 0x195   : > { %1475 = vrsqrt.f32 %v538_v44  ;;  %v914_v49 = vpop.xlane.xlu1 %913 }
 0x196   : > { %v664_v46 = vpop.xlane.xlu0 %663  ;;  %v915_v51 = vmax.f32 %v914_v49, 1e-24 }
 0x197   : > { %v665_v48 = vmax.f32 %v664_v46, 1e-24 }
 0x199   : > { %1477 = vrsqrt.f32 %v665_v48  ;;  %v660_v25 = vpop.xlane.xlu1 %659 }
 0x19a   : > { %1479 = vrsqrt.f32 %v790_v47  ;;  %v533_v23 = vpop.xlane.xlu0 %532  ;;  %v716_v26 = vmax.f32 %v660_v25, 1e-24 }
 0x19b   : > { %1481 = vrsqrt.f32 %v915_v51  ;;  %v589_v24 = vmax.f32 %v533_v23, 1e-24  ;;  %v843_v51 = vstv %s1322_s13 }
 0x19d   : > { %1483 = vrsqrt.f32 %v589_v24  ;;  %v910_v32 = vpop.xlane.xlu1 %909 }
 0x19e   : > { %1485 = vrsqrt.f32 %v716_v26  ;;  %v785_v27 = vpop.xlane.xlu0 %784  ;;  %v966_v39 = vmax.f32 %v910_v32, 1e-24 }
 0x19f   : > { %v1476_v50 = vpop.eup %1475  ;;  %v841_v28 = vmax.f32 %v785_v27, 1e-24 }
 0x1a0   : > { %v540_v52 = vmul.f32 %v1476_v50, %v497_v17  ;;  %v607_v17 = vpack.c.bf16 %v513_v13, %v513_v13 }
 0x1a1   : > { %1487 = vrsqrt.f32 %v841_v28 }
 0x1a2   : > { %v542_v53 = vpack.c.bf16 %v540_v52, %v540_v52  ;;  %v613_v20 = vsel %vm611_vm3, %v607_v17, 0  ;;  %1489 = vrsqrt.f32 %v966_v39 }
 0x1a3   : > { %v1478_v54 = vpop.eup %1477 }
 0x1a4   : > { %v547_v55 = vsel %vm530_vm1, %v542_v53, 0  ;;  %v667_v56 = vmul.f32 %v1478_v54, %v500_v22  ;;  %v1480_v57 = vpop.eup %1479 }
 0x1a5   : > { %1388 = vmatpush3.bf16.xpose.msra.mxu0 %v547_v55  ;;  %v792_v61 = vmul.f32 %v1480_v57, %v1645_v16  ;;  %v1482_v63 = vpop.eup %1481  ;;  %v516_v16 = vpop.f32.mrb[7].mxu1 }
 0x1a6   : > { %v669_v58 = vpack.c.bf16 %v667_v56, %v667_v56  ;;  %1393 = vmatprep.subr.bf16.mxu0 %v1537_v29  ;;  %v917_v2 = vmul.f32 %v1482_v63, %v1649_v19  ;;  %v733_v19 = vpack.c.bf16 %v516_v16, %v516_v16 }
 0x1a7   : > { %v794_v62 = vpack.c.bf16 %v792_v61, %v792_v61  ;;  %v1484_v30 = vpop.eup %1483 }
 0x1a8   : > { %v674_v60 = vsel %vm530_vm1, %v669_v58, 0  ;;  %v919_v3 = vpack.c.bf16 %v917_v2, %v917_v2  ;;  %v1710_v22 = vsel %vm611_vm3, %v733_v19, 0  ;;  %v592_v33 = vmul.f32 %v1484_v30, %v591_v31  ;;  %v1486_v34 = vpop.eup %1485 }
 0x1a9   : > { %1400 = vmatpush3.bf16.xpose.msra.mxu1 %v674_v60  ;;  %v799_v1 = vsel %vm530_vm1, %v794_v62, 0  ;;  %v719_v42 = vmul.f32 %v1486_v34, %v718_v36  ;;  %v968_v60 = vstv %s1325_s14 }
 0x1aa   : > { %1411 = vmatprep.subr.bf16.mxu1 %v1537_v29  ;;  %v924_v5 = vsel %vm530_vm1, %v919_v3, 0 }
 0x1ab   : > { %v1488_v50 = vpop.eup %1487 }
 0x1ac   : > { %1390 = vmatmul.mubr.msk.bf16.vlgmr.msra.gmra.mrb[4].mxu0 %vm530_vm1, %v541_v59  ;;  %v844_v52 = vmul.f32 %v1488_v50, %v843_v51  ;;  %v1490_v59 = vpop.eup %1489  ;;  %v1114_v50 = vld [vmem:[%s1798_s3] sm:$0xff]  ;;  %v1115_v51 = vld [vmem:[%s1798_s3 + $0x8] sm:$0xff] }
 0x1ad   : > { %1395 = vmatprep.mubr.msk.bf16.mxu0 %vm1538_vm2, %v1537_v29  ;;  %1394 = vmatpush3.bf16.msra.mxu0 %v613_v20  ;;  %v969_v61 = vmul.f32 %v1490_v59, %v968_v60 }
 0x1ae   : > { %1405 = vmatprep.subr.bf16.mxu0 %v1537_v29 }
 0x1b0   : > { %1402 = vmatmul.mubr.msk.bf16.vlgmr.msra.gmra.mrb[8].mxu1 %vm530_vm1, %v668_v0 }
 0x1b1   : > { %1412 = vmatpush3.bf16.xpose.msra.mxu1 %v799_v1  ;;  %1413 = vmatprep.mubr.msk.bf16.mxu1 %vm1538_vm2, %v1537_v29 }
 0x1b2   : > { %1423 = vmatprep.subr.bf16.mxu1 %v1537_v29 }
 0x1b8   : > { %1414 = vmatmul.mubr.msk.bf16.vlgmr.msra.gmra.mrb[12].mxu1 %vm530_vm1, %v793_v4 }
 0x1b9   : > { %1424 = vmatpush3.bf16.xpose.msra.mxu1 %v924_v5  ;;  %1425 = vmatprep.mubr.msk.bf16.mxu1 %vm1538_vm2, %v1537_v29 }
 0x1c0   : > { %1426 = vmatmul.mubr.msk.bf16.vlgmr.msra.gmra.mrb[16].mxu1 %vm530_vm1, %v918_v6 }
 0x27f   : > { %v583_v35 = vpop.f32.mrb[4].mxu0 }
 0x280   : > { %v593_v37 = vmul.f32 %v592_v33, %v583_v35  ;;  %v1391_v38 = vpop.f32.mrb[5].mxu0 }
 0x281   : > { %v586_v40 = vpop.f32.mrb[6].mxu0 }
 0x282   : > { %v1392_v41 = vpop.f32.mrb[7].mxu0  ;;  %v595_v43 = vsel %vm594_vm4, %v593_v37, -inf }
 0x283   : > { %v710_v44 = vpop.f32.mrb[8].mxu1  ;;  %596 = vmax.xlane.f32.xlu0 %v595_v43 }
 0x284   : > { %v720_v45 = vmul.f32 %v719_v42, %v710_v44  ;;  %v1403_v46 = vpop.f32.mrb[9].mxu1 }
 0x285   : > { %v713_v47 = vpop.f32.mrb[10].mxu1 }
 0x286   : > { %v1404_v48 = vpop.f32.mrb[11].mxu1  ;;  %v721_v49 = vsel %vm594_vm4, %v720_v45, -inf  ;;  %v1111_v47 = vld [vmem:[%s1797_s2 + $0x8] sm:$0xff] }
 0x287   : > { %722 = vmax.xlane.f32.xlu1 %v721_v49  ;;  %v1539_v48 = vmov 0   ;;  %v1113_v49 = vld [vmem:[%s1797_s2 + $0x18] sm:$0xff] }
 0x288   : > { %1466 = vset.pattern.permute.xlu1 %v1539_v48  ;;  %1465 = vset.pattern.permute.xlu0 %v1539_v48 }
 0x28b   : > { %v835_v53 = vpop.f32.mrb[12].mxu1 }
 0x28c   : > { %v845_v54 = vmul.f32 %v844_v52, %v835_v53  ;;  %v1415_v55 = vpop.f32.mrb[13].mxu1  ;;  %v1116_v52 = vld [vmem:[%s1798_s3 + $0x10] sm:$0xff]  ;;  %v1117_v53 = vld [vmem:[%s1798_s3 + $0x18] sm:$0xff] }
 0x28d   : > { %v838_v56 = vpop.f32.mrb[14].mxu1 }
 0x28e   : > { %v1416_v57 = vpop.f32.mrb[15].mxu1  ;;  %v846_v58 = vsel %vm594_vm4, %v845_v54, -inf }
 0x28f   : > { %847 = vmax.xlane.f32.xlu0 %v846_v58 }
 0x293   : > { %v960_v62 = vpop.f32.mrb[16].mxu1 }
 0x294   : > { %v970_v63 = vmul.f32 %v969_v61, %v960_v62  ;;  %v1427_v0 = vpop.f32.mrb[17].mxu1 }
 0x295   : > { %v963_v1 = vpop.f32.mrb[18].mxu1 }
 0x296   : > { %v1428_v2 = vpop.f32.mrb[19].mxu1  ;;  %v971_v3 = vsel %vm594_vm4, %v970_v63, -inf }
 0x297   : > { %972 = vmax.xlane.f32.xlu1 %v971_v3 }
 0x310   : > { %v597_v4 = vpop.xlane.xlu0 %596 }
 0x311   : > { %v598_v5 = vsub.f32 %v593_v37, %v597_v4 }
 0x313   : > { %v599_v6 = vmul.f32 1.442695, %v598_v5 }
 0x314   : > { %v723_v9 = vpop.xlane.xlu1 %722 }
 0x315   : > { %1491 = vpow2.f32 %v599_v6  ;;  %v724_v10 = vsub.f32 %v720_v45, %v723_v9 }
 0x317   : > { %v725_v13 = vmul.f32 1.442695, %v724_v10 }
 0x319   : > { %1493 = vpow2.f32 %v725_v13 }
 0x31c   : > { %v848_v15 = vpop.xlane.xlu0 %847 }
 0x31d   : > { %v849_v16 = vsub.f32 %v845_v54, %v848_v15 }
 0x31f   : > { %v1492_v17 = vpop.eup %1491  ;;  %v850_v18 = vmul.f32 1.442695, %v849_v16 }
 0x320   : > { %v601_v19 = vsel %vm594_vm4, %v1492_v17, 0.0 }
 0x321   : > { %1495 = vpow2.f32 %v850_v18  ;;  %602 = vadd.xlane.f32.xlu0 %v601_v19 }
 0x323   : > { %v1494_v20 = vpop.eup %1493 }
 0x324   : > { %v973_v23 = vpop.xlane.xlu1 %972  ;;  %v727_v24 = vsel %vm594_vm4, %v1494_v20, 0.0 }
 0x325   : > { %v974_v25 = vsub.f32 %v970_v63, %v973_v23  ;;  %728 = vadd.xlane.f32.xlu1 %v727_v24 }
 0x327   : > { %v975_v26 = vmul.f32 1.442695, %v974_v25 }
 0x329   : > { %1497 = vpow2.f32 %v975_v26 }
 0x32b   : > { %v1496_v27 = vpop.eup %1495 }
 0x32c   : > { %v852_v28 = vsel %vm594_vm4, %v1496_v27, 0.0 }
 0x32d   : > { %853 = vadd.xlane.f32.xlu0 %v852_v28 }
 0x333   : > { %v1498_v30 = vpop.eup %1497 }
 0x334   : > { %v977_v31 = vsel %vm594_vm4, %v1498_v30, 0.0 }
 0x335   : > { %978 = vadd.xlane.f32.xlu1 %v977_v31 }
 0x346   : > { %1168 = vperm.xlu1 %1466, %v1111_v47  }
 0x3ae   : > { %v603_v32 = vpop.xlane.xlu0 %602 }
 0x3af   : > { %1499 = vrcp.f32 %v603_v32 }
 0x3b2   : > { %v729_v33 = vpop.xlane.xlu1 %728 }
 0x3b3   : > { %1501 = vrcp.f32 %v729_v33 }
 0x3b9   : > { %v1500_v34 = vpop.eup %1499 }
 0x3ba   : > { %v605_v35 = vmul.f32 %v1500_v34, %v1492_v17  ;;  %v854_v36 = vpop.xlane.xlu0 %853  ;;  %v1474_v17 = vld [vmem:[%s1801_s6 + $0x8] sm:$0xff]  }
 0x3bb   : > { %1503 = vrcp.f32 %v854_v36 }
 0x3bc   : > { %v606_v37 = vpack.c.bf16 %v605_v35, %v605_v35 }
 0x3bd   : > { %v1502_v38 = vpop.eup %1501 }
 0x3be   : > { %1396 = vmatmul.mubr.msk.bf16.vlgmr.msra.gmra.mrb[8].mxu0 %vm594_vm4, %v606_v37  ;;  %v731_v39 = vmul.f32 %v1502_v38, %v1494_v20 }
 0x3bf   : > { %1406 = vmatpush3.bf16.msra.mxu0 %v1710_v22  ;;  %1407 = vmatprep.mubr.msk.bf16.mxu0 %vm1538_vm2, %v1537_v29 }
 0x3c0   : > { %1417 = vmatprep.subr.bf16.mxu0 %v1537_v29  ;;  %v732_v41 = vpack.c.bf16 %v731_v39, %v731_v39 }
 0x3c2   : > { %v979_v40 = vpop.xlane.xlu1 %978 }
 0x3c3   : > { %1505 = vrcp.f32 %v979_v40 }
 0x3c5   : > { %v1504_v42 = vpop.eup %1503 }
 0x3c6   : > { %1408 = vmatmul.mubr.msk.bf16.vlgmr.msra.gmra.mrb[12].mxu0 %vm594_vm4, %v732_v41  ;;  %v856_v43 = vmul.f32 %v1504_v42, %v1496_v27  ;;  %v1169_v48 = vpop.permute.xlu1 %1168 }
 0x3c7   : > { %1418 = vmatpush3.bf16.msra.mxu0 %v1706_v14  ;;  %1419 = vmatprep.mubr.msk.bf16.mxu0 %vm1538_vm2, %v1537_v29  ;;  %v1473_v14 = vld [vmem:[%s1801_s6] sm:$0xff]  }
 0x3c8   : > { %1429 = vmatprep.subr.bf16.mxu0 %v1537_v29  ;;  %v857_v22 = vpack.c.bf16 %v856_v43, %v856_v43  ;;  %1439 = vmatprep.mubr.msk.bf16.mxu1 %vm367_vm0, %v1473_v14 }
 0x3cd   : > { %v1506_v44 = vpop.eup %1505 }
 0x3ce   : > { %1420 = vmatmul.mubr.msk.bf16.vlgmr.msra.gmra.mrb[16].mxu0 %vm594_vm4, %v857_v22  ;;  %v981_v45 = vmul.f32 %v1506_v44, %v1498_v30 }
 0x3cf   : > { %1430 = vmatpush3.bf16.msra.mxu0 %v1708_v21  ;;  %1431 = vmatprep.mubr.msk.bf16.mxu0 %vm1538_vm2, %v1537_v29  ;;  %v1110_v29 = vld [vmem:[%s1797_s2] sm:$0xff]  ;;  %v1112_v21 = vld [vmem:[%s1797_s2 + $0x10] sm:$0xff] }
 0x3d0   : > { %v982_v46 = vpack.c.bf16 %v981_v45, %v981_v45  ;;  %1163 = vperm.xlu0 %1465, %v1110_v29   ;;  %1173 = vperm.xlu1 %1466, %v1112_v21  }
 0x3d4   : > { %1178 = vperm.xlu1 %1466, %v1113_v49  }
 0x3d6   : > { %1432 = vmatmul.mubr.msk.bf16.vlgmr.msra.gmra.mrb[20].mxu0 %vm594_vm4, %v982_v46 }
 0x3d8   : > { %1187 = vperm.xlu1 %1466, %v1114_v50  }
 0x3dc   : > { %1192 = vperm.xlu1 %1466, %v1115_v51  }
 0x3e0   : > { %1197 = vperm.xlu1 %1466, %v1116_v52  }
 0x3e4   : > { %1202 = vperm.xlu1 %1466, %v1117_v53  }
 0x44f   : > { %v1174_v52 = vpop.permute.xlu1 %1173 }
 0x491   : > { %v649_v54 = vpop.f32.mrb[8].mxu0 }
 0x492   : > { %655 = vst.msk [vmem:[#allocation2] sm:$0xff] %vm530_vm1, %v649_v54  ;;  %v1397_v55 = vpop.f32.mrb[9].mxu0 }
 0x493   : > { %v652_v56 = vpop.f32.mrb[10].mxu0 }
 0x494   : > { %v1398_v57 = vpop.f32.mrb[11].mxu0  ;;  %v1179_v56 = vpop.permute.xlu1 %1178 }
 0x499   : > { %v774_v58 = vpop.f32.mrb[12].mxu0  ;;  %v1035_v63 = vld [vmem:[#allocation2] sm:$0xff] }
 0x49a   : > { %780 = vst.msk [vmem:[#allocation2 + $0x8] sm:$0xff] %vm530_vm1, %v774_v58  ;;  %v1409_v59 = vpop.f32.mrb[13].mxu0 }
 0x49b   : > { %v777_v60 = vpop.f32.mrb[14].mxu0 }
 0x49c   : > { %v1410_v61 = vpop.f32.mrb[15].mxu0  ;;  %v1188_v60 = vpop.permute.xlu1 %1187 }
 0x4a1   : > { %v899_v62 = vpop.f32.mrb[16].mxu0  ;;  %v1036_v0 = vld [vmem:[#allocation2 + $0x8] sm:$0xff] }
 0x4a2   : > { %905 = vst.msk [vmem:[#allocation2 + $0x10] sm:$0xff] %vm530_vm1, %v899_v62  ;;  %v1421_v1 = vpop.f32.mrb[17].mxu0  ;;  %v1039_v2 = vpack.c.bf16 %v1036_v0, %v1035_v63  ;;  %v1193_v62 = vpop.permute.xlu1 %1192 }
 0x4a3   : > { %v902_v3 = vpop.f32.mrb[18].mxu0  ;;  %v1164_v1 = vpop.permute.xlu0 %1163 }
 0x4a4   : > { %v1422_v4 = vpop.f32.mrb[19].mxu0  ;;  %1435 = vmatprep.subr.bf16.mxu1 %v1039_v2 }
 0x4a5   : > { %1436 = vmatpush3.bf16.msra.mxu1 %v1039_v2 }
 0x4a6   : > { %v1198_v63 = vpop.permute.xlu1 %1197 }
 0x4a9   : > { %v1024_v5 = vpop.f32.mrb[20].mxu0  ;;  %v1037_v13 = vld [vmem:[#allocation2 + $0x10] sm:$0xff] }
 0x4aa   : > { %1030 = vst.msk [vmem:[#allocation2 + $0x18] sm:$0xff] %vm530_vm1, %v1024_v5  ;;  %v1433_v6 = vpop.f32.mrb[21].mxu0 }
 0x4ab   : > { %v1027_v9 = vpop.f32.mrb[22].mxu0 }
 0x4ac   : > { %v1434_v10 = vpop.f32.mrb[23].mxu0 }
 0x4b1   : > { %v1038_v15 = vld [vmem:[#allocation2 + $0x18] sm:$0xff] }
 0x4b2   : > { %v1040_v16 = vpack.c.bf16 %v1038_v15, %v1037_v13  ;;  %v1203_v15 = vpop.permute.xlu1 %1202 }
 0x4b4   : > { %1437 = vmatprep.subr.bf16.mxu1 %v1040_v16 }
 0x4b5   : > { %1438 = vmatpush3.bf16.msra.mxu1 %v1040_v16 }
 0x4b8   : > { %1440 = vmatmul.mubr.msk.bf16.vlgmr.msra.gmra.mrb[20].mxu1 %vm367_vm0, %v1474_v17 }
 0x58b   : > { %v1441_v18 = vpop.f32.mrb[20].mxu1 }
 0x58c   : > { %v1091_v19 = vpop.f32.mrb[21].mxu1  ;;  %v1108_v25 = vadd.f32 %v1441_v18, %v1631_v11 }
 0x58d   : > { %v1106_v20 = vadd.f32 %v1091_v19, %v1625_v7  ;;  %v1442_v23 = vpop.f32.mrb[22].mxu1 }
 0x58e   : > { %v1094_v24 = vpop.f32.mrb[23].mxu1  ;;  %v1109_v28 = vadd.f32 %v1442_v23, %v1633_v12  ;;  %v1121_v32 = vsel %vm530_vm1, %v1108_v25, 0.0 }
 0x58f   : > { %v1107_v26 = vadd.f32 %v1094_v24, %v1627_v8  ;;  %v1118_v27 = vsel %vm530_vm1, %v1106_v20, 0.0 }
 0x590   : > { %v1123_v34 = vsel %vm530_vm1, %v1109_v28, 0.0 }
 0x591   : > { %v1119_v30 = vsel %vm530_vm1, %v1107_v26, 0.0 }
 0x592   : > { %v1120_v31 = vadd.f32 %v1119_v30, %v1118_v27 }
 0x594   : > { %v1122_v33 = vadd.f32 %v1121_v32, %v1120_v31 }
 0x596   : > { %v1124_v35 = vadd.f32 %v1123_v34, %v1122_v33 }
 0x598   : > { %v1125_v7 = vrot.slane %v1124_v35, 4 }
 0x59a   : > { %v1126_v36 = vadd.f32 %v1125_v7, %v1124_v35 }
 0x59c   : > { %v1127_v37 = vrot.slane %v1126_v36, 2 }
 0x59e   : > { %v1128_v38 = vadd.f32 %v1127_v37, %v1126_v36 }
 0x5a0   : > { %v1129_v11 = vrot.slane %v1128_v38, 1 }
 0x5a2   : > { %v1130_v39 = vadd.f32 %v1129_v11, %v1128_v38 }
 0x5a4   : > { %v1132_v8 = vmul.f32 0.03125, %v1130_v39 }
 0x5a6   : > { %v1133_v40 = vsub.f32 %v1106_v20, %v1132_v8  ;;  %v1134_v41 = vsub.f32 %v1107_v26, %v1132_v8  ;;  %v1135_v42 = vsub.f32 %v1108_v25, %v1132_v8  ;;  %v1136_v12 = vsub.f32 %v1109_v28, %v1132_v8 }
 0x5a8   : > { %v1137_v43 = vmul.f32 %v1133_v40, %v1133_v40  ;;  %v1138_v22 = vmul.f32 %v1134_v41, %v1134_v41  ;;  %v1139_v44 = vmul.f32 %v1135_v42, %v1135_v42  ;;  %v1140_v45 = vmul.f32 %v1136_v12, %v1136_v12 }
 0x5aa   : > { %v1141_v46 = vsel %vm530_vm1, %v1137_v43, 0.0  ;;  %v1142_v14 = vsel %vm530_vm1, %v1138_v22, 0.0  ;;  %v1144_v29 = vsel %vm530_vm1, %v1139_v44, 0.0  ;;  %v1146_v49 = vsel %vm530_vm1, %v1140_v45, 0.0 }
 0x5ab   : > { %v1143_v47 = vadd.f32 %v1142_v14, %v1141_v46 }
 0x5ad   : > { %v1145_v21 = vadd.f32 %v1144_v29, %v1143_v47 }
 0x5af   : > { %v1147_v50 = vadd.f32 %v1146_v49, %v1145_v21 }
 0x5b1   : > { %v1148_v51 = vrot.slane %v1147_v50, 4 }
 0x5b3   : > { %v1149_v53 = vadd.f32 %v1148_v51, %v1147_v50 }
 0x5b5   : > { %v1150_v54 = vrot.slane %v1149_v53, 2 }
 0x5b7   : > { %v1151_v55 = vadd.f32 %v1150_v54, %v1149_v53 }
 0x5b9   : > { %v1152_v57 = vrot.slane %v1151_v55, 1 }
 0x5bb   : > { %v1153_v58 = vadd.f32 %v1152_v57, %v1151_v55 }
 0x5bd   : > { %v1154_v59 = vmul.f32 0.03125, %v1153_v58 }
 0x5bf   : > { %v1155_v61 = vadd.f32 1e-05, %v1154_v59 }
 0x5c1   : > { %1507 = vrsqrt.f32 %v1155_v61 }
 0x5cb   : > { %v1508_v0 = vpop.eup %1507 }
 0x5cc   : > { %v1158_v2 = vmul.f32 %v1508_v0, %v1134_v41  ;;  %v1159_v3 = vmul.f32 %v1508_v0, %v1135_v42  ;;  %v1160_v4 = vmul.f32 %v1508_v0, %v1136_v12  ;;  %v1157_v5 = vmul.f32 %v1508_v0, %v1133_v40 }
 0x5ce   : > { %v1182_v6 = vmul.f32 %v1169_v48, %v1158_v2  ;;  %v1183_v9 = vmul.f32 %v1174_v52, %v1159_v3  ;;  %v1184_v10 = vmul.f32 %v1179_v56, %v1160_v4  ;;  %v1181_v13 = vmul.f32 %v1164_v1, %v1157_v5 }
 0x5d0   : > { %v1206_v16 = vadd.f32 %v1193_v62, %v1182_v6  ;;  %v1207_v17 = vadd.f32 %v1198_v63, %v1183_v9  ;;  %v1208_v18 = vadd.f32 %v1203_v15, %v1184_v10  ;;  %v1205_v19 = vadd.f32 %v1188_v60, %v1181_v13 }
 0x5d2   : > { %1210 = vst.msk [vmem:[%s339_s18 + $0x8] sm:$0xff] %vm530_vm1, %v1206_v16  ;;  %1211 = vst.msk [vmem:[%s339_s18 + $0x10] sm:$0xff] %vm530_vm1, %v1207_v17 }
 0x5d3   : > { %1212 = vst.msk [vmem:[%s339_s18 + $0x18] sm:$0xff] %vm530_vm1, %v1208_v18  ;;  %1209 = vst.msk [vmem:[%s339_s18] sm:$0xff] %vm530_vm1, %v1205_v19 }
 0x5d4 PF: > { %s19_s27 = sadd.s32 1, %s1534_s27  }
 0x5d5   : > { %p16_p1 = scmp.ge.s32.totalorder %s19_s27, 4  }
 0x5d7   :  { %18 = sbr.rel (!%p16_p1) target bundleno = 1 (0x1), region = 90 }
 0x5de   :  { %1234 = vsyncpa [#allocation4], 1 }
 0x5df   :  { %1236 = vsyncpa [#allocation4 + $0x1], 1 }

// kernel: dual_channel_block.7
= control target key start
LH: loop header
LB: loop body
LE: loop exit
PB: predicated region body
PF: predicated region fallthrough
CT: control target
= control target key end

     0   :  { %s2456_s13 = smov 0   ;;  %s2458_s14 = smov 0   ;;  %s3615_s0 = inlined_call_operand.vmem [shape: f32[2,2,32,64], index: 0, kind: input, shape index: {}]   ;;  %s3616_s1 = inlined_call_operand.vmem [shape: f32[2,64], index: 1, kind: input, shape index: {}]   ;;  %s3617_s2 = inlined_call_operand.vmem [shape: f32[2,32,1], index: 2, kind: input, shape index: {}]   ;;  %s3618_s3 = inlined_call_operand.vmem [shape: f32[2,32,1], index: 3, kind: input, shape index: {}]   ;;  %s3619_s4 = inlined_call_operand.vmem [shape: bf16[2,64,32], index: 4, kind: input, shape index: {}]   ;;  %s3620_s5 = inlined_call_operand.vmem [shape: f32[2,64,1], index: 5, kind: input, shape index: {}]   ;;  %s3621_s6 = inlined_call_operand.vmem [shape: f32[2,64,9], index: 6, kind: input, shape index: {}]   ;;  %s3622_s7 = inlined_call_operand.vmem [shape: f32[2,64,1], index: 7, kind: input, shape index: {}]   ;;  %s3623_s8 = inlined_call_operand.vmem [shape: bf16[2,32,64], index: 8, kind: input, shape index: {}]   ;;  %s3624_s9 = inlined_call_operand.vmem [shape: f32[2,32,1], index: 9, kind: input, shape index: {}]   ;;  %s3625_s10 = inlined_call_operand.vmem [shape: f32[2,2,32,64], index: 10, kind: output, shape index: {}]  }
   0x1   :  { %s2460_s15 = smov 0   ;;  %s2462_s16 = smov 0  }
   0x2   :  { %s2464_s17 = smov 0  }
   0x3 LB: > { %s29_s18 = sadd.s32 1, %s2373_s15  ;;  %s32_s19 = sadd.s32 1, %s2377_s16  ;;  %s2381_s17 = sphi %s2464_s17, %s20_s17   ;;  %s2377_s16 = sphi %s2462_s16, %s3799_s16   ;;  %s2373_s15 = sphi %s2460_s15, %s3798_s15   ;;  %s2369_s14 = sphi %s2458_s14, %s3797_s14   ;;  %s2365_s13 = sphi %s2456_s13, %s3796_s13  }
   0x4   : > { %p30_p0 = scmp.ge.s32.totalorder %s29_s18, 2  ;;  %p2122_p1 = scmp.ge.s32.totalorder %s2381_s17, 1 }
   0x5   : > { %p412_p2 = scmp.lt.s32.totalorder %s2381_s17, 5 }
   0x6   : > { %s3801_s18 = smov (%p30_p0, %s29_s18), 0  ;;  %s3803_s19 = smov (!%p30_p0, %s32_s19), %s2377_s16 }
   0x7   : > { %p413_p3 = pnand %p2122_p1, %p412_p2  ;;  %p34_p4 = scmp.ge.s32.totalorder %s3803_s19, 2 }
   0x9   : > { %s3805_s19 = smov (%p34_p4, %s3803_s19), 0  ;;  %416 = sbr.rel (%p413_p3) target bundleno = 1152 (0x480), region = 60 }
  0x10   : > { %p498_p5 = scmp.lt.s32.totalorder %s2369_s14, 1  ;;  %p500_p6 = scmp.lt.s32.totalorder %s2365_s13, 1  ;;  %v3626_v0 = vmov 0   ;;  %vm3636_vm0 = vcmask 523264   ;;  %vm739_vm1 = vcmask 261120   ;;  %v2384_v33 = vmov 1  }
  0x11   : > { %2262 = vset.pattern.permute.xlu1 %v3626_v0  ;;  %2261 = vset.pattern.permute.xlu0 %v3626_v0  ;;  %v2385_v41 = vmov 2   ;;  %v2386_v48 = vmov 3   ;;  %v2387_v59 = vmov 4   ;;  %vm866_vm2 = vcmask 1048064   ;;  %s2398_s30 = smov 65  }
  0x12   : > { %s3807_s14 = smov (!%p498_p5, %s2369_s14), 1  ;;  %s3809_s13 = smov (!%p500_p6, %s2365_s13), 1 }
  0x13   : > { %s2491_s20 = sshll.u32 %s3807_s14, 5  ;;  %s2123_s27 = sshll.u32 %s3809_s13, 2 }
  0x14   : > { %s516_s23 = scalar_lea.vmem %s3618_s3, %s2491_s20  ;;  %s511_s26 = scalar_lea.vmem %s3617_s2, %s2491_s20 }
  0x15   : > { %v565_v1 = vld [vmem:[%s516_s23] sm:$0xff]  ;;  %v566_v3 = vld [vmem:[%s516_s23 + $0x8] sm:$0xff]  ;;  %s2124_s28 = sshll.u32 %s3807_s14, 3  ;;  %v564_v5 = vld [vmem:[%s511_s26 + $0x18] sm:$0xff]  ;;  %s2508_s12 = scalar_lea.vmem %s3619_s4, %s2491_s20 }
  0x16   : > { %639 = vperm.xlu1 %2262, %v565_v1   ;;  %v561_v2 = vld [vmem:[%s511_s26] sm:$0xff]  ;;  %v562_v4 = vld [vmem:[%s511_s26 + $0x8] sm:$0xff]  ;;  %s2502_s29 = sadd.s32 %s2124_s28, %s2123_s27  ;;  %v563_v6 = vld [vmem:[%s511_s26 + $0x10] sm:$0xff]  ;;  %s2511_s21 = sshll.u32 %s3807_s14, 6  ;;  %v2388_v1 = vmov 5  }
  0x17   : > { %615 = vperm.xlu0 %2261, %v561_v2   ;;  %s2125_s22 = sshll.u32 %s2502_s29, 3  ;;  %v568_v7 = vld [vmem:[%s516_s23 + $0x18] sm:$0xff]  ;;  %v567_v8 = vld [vmem:[%s516_s23 + $0x10] sm:$0xff]  ;;  %s2518_s25 = scalar_lea.vmem %s3620_s5, %s2511_s21  ;;  %v2303_v18 = vld [vmem:[%s2508_s12] sm:$0xff]  }
  0x18   : > { %s506_s26 = scalar_lea.vmem %s3615_s0, %s2125_s22  ;;  %v672_v9 = vld [vmem:[%s2518_s25 + $0x8] sm:$0xff]  ;;  %v671_v12 = vld [vmem:[%s2518_s25] sm:$0xff]  ;;  %v674_v15 = vld [vmem:[%s2518_s25 + $0x18] sm:$0xff]  ;;  %2183 = vmatprep.mubr.msk.bf16.mxu0 %vm739_vm1, %v2303_v18  ;;  %s2548_s11 = scalar_lea.vmem %s3621_s6, %s2511_s21 }
  0x19   : > { %v2526_v10 = vld [vmem:[%s506_s26] sm:$0xff]  ;;  %v2528_v11 = vld [vmem:[%s506_s26 + $0x8] sm:$0xff]  ;;  %v559_v16 = vld [vmem:[%s506_s26 + $0x10] sm:$0xff]  ;;  %s2717_s24 = scalar_lea.vmem %s3622_s7, %s2511_s21  ;;  %s2392_s21 = smov 64  }
  0x1a   : > { %644 = vperm.xlu1 %2262, %v566_v3   ;;  %v570_v13 = vsel %vm3636_vm0, %v2526_v10, 0.0  ;;  %v571_v14 = vsel %vm3636_vm0, %v2528_v11, 0.0  ;;  %v673_v17 = vld [vmem:[%s2518_s25 + $0x10] sm:$0xff]  ;;  %v573_v20 = vsel %vm3636_vm0, %v559_v16, 0.0  ;;  %v676_v21 = vld [vmem:[%s2518_s25 + $0x28] sm:$0xff]  ;;  %v560_v22 = vld [vmem:[%s506_s26 + $0x18] sm:$0xff] }
  0x1b   : > { %620 = vperm.xlu0 %2261, %v562_v4   ;;  %v572_v19 = vadd.f32 %v571_v14, %v570_v13  ;;  %v675_v23 = vld [vmem:[%s2518_s25 + $0x20] sm:$0xff]  ;;  %v575_v25 = vsel %vm3636_vm0, %v560_v22, 0.0  ;;  %v678_v26 = vld [vmem:[%s2518_s25 + $0x38] sm:$0xff]  ;;  %v677_v27 = vld [vmem:[%s2518_s25 + $0x30] sm:$0xff]  ;;  %s2393_s25 = smov 71   ;;  %s2394_s27 = smov 73  }
  0x1c   : > { %v2552_v29 = vld [vmem:[%s2548_s11 + $0x8] sm:$0xff]  ;;  %v2556_v31 = vld [vmem:[%s2548_s11 + $0x18] sm:$0xff]  ;;  %v2559_v32 = vld [vmem:[%s2548_s11] sm:$0xff]  ;;  %s2395_s28 = smov 127   ;;  %s2396_s26 = smov 72  }
  0x1d   : > { %v574_v24 = vadd.f32 %v573_v20, %v572_v19  ;;  %v2564_v35 = vld [vmem:[%s2548_s11 + $0x28] sm:$0xff]  ;;  %v2569_v37 = vld [vmem:[%s2548_s11 + $0x38] sm:$0xff]  ;;  %v2576_v40 = vld [vmem:[%s2548_s11 + $0x10] sm:$0xff]  ;;  %s2397_s23 = smov 121  }
  0x1e   : > { %630 = vperm.xlu1 %2262, %v564_v5   ;;  %v2582_v43 = vld [vmem:[%s2548_s11 + $0x20] sm:$0xff]  ;;  %v2587_v45 = vld [vmem:[%s2548_s11 + $0x30] sm:$0xff]  ;;  %s2399_s11 = smov 120  }
  0x1f   : > { %625 = vperm.xlu0 %2261, %v563_v6   ;;  %v576_v28 = vadd.f32 %v575_v25, %v574_v24 }
  0x21   : > { %v577_v30 = vrot.slane %v576_v28, 4 }
  0x22   : > { %654 = vperm.xlu1 %2262, %v568_v7   ;;  %v2389_v7 = vmov 6  }
  0x23   : > { %649 = vperm.xlu0 %2261, %v567_v8   ;;  %v578_v34 = vadd.f32 %v577_v30, %v576_v28 }
  0x25   : > { %v579_v36 = vrot.slane %v578_v34, 2 }
  0x26   : > { %686 = vperm.xlu1 %2262, %v672_v9  }
  0x27   : > { %681 = vperm.xlu0 %2261, %v671_v12   ;;  %v580_v38 = vadd.f32 %v579_v36, %v578_v34 }
  0x29   : > { %v581_v39 = vrot.slane %v580_v38, 1 }
  0x2a   : > { %696 = vperm.xlu1 %2262, %v674_v15  }
  0x2b   : > { %691 = vperm.xlu0 %2261, %v673_v17   ;;  %v582_v42 = vadd.f32 %v581_v39, %v580_v38 }
  0x2d   : > { %v584_v44 = vmul.f32 0.03125, %v582_v42  ;;  %v2305_v42 = vld [vmem:[%s2508_s12 + $0x10] sm:$0xff]  }
  0x2e   : > { %706 = vperm.xlu1 %2262, %v676_v21  }
  0x2f   : > { %701 = vperm.xlu0 %2261, %v675_v23   ;;  %v2590_v46 = vsub.f32 %v2526_v10, %v584_v44  ;;  %v2593_v47 = vsub.f32 %v2528_v11, %v584_v44  ;;  %v2598_v49 = vsub.f32 %v559_v16, %v584_v44  ;;  %v2607_v52 = vsub.f32 %v560_v22, %v584_v44  ;;  %v2306_v44 = vld [vmem:[%s2508_s12 + $0x18] sm:$0xff]  }
  0x30   : > { %v2390_v10 = vmov 7  }
  0x31   : > { %v589_v50 = vmul.f32 %v2590_v46, %v2590_v46  ;;  %v590_v51 = vmul.f32 %v2593_v47, %v2593_v47  ;;  %v591_v53 = vmul.f32 %v2598_v49, %v2598_v49  ;;  %v592_v57 = vmul.f32 %v2607_v52, %v2607_v52 }
  0x32   : > { %716 = vperm.xlu1 %2262, %v678_v26   ;;  %v2391_v26 = vmov 8  }
  0x33   : > { %711 = vperm.xlu0 %2261, %v677_v27   ;;  %v593_v54 = vsel %vm3636_vm0, %v589_v50, 0.0  ;;  %v594_v55 = vsel %vm3636_vm0, %v590_v51, 0.0  ;;  %v596_v58 = vsel %vm3636_vm0, %v591_v53, 0.0  ;;  %v598_v61 = vsel %vm3636_vm0, %v592_v57, 0.0  ;;  %v1729_v50 = vld [vmem:[%s2717_s24 + $0x18] sm:$0xff]  ;;  %v1730_v53 = vld [vmem:[%s2717_s24 + $0x20] sm:$0xff] }
  0x34   : > { %v595_v56 = vadd.f32 %v594_v55, %v593_v54  ;;  %v1731_v54 = vld [vmem:[%s2717_s24 + $0x28] sm:$0xff] }
  0x36   : > { %979 = vperm.xlu1 %2262, %v2552_v29   ;;  %v597_v60 = vadd.f32 %v596_v58, %v595_v56 }
  0x37   : > { %2263 = vset.pattern.permute.xlu0 %v2384_v33 }
  0x38   : > { %1077 = vperm.xlu0 %2263, %v2559_v32   ;;  %v599_v62 = vadd.f32 %v598_v61, %v597_v60 }
  0x3a   : > { %989 = vperm.xlu1 %2262, %v2556_v31   ;;  %v600_v63 = vrot.slane %v599_v62, 4 }
  0x3c   : > { %1089 = vperm.xlu0 %2263, %v2556_v31   ;;  %v601_v2 = vadd.f32 %v600_v63, %v599_v62 }
  0x3e   : > { %999 = vperm.xlu1 %2262, %v2564_v35   ;;  %v602_v3 = vrot.slane %v601_v2, 2 }
  0x40   : > { %1097 = vperm.xlu0 %2263, %v2564_v35   ;;  %v603_v4 = vadd.f32 %v602_v3, %v601_v2 }
  0x42   : > { %1009 = vperm.xlu1 %2262, %v2569_v37   ;;  %v604_v5 = vrot.slane %v603_v4, 1 }
  0x44   : > { %1105 = vperm.xlu0 %2263, %v2569_v37   ;;  %v605_v6 = vadd.f32 %v604_v5, %v603_v4 }
  0x46   : > { %2264 = vset.pattern.permute.xlu1 %v2384_v33  ;;  %v606_v8 = vmul.f32 0.03125, %v605_v6 }
  0x47   : > { %1081 = vperm.xlu1 %2264, %v2552_v29  }
  0x48   : > { %2266 = vset.pattern.permute.xlu0 %v2385_v41  ;;  %v607_v9 = vadd.f32 1e-05, %v606_v8 }
  0x49   : > { %1177 = vperm.xlu0 %2266, %v2552_v29  }
  0x4a   : > { %2309 = vrsqrt.f32 %v607_v9 }
  0x4b   : > { %1085 = vperm.xlu1 %2264, %v2576_v40  }
  0x4d   : > { %1189 = vperm.xlu0 %2266, %v2582_v43  }
  0x4f   : > { %1093 = vperm.xlu1 %2264, %v2582_v43  }
  0x51   : > { %2268 = vset.pattern.permute.xlu0 %v2386_v48 }
  0x52   : > { %1266 = vperm.xlu0 %2268, %v2552_v29  }
  0x53   : > { %1101 = vperm.xlu1 %2264, %v2587_v45  }
  0x54   : > { %v2310_v11 = vpop.eup %2309 }
  0x55   : > { %v609_v13 = vmul.f32 %v2310_v11, %v2590_v46  ;;  %v610_v15 = vmul.f32 %v2310_v11, %v2593_v47  ;;  %v612_v20 = vmul.f32 %v2310_v11, %v2607_v52  ;;  %v611_v22 = vmul.f32 %v2310_v11, %v2598_v49 }
  0x56   : > { %1270 = vperm.xlu0 %2268, %v2576_v40  }
  0x57   : > { %2265 = vset.pattern.permute.xlu1 %v2385_v41 }
  0x58   : > { %1173 = vperm.xlu1 %2265, %v2559_v32  }
  0x5a   : > { %1286 = vperm.xlu0 %2268, %v2587_v45  }
  0x5c   : > { %1181 = vperm.xlu1 %2265, %v2576_v40  }
  0x5e   : > { %2282 = vset.pattern.permute.xlu0 %v2387_v59 }
  0x5f   : > { %1334 = vperm.xlu0 %2282, %v2576_v40  }
  0x60   : > { %1185 = vperm.xlu1 %2265, %v2556_v31  }
  0x63   : > { %1342 = vperm.xlu0 %2282, %v2582_v43  }
  0x64   : > { %2267 = vset.pattern.permute.xlu1 %v2386_v48 }
  0x65   : > { %1262 = vperm.xlu1 %2267, %v2559_v32  }
  0x67   : > { %1354 = vperm.xlu0 %2282, %v2569_v37  }
  0x69   : > { %2269 = vset.pattern.permute.xlu1 %v2387_v59 }
  0x6a   : > { %1326 = vperm.xlu1 %2269, %v2559_v32  }
  0x6b   : > { %2287 = vset.pattern.permute.xlu0 %v2388_v1 }
  0x6c   : > { %1414 = vperm.xlu0 %2287, %v2559_v32  }
  0x6e   : > { %1330 = vperm.xlu1 %2269, %v2552_v29  }
  0x70   : > { %1422 = vperm.xlu0 %2287, %v2576_v40  }
  0x72   : > { %2270 = vset.pattern.permute.xlu1 %v2386_v48 }
  0x73   : > { %1274 = vperm.xlu1 %2270, %v2556_v31  }
  0x74   : > { %1434 = vperm.xlu0 %2287, %v2564_v35  }
  0x77   : > { %2271 = vset.pattern.permute.xlu1 %v2388_v1 }
  0x78   : > { %1418 = vperm.xlu1 %2271, %v2552_v29   ;;  %1438 = vperm.xlu0 %2287, %v2587_v45  }
  0x7c   : > { %2272 = vset.pattern.permute.xlu1 %v2385_v41  ;;  %2291 = vset.pattern.permute.xlu0 %v2389_v7 }
  0x7d   : > { %1193 = vperm.xlu1 %2272, %v2564_v35   ;;  %1507 = vperm.xlu0 %2291, %v2552_v29  }
  0x81   : > { %2273 = vset.pattern.permute.xlu1 %v2387_v59  ;;  %1515 = vperm.xlu0 %2291, %v2556_v31  }
  0x82   : > { %1338 = vperm.xlu1 %2273, %v2556_v31  }
  0x85   : > { %1519 = vperm.xlu0 %2291, %v2582_v43  }
  0x86   : > { %2274 = vset.pattern.permute.xlu1 %v2389_v7 }
  0x87   : > { %1503 = vperm.xlu1 %2274, %v2559_v32  }
  0x89   : > { %1527 = vperm.xlu0 %2291, %v2587_v45  }
  0x8b   : > { %2275 = vset.pattern.permute.xlu1 %v2386_v48 }
  0x8c   : > { %1278 = vperm.xlu1 %2275, %v2582_v43  }
  0x8d   : > { %2294 = vset.pattern.permute.xlu0 %v2390_v10 }
  0x8e   : > { %1595 = vperm.xlu0 %2294, %v2552_v29  }
  0x90   : > { %1282 = vperm.xlu1 %2275, %v2564_v35  }
  0x92   : > { %1599 = vperm.xlu0 %2294, %v2576_v40  }
  0x94   : > { %2276 = vset.pattern.permute.xlu1 %v2388_v1 }
  0x95   : > { %v640_v12 = vpop.permute.xlu1 %639  ;;  %1426 = vperm.xlu1 %2276, %v2556_v31  }
  0x96   : > { %v616_v14 = vpop.permute.xlu0 %615  ;;  %1611 = vperm.xlu0 %2294, %v2564_v35  }
  0x97   : > { %v633_v16 = vmul.f32 %v616_v14, %v609_v13 }
  0x99   : > { %v645_v17 = vpop.permute.xlu1 %644  ;;  %2277 = vset.pattern.permute.xlu1 %v2390_v10  ;;  %v2665_v23 = vadd.f32 %v640_v12, %v633_v16 }
  0x9a   : > { %v621_v18 = vpop.permute.xlu0 %620  ;;  %1591 = vperm.xlu1 %2277, %v2559_v32   ;;  %1615 = vperm.xlu0 %2294, %v2587_v45  }
  0x9b   : > { %v634_v19 = vmul.f32 %v621_v18, %v610_v15  ;;  %3638 = vst [vmem:[#allocation2_spill] sm:$0xff] %v2665_v23 }
  0x9d   : > { %v631_v21 = vpop.permute.xlu1 %630  ;;  %v2667_v24 = vadd.f32 %v645_v17, %v634_v19 }
  0x9e   : > { %v626_v25 = vpop.permute.xlu0 %625  ;;  %2278 = vset.pattern.permute.xlu1 %v2385_v41  ;;  %2298 = vset.pattern.permute.xlu0 %v2391_v26  ;;  %v636_v28 = vmul.f32 %v631_v21, %v612_v20  ;;  %v2304_v41 = vld [vmem:[%s2508_s12 + $0x8] sm:$0xff]   ;;  %s2400_s12 = smov 119  }
  0x9f   : > { %3639 = vst [vmem:[#allocation3_spill] sm:$0xff] %v2667_v24  ;;  %v669_v27 = vpack.c.bf16 %v2667_v24, %v2665_v23  ;;  %1197 = vperm.xlu1 %2278, %v2587_v45   ;;  %1691 = vperm.xlu0 %2298, %v2556_v31   ;;  %v635_v30 = vmul.f32 %v626_v25, %v611_v22 }
  0xa1   : > { %2179 = vmatprep.subr.bf16.mxu0 %v669_v27  ;;  %v655_v33 = vpop.permute.xlu1 %654 }
  0xa2   : > { %v2675_v34 = vadd.f32 %v655_v33, %v636_v28  ;;  %v650_v36 = vpop.permute.xlu0 %649  ;;  %2180 = vmatpush3.bf16.msra.mxu0 %v669_v27 }
  0xa3   : > { %v2677_v38 = vadd.f32 %v650_v36, %v635_v30  ;;  %1201 = vperm.xlu1 %2278, %v2569_v37   ;;  %1699 = vperm.xlu0 %2298, %v2564_v35  }
  0xa4   : > { %3640 = vst [vmem:[#allocation4_spill] sm:$0xff] %v2675_v34 }
  0xa5   : > { %3641 = vst [vmem:[#allocation5_spill] sm:$0xff] %v2677_v38  ;;  %v670_v39 = vpack.c.bf16 %v2675_v34, %v2677_v38 }
  0xa6   : > { %v682_v61 = vpop.permute.xlu0 %681 }
  0xa7   : > { %2181 = vmatprep.subr.bf16.mxu0 %v670_v39  ;;  %2279 = vset.pattern.permute.xlu1 %v2387_v59 }
  0xa8   : > { %2182 = vmatpush3.bf16.msra.mxu0 %v670_v39  ;;  %1346 = vperm.xlu1 %2279, %v2564_v35  }
  0xa9   : > { %1707 = vperm.xlu0 %2298, %v2569_v37  }
  0xaa   : > { %v692_v63 = vpop.permute.xlu0 %691 }
  0xab   : > { %2184 = vmatmul.mubr.msk.bf16.vlgmr.msra.gmra.mrb[0].mxu0 %vm739_vm1, %v2304_v41 }
  0xac   : > { %2187 = vmatprep.mubr.msk.bf16.mxu0 %vm739_vm1, %v2305_v42  ;;  %2280 = vset.pattern.permute.xlu1 %v2389_v7 }
  0xad   : > { %1511 = vperm.xlu1 %2280, %v2576_v40   ;;  %2301 = vset.pattern.permute.xlu0 %v3626_v0 }
  0xae   : > { %974 = vperm.xlu0 %2301, %v2559_v32   ;;  %v702_v2 = vpop.permute.xlu0 %701 }
  0xb1   : > { %2281 = vset.pattern.permute.xlu1 %v2391_v26 }
  0xb2   : > { %1679 = vperm.xlu1 %2281, %v2559_v32   ;;  %984 = vperm.xlu0 %2301, %v2576_v40   ;;  %v1727_v32 = vld [vmem:[%s2717_s24 + $0x8] sm:$0xff]  ;;  %v712_v4 = vpop.permute.xlu0 %711 }
  0xb3   : > { %2188 = vmatmul.mubr.msk.bf16.gmra.mrb[4].mxu0 %vm739_vm1, %v2306_v44 }
  0xb6   : > { %1683 = vperm.xlu1 %2281, %v2552_v29   ;;  %994 = vperm.xlu0 %2301, %v2582_v43   ;;  %v1726_v29 = vld [vmem:[%s2717_s24] sm:$0xff] }
  0xb7   : > { %v2783_v6 = vpop.permute.xlu0 %1077 }
  0xba   : > { %2283 = vset.pattern.permute.xlu1 %v2386_v48  ;;  %1004 = vperm.xlu0 %2301, %v2587_v45   ;;  %v1728_v48 = vld [vmem:[%s2717_s24 + $0x10] sm:$0xff] }
  0xbb   : > { %1290 = vperm.xlu1 %2283, %v2569_v37   ;;  %v2787_v8 = vpop.permute.xlu0 %1089 }
  0xbf   : > { %2284 = vset.pattern.permute.xlu1 %v2388_v1 }
  0xc0   : > { %1430 = vperm.xlu1 %2284, %v2582_v43  }
  0xc4   : > { %2285 = vset.pattern.permute.xlu1 %v2390_v10 }
  0xc5   : > { %1603 = vperm.xlu1 %2285, %v2556_v31   ;;  %v2721_v31 = vpop.permute.xlu1 %686 }
  0xc9   : > { %2286 = vset.pattern.permute.xlu1 %v2387_v59 }
  0xca   : > { %1350 = vperm.xlu1 %2286, %v2587_v45  }
  0xce   : > { %2288 = vset.pattern.permute.xlu1 %v2389_v7 }
  0xcf   : > { %1523 = vperm.xlu1 %2288, %v2564_v35   ;;  %v2725_v35 = vpop.permute.xlu1 %696 }
  0xd3   : > { %2289 = vset.pattern.permute.xlu1 %v2391_v26  ;;  %v2729_v46 = vpop.permute.xlu1 %706 }
  0xd4   : > { %1687 = vperm.xlu1 %2289, %v2576_v40  }
  0xd7   : > { %v2733_v40 = vpop.permute.xlu1 %716 }
  0xd8   : > { %2290 = vset.pattern.permute.xlu1 %v3626_v0 }
  0xd9   : > { %1736 = vperm.xlu1 %2290, %v1726_v29  }
  0xdb   : > { %v2737_v47 = vpop.permute.xlu1 %979 }
  0xdd   : > { %1741 = vperm.xlu1 %2290, %v1727_v32  }
  0xdf   : > { %v2743_v49 = vpop.permute.xlu1 %989 }
  0xe1   : > { %2292 = vset.pattern.permute.xlu1 %v2388_v1 }
  0xe2   : > { %1442 = vperm.xlu1 %2292, %v2569_v37  }
  0xe3   : > { %v2746_v51 = vpop.permute.xlu1 %999 }
  0xe4   : > { %3642 = vst [vmem:[#allocation6_spill] sm:$0xff] %v2746_v51 }
  0xe6   : > { %2293 = vset.pattern.permute.xlu1 %v2390_v10 }
  0xe7   : > { %1607 = vperm.xlu1 %2293, %v2582_v43   ;;  %v2750_v52 = vpop.permute.xlu1 %1009 }
  0xe8   : > { %3643 = vst [vmem:[#allocation7_spill] sm:$0xff] %v2750_v52 }
  0xeb   : > { %2295 = vset.pattern.permute.xlu1 %v2389_v7 }
  0xec   : > { %1531 = vperm.xlu1 %2295, %v2569_v37  }
  0xf0   : > { %2296 = vset.pattern.permute.xlu1 %v2391_v26 }
  0xf1   : > { %1695 = vperm.xlu1 %2296, %v2582_v43   ;;  %v2754_v43 = vpop.permute.xlu1 %1081 }
  0xf5   : > { %2297 = vset.pattern.permute.xlu1 %v3626_v0  ;;  %v2759_v55 = vpop.permute.xlu1 %1085 }
  0xf6   : > { %1746 = vperm.xlu1 %2297, %v1728_v48  }
  0xf9   : > { %v2761_v56 = vpop.permute.xlu1 %1093 }
  0xfa   : > { %1751 = vperm.xlu1 %2297, %v1729_v50   ;;  %3644 = vst [vmem:[#allocation8_spill] sm:$0xff] %v2761_v56 }
  0xfd   : > { %v2763_v57 = vpop.permute.xlu1 %1101 }
  0xfe   : > { %2299 = vset.pattern.permute.xlu1 %v2390_v10  ;;  %3645 = vst [vmem:[#allocation9_spill] sm:$0xff] %v2763_v57  ;;  %v2791_v10 = vpop.permute.xlu0 %1097 }
  0xff   : > { %1619 = vperm.xlu1 %2299, %v2569_v37   ;;  %3649 = vst [vmem:[#allocation13_spill] sm:$0xff] %v2791_v10 }
 0x101   : > { %v2765_v37 = vpop.permute.xlu1 %1173 }
 0x102   : > { %v2795_v12 = vpop.permute.xlu0 %1105 }
 0x103   : > { %2300 = vset.pattern.permute.xlu1 %v2391_v26  ;;  %3651 = vst [vmem:[#allocation15_spill] sm:$0xff] %v2795_v12 }
 0x104   : > { %1703 = vperm.xlu1 %2300, %v2587_v45  }
 0x105   : > { %v2767_v58 = vpop.permute.xlu1 %1181 }
 0x106   : > { %v2799_v14 = vpop.permute.xlu0 %1177 }
 0x108   : > { %2302 = vset.pattern.permute.xlu1 %v3626_v0 }
 0x109   : > { %1756 = vperm.xlu1 %2302, %v1730_v53   ;;  %v2769_v59 = vpop.permute.xlu1 %1185 }
 0x10a   : > { %v2803_v16 = vpop.permute.xlu0 %1189 }
 0x10b   : > { %3653 = vst [vmem:[#allocation17_spill] sm:$0xff] %v2803_v16 }
 0x10d   : > { %1761 = vperm.xlu1 %2302, %v1731_v54   ;;  %v2771_v45 = vpop.permute.xlu1 %1262 }
 0x10e   : > { %v2807_v18 = vpop.permute.xlu0 %1266 }
 0x111   : > { %v2773_v60 = vpop.permute.xlu1 %1326 }
 0x112   : > { %v2811_v20 = vpop.permute.xlu0 %1270 }
 0x115   : > { %v2775_v62 = vpop.permute.xlu1 %1330 }
 0x116   : > { %3646 = vst [vmem:[#allocation10_spill] sm:$0xff] %v2775_v62  ;;  %v2817_v42 = vpop.permute.xlu0 %1286 }
 0x117   : > { %3656 = vst [vmem:[#allocation20_spill] sm:$0xff] %v2817_v42 }
 0x119   : > { %v2777_v1 = vpop.permute.xlu1 %1274 }
 0x11d   : > { %v2779_v3 = vpop.permute.xlu1 %1418 }
 0x11e   : > { %3647 = vst [vmem:[#allocation11_spill] sm:$0xff] %v2779_v3 }
 0x121   : > { %v2781_v5 = vpop.permute.xlu1 %1193 }
 0x122   : > { %3648 = vst [vmem:[#allocation12_spill] sm:$0xff] %v2781_v5 }
 0x125   : > { %v2785_v7 = vpop.permute.xlu1 %1338 }
 0x129   : > { %v2789_v9 = vpop.permute.xlu1 %1503 }
 0x12d   : > { %v2793_v11 = vpop.permute.xlu1 %1278 }
 0x12e   : > { %3650 = vst [vmem:[#allocation14_spill] sm:$0xff] %v2793_v11 }
 0x131   : > { %v2797_v13 = vpop.permute.xlu1 %1282 }
 0x132   : > { %3652 = vst [vmem:[#allocation16_spill] sm:$0xff] %v2797_v13 }
 0x135   : > { %v2801_v15 = vpop.permute.xlu1 %1426 }
 0x139   : > { %v2805_v17 = vpop.permute.xlu1 %1591 }
 0x13d   : > { %v2809_v19 = vpop.permute.xlu1 %1197 }
 0x13e   : > { %3654 = vst [vmem:[#allocation18_spill] sm:$0xff] %v2809_v19 }
 0x141   : > { %v2813_v21 = vpop.permute.xlu1 %1201 }
 0x142   : > { %3655 = vst [vmem:[#allocation19_spill] sm:$0xff] %v2813_v21 }
 0x145   : > { %v2819_v29 = vpop.permute.xlu1 %1346 }
 0x146   : > { %3657 = vst [vmem:[#allocation21_spill] sm:$0xff] %v2819_v29 }
 0x17e   : > { %v2185_v22 = vpop.f32.mrb[0].mxu0 }
 0x17f   : > { %v795_v25 = vadd.f32 %v2185_v22, %v692_v63  ;;  %v786_v26 = vpop.f32.mrb[1].mxu0 }
 0x180   : > { %v787_v27 = vadd.f32 %v786_v26, %v682_v61  ;;  %v2186_v28 = vpop.f32.mrb[2].mxu0  ;;  %v2824_v26 = vpop.permute.xlu1 %1511 }
 0x181   : > { %v827_v30 = vmul.f32 0.70710677, %v795_v25  ;;  %v798_v33 = vadd.f32 %v2186_v28, %v2725_v35  ;;  %v789_v36 = vpop.f32.mrb[3].mxu0  ;;  %v2821_v35 = vpop.permute.xlu0 %1334 }
 0x182   : > { %v825_v39 = vmul.f32 0.70710677, %v787_v27  ;;  %v790_v41 = vadd.f32 %v789_v36, %v2721_v31 }
 0x183   : > { %2311 = verf.f32 %v827_v30  ;;  %v828_v44 = vmul.f32 0.70710677, %v798_v33  ;;  %v820_v24 = vmul.f32 0.5, %v798_v33 }
 0x184   : > { %2313 = verf.f32 %v825_v39  ;;  %v826_v32 = vmul.f32 0.70710677, %v790_v41 }
 0x185   : > { %2315 = verf.f32 %v828_v44  ;;  %v2827_v44 = vpop.permute.xlu0 %1342 }
 0x186   : > { %2317 = verf.f32 %v826_v32  ;;  %v2189_v48 = vpop.f32.mrb[4].mxu0  ;;  %3658 = vst [vmem:[#allocation22_spill] sm:$0xff] %v2827_v44  ;;  %v819_v32 = vmul.f32 0.5, %v795_v25 }
 0x187   : > { %v811_v50 = vadd.f32 %v2189_v48, %v712_v4  ;;  %v802_v53 = vpop.f32.mrb[5].mxu0 }
 0x188   : > { %v803_v54 = vadd.f32 %v802_v53, %v702_v2  ;;  %v2190_v61 = vpop.f32.mrb[6].mxu0 }
 0x189   : > { %v831_v63 = vmul.f32 0.70710677, %v811_v50  ;;  %v814_v31 = vadd.f32 %v2190_v61, %v2733_v40  ;;  %v805_v22 = vpop.f32.mrb[7].mxu0  ;;  %v2837_v25 = vpop.permute.xlu0 %1354 }
 0x18a   : > { %v829_v28 = vmul.f32 0.70710677, %v803_v54  ;;  %v806_v30 = vadd.f32 %v805_v22, %v2729_v46  ;;  %v2831_v46 = vpop.permute.xlu1 %1679  ;;  %3659 = vst [vmem:[#allocation23_spill] sm:$0xff] %v2837_v25 }
 0x18b   : > { %2319 = verf.f32 %v831_v63  ;;  %v832_v36 = vmul.f32 0.70710677, %v814_v31  ;;  %v817_v63 = vmul.f32 0.5, %v787_v27  ;;  %v823_v27 = vmul.f32 0.5, %v811_v50 }
 0x18c   : > { %2321 = verf.f32 %v829_v28  ;;  %v830_v39 = vmul.f32 0.70710677, %v806_v30  ;;  %v822_v23 = vmul.f32 0.5, %v806_v30 }
 0x18d   : > { %v2312_v4 = vpop.eup %2311  ;;  %2323 = verf.f32 %v832_v36 }
 0x18e   : > { %v2314_v2 = vpop.eup %2313  ;;  %v843_v48 = vadd.f32 1.0, %v2312_v4  ;;  %2325 = verf.f32 %v830_v39  ;;  %v818_v39 = vmul.f32 0.5, %v790_v41 }
 0x18f   : > { %v2316_v53 = vpop.eup %2315  ;;  %v841_v0 = vadd.f32 1.0, %v2314_v2 }
 0x190   : > { %v2318_v40 = vpop.eup %2317  ;;  %v2829_v61 = vmul.f32 %v843_v48, %v819_v32  ;;  %v844_v34 = vadd.f32 1.0, %v2316_v53  ;;  %v2849_v32 = vpop.permute.xlu0 %1414 }
 0x191   : > { %v842_v28 = vadd.f32 1.0, %v2318_v40  ;;  %v2839_v36 = vmul.f32 %v841_v0, %v817_v63  ;;  %v824_v40 = vmul.f32 0.5, %v814_v31 }
 0x192   : > { %v2833_v22 = vmul.f32 %v844_v34, %v820_v24  ;;  %873 = vrot.lane.b32.xlu0 %v2829_v61, %s2392_s21  ;;  %v2845_v34 = vpop.permute.xlu1 %1683 }
 0x193   : > { %v2843_v2 = vmul.f32 %v842_v28, %v818_v39  ;;  %3660 = vst [vmem:[#allocation24_spill] sm:$0xff] %v2845_v34  ;;  %v821_v28 = vmul.f32 0.5, %v803_v54  ;;  %v3760_v34 = vld [vmem:[#allocation12_spill] sm:$0xff] }
 0x194   : > { %876 = vrot.lane.b32.xlu1 %v2833_v22, %s2392_s21  ;;  %v2865_v31 = vpop.permute.xlu0 %1422 }
 0x195   : > { %v2320_v33 = vpop.eup %2319 }
 0x196   : > { %v2322_v4 = vpop.eup %2321  ;;  %v847_v24 = vadd.f32 1.0, %v2320_v33  ;;  %867 = vrot.lane.b32.xlu0 %v2839_v36, %s2392_s21  ;;  %v2861_v38 = vpop.permute.xlu1 %1290 }
 0x197   : > { %v2324_v48 = vpop.eup %2323  ;;  %v845_v41 = vadd.f32 1.0, %v2322_v4  ;;  %3664 = vst [vmem:[#allocation28_spill] sm:$0xff] %v2861_v38 }
 0x198   : > { %v2326_v0 = vpop.eup %2325  ;;  %v2851_v53 = vmul.f32 %v847_v24, %v823_v27  ;;  %v848_v63 = vadd.f32 1.0, %v2324_v48  ;;  %870 = vrot.lane.b32.xlu1 %v2843_v2, %s2392_s21  ;;  %v2875_v27 = vpop.permute.xlu0 %1434 }
 0x199   : > { %v846_v39 = vadd.f32 1.0, %v2326_v0  ;;  %v2859_v33 = vmul.f32 %v845_v41, %v821_v28  ;;  %3667 = vst [vmem:[#allocation31_spill] sm:$0xff] %v2875_v27 }
 0x19a   : > { %3661 = vst [vmem:[#allocation25_spill] sm:$0xff] %v2851_v53  ;;  %v2855_v50 = vmul.f32 %v848_v63, %v824_v40  ;;  %885 = vrot.lane.b32.xlu0 %v2851_v53, %s2392_s21  ;;  %v2873_v54 = vpop.permute.xlu1 %1430 }
 0x19b   : > { %3663 = vst [vmem:[#allocation27_spill] sm:$0xff] %v2859_v33  ;;  %v2867_v4 = vmul.f32 %v846_v39, %v822_v23  ;;  %3666 = vst [vmem:[#allocation30_spill] sm:$0xff] %v2873_v54 }
 0x19c   : > { %3662 = vst [vmem:[#allocation26_spill] sm:$0xff] %v2855_v50  ;;  %888 = vrot.lane.b32.xlu1 %v2855_v50, %s2392_s21  ;;  %v2879_v24 = vpop.permute.xlu0 %1438 }
 0x19d   : > { %3665 = vst [vmem:[#allocation29_spill] sm:$0xff] %v2867_v4  ;;  %3668 = vst [vmem:[#allocation32_spill] sm:$0xff] %v2879_v24 }
 0x19e   : > { %879 = vrot.lane.b32.xlu0 %v2859_v33, %s2392_s21  ;;  %v2877_v30 = vpop.permute.xlu1 %1603 }
 0x1a0   : > { %882 = vrot.lane.b32.xlu1 %v2867_v4, %s2392_s21  ;;  %v2883_v0 = vpop.permute.xlu0 %1507 }
 0x1a1   : > { %3670 = vst [vmem:[#allocation34_spill] sm:$0xff] %v2883_v0 }
 0x1a2   : > { %v2881_v48 = vpop.permute.xlu1 %1350 }
 0x1a3   : > { %3669 = vst [vmem:[#allocation33_spill] sm:$0xff] %v2881_v48 }
 0x1a4   : > { %v2887_v41 = vpop.permute.xlu0 %1515 }
 0x1a6   : > { %v2885_v23 = vpop.permute.xlu1 %1523 }
 0x1a7   : > { %3671 = vst [vmem:[#allocation35_spill] sm:$0xff] %v2885_v23 }
 0x1a8   : > { %v2891_v63 = vpop.permute.xlu0 %1519 }
 0x1a9   : > { %3673 = vst [vmem:[#allocation37_spill] sm:$0xff] %v2891_v63 }
 0x1aa   : > { %v2889_v40 = vpop.permute.xlu1 %1687 }
 0x1ab   : > { %3672 = vst [vmem:[#allocation36_spill] sm:$0xff] %v2889_v40 }
 0x1ac   : > { %v2895_v39 = vpop.permute.xlu0 %1527 }
 0x1ad   : > { %3675 = vst [vmem:[#allocation39_spill] sm:$0xff] %v2895_v39 }
 0x1ae   : > { %v2893_v28 = vpop.permute.xlu1 %1736 }
 0x1af   : > { %3674 = vst [vmem:[#allocation38_spill] sm:$0xff] %v2893_v28 }
 0x1b0   : > { %v2899_v29 = vpop.permute.xlu0 %1595 }
 0x1b1   : > { %3677 = vst [vmem:[#allocation41_spill] sm:$0xff] %v2899_v29 }
 0x1b2   : > { %v2897_v27 = vpop.permute.xlu1 %1741 }
 0x1b3   : > { %3676 = vst [vmem:[#allocation40_spill] sm:$0xff] %v2897_v27 }
 0x1b4   : > { %v2903_v48 = vpop.permute.xlu0 %1599 }
 0x1b6   : > { %v2901_v24 = vpop.permute.xlu1 %1442 }
 0x1b7   : > { %3678 = vst [vmem:[#allocation42_spill] sm:$0xff] %v2901_v24 }
 0x1b8   : > { %v2907_v23 = vpop.permute.xlu0 %1611 }
 0x1b9   : > { %3680 = vst [vmem:[#allocation44_spill] sm:$0xff] %v2907_v23 }
 0x1ba   : > { %v2905_v42 = vpop.permute.xlu1 %1607 }
 0x1bb   : > { %3679 = vst [vmem:[#allocation43_spill] sm:$0xff] %v2905_v42 }
 0x1bc   : > { %v2911_v25 = vpop.permute.xlu0 %1615 }
 0x1bd   : > { %3682 = vst [vmem:[#allocation46_spill] sm:$0xff] %v2911_v25 }
 0x1be   : > { %v2909_v13 = vpop.permute.xlu1 %1531 }
 0x1bf   : > { %3681 = vst [vmem:[#allocation45_spill] sm:$0xff] %v2909_v13 }
 0x1c0   : > { %v2913_v63 = vpop.permute.xlu0 %1691 }
 0x1c2   : > { %v2915_v19 = vpop.permute.xlu1 %1695 }
 0x1c3   : > { %3683 = vst [vmem:[#allocation47_spill] sm:$0xff] %v2915_v19 }
 0x1c4   : > { %v2917_v39 = vpop.permute.xlu0 %1699 }
 0x1c5   : > { %3684 = vst [vmem:[#allocation48_spill] sm:$0xff] %v2917_v39 }
 0x1c6   : > { %v2919_v5 = vpop.permute.xlu1 %1746 }
 0x1c7   : > { %3685 = vst [vmem:[#allocation49_spill] sm:$0xff] %v2919_v5 }
 0x1c8   : > { %v2921_v57 = vpop.permute.xlu0 %1707 }
 0x1c9   : > { %3686 = vst [vmem:[#allocation50_spill] sm:$0xff] %v2921_v57 }
 0x1ca   : > { %v2923_v24 = vpop.permute.xlu1 %1751 }
 0x1cb   : > { %3687 = vst [vmem:[#allocation51_spill] sm:$0xff] %v2923_v24 }
 0x1cc   : > { %v2925_v54 = vpop.permute.xlu0 %974 }
 0x1ce   : > { %v2927_v42 = vpop.permute.xlu1 %1619 }
 0x1cf   : > { %3688 = vst [vmem:[#allocation52_spill] sm:$0xff] %v2927_v42 }
 0x1d0   : > { %v2929_v23 = vpop.permute.xlu0 %984 }
 0x1d2   : > { %v2931_v13 = vpop.permute.xlu1 %1703 }
 0x1d3   : > { %3689 = vst [vmem:[#allocation53_spill] sm:$0xff] %v2931_v13 }
 0x1d4   : > { %v2933_v25 = vpop.permute.xlu0 %994 }
 0x1d5   : > { %3690 = vst [vmem:[#allocation54_spill] sm:$0xff] %v2933_v25 }
 0x1d6   : > { %v2935_v38 = vpop.permute.xlu1 %1756 }
 0x1d7   : > { %3691 = vst [vmem:[#allocation55_spill] sm:$0xff] %v2935_v38 }
 0x1d8   : > { %v2937_v19 = vpop.permute.xlu0 %1004 }
 0x1d9   : > { %3692 = vst [vmem:[#allocation56_spill] sm:$0xff] %v2937_v19 }
 0x1da   : > { %v2939_v39 = vpop.permute.xlu1 %1761 }
 0x1db   : > { %3693 = vst [vmem:[#allocation57_spill] sm:$0xff] %v2939_v39 }
 0x204   : > { %v874_v57 = vpop.permute.xlu0 %873 }
 0x205   : > { %v875_v51 = vsel %vm866_vm2, %v874_v57, %v2829_v61 }
 0x206   : > { %v877_v21 = vpop.permute.xlu1 %876  ;;  %895 = vrot.lane.b32.xlu0 %v875_v51, %s2392_s21 }
 0x207   : > { %v878_v42 = vsel %vm866_vm2, %v877_v21, %v2833_v22 }
 0x208   : > { %897 = vrot.lane.b32.xlu1 %v878_v42, %s2392_s21  ;;  %v868_v13 = vpop.permute.xlu0 %867 }
 0x209   : > { %v869_v38 = vsel %vm866_vm2, %v868_v13, %v2839_v36 }
 0x20a   : > { %v871_v19 = vpop.permute.xlu1 %870  ;;  %891 = vrot.lane.b32.xlu0 %v869_v38, %s2392_s21 }
 0x20b   : > { %v872_v39 = vsel %vm866_vm2, %v871_v19, %v2843_v2 }
 0x20c   : > { %893 = vrot.lane.b32.xlu1 %v872_v39, %s2392_s21  ;;  %v886_v57 = vpop.permute.xlu0 %885 }
 0x20d   : > { %v887_v51 = vsel %vm866_vm2, %v886_v57, %v2851_v53 }
 0x20e   : > { %v889_v10 = vpop.permute.xlu1 %888  ;;  %903 = vrot.lane.b32.xlu0 %v887_v51, %s2392_s21 }
 0x20f   : > { %v890_v21 = vsel %vm866_vm2, %v889_v10, %v2855_v50 }
 0x210   : > { %905 = vrot.lane.b32.xlu1 %v890_v21, %s2392_s21  ;;  %v880_v13 = vpop.permute.xlu0 %879 }
 0x211   : > { %v881_v38 = vsel %vm866_vm2, %v880_v13, %v2859_v33 }
 0x212   : > { %v883_v42 = vpop.permute.xlu1 %882  ;;  %899 = vrot.lane.b32.xlu0 %v881_v38, %s2392_s21 }
 0x213   : > { %v884_v19 = vsel %vm866_vm2, %v883_v42, %v2867_v4 }
 0x214   : > { %901 = vrot.lane.b32.xlu1 %v884_v19, %s2392_s21 }
 0x278   : > { %v896_v39 = vpop.permute.xlu0 %895 }
 0x279   : > { %v909_v57 = vsel %vm866_vm2, %v896_v39, %v2829_v61 }
 0x27a   : > { %1144 = vrot.lane.b32.xlu1 %v909_v57, %s2393_s25  ;;  %944 = vrot.lane.b32.xlu0 %v909_v57, %s2394_s27  ;;  %v898_v21 = vpop.permute.xlu1 %897 }
 0x27b   : > { %v910_v13 = vsel %vm866_vm2, %v898_v21, %v2833_v22 }
 0x27c   : > { %v892_v10 = vpop.permute.xlu0 %891 }
 0x27d   : > { %v907_v51 = vsel %vm866_vm2, %v892_v10, %v2839_v36 }
 0x27e   : > { %1385 = vrot.lane.b32.xlu1 %v909_v57, %s2395_s28  ;;  %1048 = vrot.lane.b32.xlu0 %v909_v57, %s2396_s26  ;;  %v894_v38 = vpop.permute.xlu1 %893 }
 0x27f   : > { %v908_v42 = vsel %vm866_vm2, %v894_v38, %v2843_v2 }
 0x280   : > { %v904_v19 = vpop.permute.xlu0 %903 }
 0x281   : > { %v3001_v39 = vsel %vm866_vm2, %v904_v19, %v2851_v53 }
 0x282   : > { %1474 = vrot.lane.b32.xlu1 %v909_v57, %s2397_s23  ;;  %1233 = vrot.lane.b32.xlu0 %v909_v57, %s2398_s30  ;;  %v906_v21 = vpop.permute.xlu1 %905 }
 0x286   : > { %1562 = vrot.lane.b32.xlu1 %v909_v57, %s2399_s11  ;;  %940 = vrot.lane.b32.xlu0 %v907_v51, %s2394_s27  ;;  %v902_v44 = vpop.permute.xlu1 %901 }
 0x287   : > { %v3064_v12 = vsel %vm866_vm2, %v902_v44, %v2867_v4 }
 0x28a   : > { %1650 = vrot.lane.b32.xlu1 %v909_v57, %s2400_s12  ;;  %1044 = vrot.lane.b32.xlu0 %v907_v51, %s2396_s26  ;;  %v900_v57 = vpop.permute.xlu0 %899 }
 0x28b   : > { %v911_v10 = vsel %vm866_vm2, %v900_v57, %v2859_v33 }
 0x28e   : > { %1140 = vrot.lane.b32.xlu1 %v907_v51, %s2393_s25  ;;  %1229 = vrot.lane.b32.xlu0 %v907_v51, %s2398_s30 }
 0x292   : > { %1381 = vrot.lane.b32.xlu1 %v907_v51, %s2395_s28  ;;  %1146 = vrot.lane.b32.xlu0 %v910_v13, %s2393_s25 }
 0x296   : > { %1470 = vrot.lane.b32.xlu1 %v907_v51, %s2397_s23  ;;  %1476 = vrot.lane.b32.xlu0 %v910_v13, %s2397_s23 }
 0x29a   : > { %1558 = vrot.lane.b32.xlu1 %v907_v51, %s2399_s11  ;;  %1564 = vrot.lane.b32.xlu0 %v910_v13, %s2399_s11 }
 0x29e   : > { %1646 = vrot.lane.b32.xlu1 %v907_v51, %s2400_s12  ;;  %1652 = vrot.lane.b32.xlu0 %v910_v13, %s2400_s12  ;;  %v857_v51 = vld [vmem:[%s3616_s1] sm:$0x3] }
 0x29f   : > { %vm1028_vm3 = vcmp.ge.f32.partialorder %v857_v51, 0.0  ;;  %vm1033_vm4 = vcmp.le.f32.partialorder %v857_v51, 7.0  ;;  %vm915_vm5 = vcmp.ge.f32.partialorder %v857_v51, 1.0  ;;  %vm3637_vm6 = vcmp.ge.f32.partialorder %v857_v51, -1.0 }
 0x2a0   : > { %vm916_vm7 = vcmp.le.f32.partialorder %v857_v51, 8.0  ;;  %vm1129_vm8 = vcmp.le.f32.partialorder %v857_v51, 6.0  ;;  %vm3056_vm10 = vmand %vm1028_vm3, %vm1033_vm4 }
 0x2a1   : > { %vm3082_vm13 = vmand %vm915_vm5, %vm916_vm7 }
 0x2a2   : > { %946 = vrot.lane.b32.xlu1 %v910_v13, %s2394_s27  ;;  %1142 = vrot.lane.b32.xlu0 %v908_v42, %s2393_s25 }
 0x2a6   : > { %1050 = vrot.lane.b32.xlu1 %v910_v13, %s2396_s26  ;;  %1383 = vrot.lane.b32.xlu0 %v908_v42, %s2395_s28 }
 0x2aa   : > { %1235 = vrot.lane.b32.xlu1 %v910_v13, %s2398_s30  ;;  %1560 = vrot.lane.b32.xlu0 %v908_v42, %s2399_s11 }
 0x2ae   : > { %1387 = vrot.lane.b32.xlu1 %v910_v13, %s2395_s28  ;;  %952 = vrot.lane.b32.xlu0 %v3001_v39, %s2394_s27  ;;  %v3694_v13 = vmov 0  }
 0x2af   : > { %v1029_v38 = vsel %vm1028_vm3, 1, %v3694_v13  ;;  %v1034_v57 = vsel %vm1033_vm4, 1, %v3694_v13  ;;  %v918_v53 = vsel %vm915_vm5, 1, %v3694_v13 }
 0x2b0   : > { %v1030_v19 = vrot.slane %v1029_v38, 1  ;;  %v1035_v38 = vrot.slane %v1034_v57, 1  ;;  %v919_v33 = vrot.slane %v918_v53, 1 }
 0x2b2   : > { %942 = vrot.lane.b32.xlu1 %v908_v42, %s2394_s27  ;;  %1056 = vrot.lane.b32.xlu0 %v3001_v39, %s2396_s26  ;;  %vm3050_vm9 = vcmp.ne.s32.totalorder %v1030_v19, 0  ;;  %v1130_v19 = vsel %vm1129_vm8, 1, %v3694_v13  ;;  %vm3076_vm12 = vcmp.ne.s32.totalorder %v1035_v38, 0  ;;  %vm3086_vm14 = vcmp.ne.s32.totalorder %v919_v33, 0 }
 0x2b3   : > { %vm1309_vm11 = vmand %vm3056_vm10, %vm3050_vm9 }
 0x2b4   : > { %vm3100_vm1 = vmand %vm1309_vm11, %vm3076_vm12 }
 0x2b6   : > { %1046 = vrot.lane.b32.xlu1 %v908_v42, %s2396_s26  ;;  %1241 = vrot.lane.b32.xlu0 %v3001_v39, %s2398_s30 }
 0x2ba   : > { %1231 = vrot.lane.b32.xlu1 %v908_v42, %s2398_s30  ;;  %1482 = vrot.lane.b32.xlu0 %v3001_v39, %s2397_s23 }
 0x2be   : > { %1472 = vrot.lane.b32.xlu1 %v908_v42, %s2397_s23  ;;  %948 = vrot.lane.b32.xlu0 %v911_v10, %s2394_s27 }
 0x2c2   : > { %1648 = vrot.lane.b32.xlu1 %v908_v42, %s2400_s12  ;;  %1052 = vrot.lane.b32.xlu0 %v911_v10, %s2396_s26  ;;  %v3036_v42 = vsel %vm866_vm2, %v906_v21, %v2855_v50  ;;  %v1125_v21 = vsel %vm3637_vm6, 1, %v3694_v13  ;;  %vm921_vm2 = vmand %vm3082_vm13, %vm3086_vm14 }
 0x2c3   : > { %v1126_v11 = vrot.slane %v1125_v21, 1  ;;  %v1131_v21 = vrot.slane %v1130_v19, 1 }
 0x2c5   : > { %vm3090_vm15 = vcmp.ne.s32.totalorder %v1126_v11, 0  ;;  %vm3116_vm5 = vcmp.ne.s32.totalorder %v1131_v21, 0 }
 0x2c6   : > { %1152 = vrot.lane.b32.xlu1 %v3001_v39, %s2393_s25  ;;  %1389 = vrot.lane.b32.xlu0 %v911_v10, %s2395_s28  ;;  %vm1128_vm4 = vmand %vm3082_vm13, %vm3090_vm15 }
 0x2c7   : > { %vm1133_vm0 = vmand %vm1128_vm4, %vm3116_vm5 }
 0x2c8   : > { %v1134_v25 = vsel %vm1133_vm0, 1, %v3694_v13 }
 0x2ca   : > { %1393 = vrot.lane.b32.xlu1 %v3001_v39, %s2395_s28  ;;  %1478 = vrot.lane.b32.xlu0 %v911_v10, %s2397_s23 }
 0x2ce   : > { %1148 = vrot.lane.b32.xlu1 %v911_v10, %s2393_s25  ;;  %1654 = vrot.lane.b32.xlu0 %v911_v10, %s2400_s12 }
 0x2d2   : > { %1237 = vrot.lane.b32.xlu1 %v911_v10, %s2398_s30  ;;  %1154 = vrot.lane.b32.xlu0 %v3036_v42, %s2393_s25 }
 0x2d6   : > { %1566 = vrot.lane.b32.xlu1 %v911_v10, %s2399_s11  ;;  %1395 = vrot.lane.b32.xlu0 %v3036_v42, %s2395_s28  ;;  %v922_v10 = vsel %vm916_vm7, 1, %v3694_v13  ;;  %vm1032_vm7 = vmand %vm3082_vm13, %vm3050_vm9 }
 0x2d7   : > { %v923_v53 = vrot.slane %v922_v10, 1  ;;  %v927_v10 = vlaneseq  ;;  %vm1037_vm6 = vmand %vm1032_vm7, %vm3076_vm12 }
 0x2d8   : > { %vm1221_vm13 = vmand %vm3056_vm10, %vm3086_vm14 }
 0x2d9   : > { %vm3108_vm3 = vcmp.ne.s32.totalorder %v923_v53, 0  ;;  %v928_v19 = vshrl.u32 %v927_v10, 7  ;;  %v1732_v10 = vld [vmem:[%s2717_s24 + $0x30] sm:$0xff]  ;;  %vm1373_vm7 = vmand %vm3056_vm10, %vm3090_vm15 }
 0x2da   : > { %954 = vrot.lane.b32.xlu1 %v3036_v42, %s2394_s27  ;;  %1150 = vrot.lane.b32.xlu0 %v3064_v12, %s2393_s25  ;;  %vm925_vm11 = vmand %vm921_vm2, %vm3108_vm3  ;;  %vm3713_vm2 = vcmp.ge.f32.partialorder %v857_v51, -1.0  ;;  %v1311_v51 = vsel %vm3100_vm1, 1, %v3694_v13 }
 0x2db   : > { %v926_v53 = vsel %vm925_vm11, 1, %v3694_v13  ;;  %v3139_v44 = vsub.s32 0, %v928_v19  ;;  %vm3147_vm4 = vmand %vm3713_vm2, %vm1129_vm8  ;;  %v1038_v19 = vsel %vm1037_vm6, 1, %v3694_v13 }
 0x2dc   : > { %vm1222_vm11 = vmand %vm1221_vm13, %vm3108_vm3 }
 0x2dd   : > { %v930_v56 = vrot.slane %v926_v53, %v3139_v44  ;;  %vm1462_vm8 = vmand %vm3147_vm4, %vm3086_vm14  ;;  %v1138_v52 = vrot.slane %v1134_v25, %v3139_v44  ;;  %v1042_v53 = vrot.slane %v1038_v19, %v3139_v44  ;;  %v1223_v4 = vsel %vm1222_vm11, 1, %v3694_v13 }
 0x2de   : > { %1058 = vrot.lane.b32.xlu1 %v3036_v42, %s2396_s26  ;;  %1239 = vrot.lane.b32.xlu0 %v3064_v12, %s2398_s30  ;;  %vm1374_vm0 = vmand %vm1373_vm7, %vm3116_vm5  ;;  %v1315_v25 = vrot.slane %v1311_v51, %v3139_v44  ;;  %v1227_v11 = vrot.slane %v1223_v4, %v3139_v44 }
 0x2df   : > { %vm3175_vm6 = vcmp.eq.s32.totalorder %v930_v56, 1  ;;  %vm1463_vm10 = vmand %vm1462_vm8, %vm3108_vm3  ;;  %vm3189_vm14 = vcmp.eq.s32.totalorder %v1138_v52, 1  ;;  %vm3197_vm1 = vcmp.eq.s32.totalorder %v1042_v53, 1 }
 0x2e0   : > { %v1464_v29 = vsel %vm1463_vm10, 1, %v3694_v13  ;;  %vm3207_vm3 = vcmp.eq.s32.totalorder %v1315_v25, 1  ;;  %vm3220_vm13 = vcmp.eq.s32.totalorder %v1227_v11, 1  ;;  %vm1550_vm11 = vmand %vm3147_vm4, %vm3050_vm9 }
 0x2e1   : > { %vm1638_vm8 = vmand %vm3147_vm4, %vm3090_vm15 }
 0x2e2   : > { %1243 = vrot.lane.b32.xlu1 %v3036_v42, %s2398_s30  ;;  %1570 = vrot.lane.b32.xlu0 %v3001_v39, %s2399_s11  ;;  %vm1551_vm9 = vmand %vm1550_vm11, %vm3076_vm12 }
 0x2e3   : > { %vm1639_vm15 = vmand %vm1638_vm8, %vm3116_vm5  ;;  %v1552_v57 = vsel %vm1551_vm9, 1, %v3694_v13  ;;  %vm3732_vm5 = vcmask 523264  }
 0x2e6   : > { %1484 = vrot.lane.b32.xlu1 %v3036_v42, %s2397_s23  ;;  %1568 = vrot.lane.b32.xlu0 %v3064_v12, %s2399_s11 }
 0x2ea   : > { %950 = vrot.lane.b32.xlu1 %v3064_v12, %s2394_s27  ;;  %1766 = vperm.xlu0 %2301, %v1732_v10   ;;  %s3183_s27 = scalar_lea.vmem %s3624_s9, %s2491_s20  ;;  %v1375_v10 = vsel %vm1374_vm0, 1, %v3694_v13  ;;  %s2165_s20 = sshll.u32 %s3807_s14, 4  ;;  %vm3787_vm0 = vmmov %vm3732_vm5 }
 0x2eb   : > { %v1831_v52 = vld [vmem:[%s3183_s27 + $0x8] sm:$0xff]  ;;  %v1379_v5 = vrot.slane %v1375_v10, %v3139_v44  ;;  %v1468_v10 = vrot.slane %v1464_v29, %v3139_v44  ;;  %v1833_v62 = vld [vmem:[%s3183_s27 + $0x18] sm:$0xff]  ;;  %vm3792_vm10 = vmmov %vm3787_vm0 }
 0x2ec   : > { %v1145_v27 = vpop.permute.xlu1 %1144  ;;  %v945_v38 = vpop.permute.xlu0 %944 }
 0x2ed   : > { %v966_v51 = vsel %vm3175_vm6, %v945_v38, 0.0  ;;  %v1166_v53 = vsel %vm3189_vm14, %v1145_v27, 0.0  ;;  %vm3226_vm2 = vcmp.eq.s32.totalorder %v1379_v5, 1  ;;  %vm3235_vm7 = vcmp.eq.s32.totalorder %v1468_v10, 1 }
 0x2ee   : > { %1054 = vrot.lane.b32.xlu1 %v3064_v12, %s2396_s26  ;;  %1660 = vrot.lane.b32.xlu0 %v3036_v42, %s2400_s12  ;;  %v1014_v3 = vmul.f32 %v2929_v23, %v966_v51  ;;  %v1206_v27 = vmul.f32 %v2767_v58, %v1166_v53  ;;  %s3344_s26 = scalar_lea.vmem %s3623_s8, %s2165_s20 }
 0x2f0   : > { %v1386_v24 = vpop.permute.xlu1 %1385  ;;  %v1049_v0 = vpop.permute.xlu0 %1048 }
 0x2f1   : > { %v1070_v4 = vsel %vm3197_vm1, %v1049_v0, 0.0 }
 0x2f2   : > { %v1110_v38 = vmul.f32 %v2759_v55, %v1070_v4  ;;  %1572 = vrot.lane.b32.xlu1 %v3036_v42, %s2399_s11  ;;  %1841 = vperm.xlu0 %2301, %v1831_v52   ;;  %v1319_v42 = vsel %vm3207_vm3, %v2829_v61, 0.0  ;;  %s555_s11 = scalar_lea.vmem %s3625_s10, %s2125_s22 }
 0x2f3   : > { %v1359_v61 = vmul.f32 %v2821_v35, %v1319_v42 }
 0x2f4   : > { %v1118_v0 = vadd.f32 %v1110_v38, %v1014_v3  ;;  %v1475_v23 = vpop.permute.xlu1 %1474  ;;  %v1234_v55 = vpop.permute.xlu0 %1233  ;;  %v1407_v3 = vsel %vm3226_vm2, %v1386_v24, 0.0 }
 0x2f5   : > { %v1255_v29 = vsel %vm3220_vm13, %v1234_v55, 0.0  ;;  %v1496_v4 = vsel %vm3235_vm7, %v1475_v23, 0.0  ;;  %v1447_v38 = vmul.f32 %v2865_v31, %v1407_v3 }
 0x2f6   : > { %v1214_v58 = vadd.f32 %v1206_v27, %v1118_v0  ;;  %v1295_v5 = vmul.f32 %v2811_v20, %v1255_v29  ;;  %1391 = vrot.lane.b32.xlu1 %v3064_v12, %s2395_s28  ;;  %1851 = vperm.xlu0 %2301, %v1833_v62   ;;  %v1733_v62 = vld [vmem:[%s2717_s24 + $0x38] sm:$0xff]  ;;  %v1536_v10 = vmul.f32 %v2824_v26, %v1496_v4  ;;  %v1830_v26 = vld [vmem:[%s3183_s27] sm:$0xff] }
 0x2f8   : > { %v1303_v51 = vadd.f32 %v1295_v5, %v1214_v58  ;;  %v3245_v52 = vpop.permute.xlu1 %1562  ;;  %v941_v53 = vpop.permute.xlu0 %940  ;;  %v1832_v5 = vld [vmem:[%s3183_s27 + $0x10] sm:$0xff] }
 0x2fa   : > { %v1367_v20 = vadd.f32 %v1359_v61, %v1303_v51  ;;  %1480 = vrot.lane.b32.xlu1 %v3064_v12, %s2397_s23 }
 0x2fc   : > { %v1455_v24 = vadd.f32 %v1447_v38, %v1367_v20  ;;  %v3254_v35 = vpop.permute.xlu1 %1650  ;;  %v1045_v27 = vpop.permute.xlu0 %1044 }
 0x2fd   : > { %v1068_v4 = vsel %vm3197_vm1, %v1045_v27, 0.0 }
 0x2fe   : > { %v3256_v0 = vadd.f32 %v1536_v10, %v1455_v24  ;;  %1771 = vperm.xlu1 %2302, %v1733_v62   ;;  %v1108_v10 = vmul.f32 %v2783_v6, %v1068_v4 }
 0x300   : > { %v1141_v55 = vpop.permute.xlu1 %1140  ;;  %v1230_v23 = vpop.permute.xlu0 %1229 }
 0x301   : > { %v1164_v38 = vsel %vm3189_vm14, %v1141_v55, 0.0  ;;  %v1253_v50 = vsel %vm3220_vm13, %v1230_v23, 0.0 }
 0x302   : > { %1656 = vrot.lane.b32.xlu1 %v3064_v12, %s2400_s12 }
 0x304   : > { %v3260_v31 = vpop.permute.xlu1 %1381  ;;  %v1147_v42 = vpop.permute.xlu0 %1146 }
 0x306   : > { %1658 = vrot.lane.b32.xlu1 %v3001_v39, %s2400_s12  ;;  %v964_v39 = vsel %vm3175_vm6, %v941_v53, 0.0 }
 0x307   : > { %v1012_v24 = vmul.f32 %v2925_v54, %v964_v39 }
 0x308   : > { %v3265_v29 = vpop.permute.xlu1 %1470  ;;  %v3267_v58 = vpop.permute.xlu0 %1476 }
 0x309   : > { %v1116_v6 = vadd.f32 %v1108_v10, %v1012_v24  ;;  %v1640_v10 = vsel %vm1639_vm15, 1, %v3694_v13 }
 0x30a   : > { %1836 = vperm.xlu1 %2302, %v1830_v26   ;;  %v1204_v26 = vmul.f32 %v2765_v37, %v1164_v38  ;;  %v1167_v37 = vsel %vm3189_vm14, %v1147_v42, 0.0 }
 0x30b   : > { %v1207_v21 = vmul.f32 %v2769_v59, %v1167_v37  ;;  %v1317_v59 = vsel %vm3207_vm3, %v2839_v36, 0.0  ;;  %v1644_v36 = vrot.slane %v1640_v10, %v3139_v44 }
 0x30c   : > { %v3270_v3 = vpop.permute.xlu1 %1558  ;;  %v3272_v61 = vpop.permute.xlu0 %1564  ;;  %v1212_v16 = vadd.f32 %v1204_v26, %v1116_v6  ;;  %v1357_v6 = vmul.f32 %v2773_v60, %v1317_v59 }
 0x30d   : > { %vm3361_vm4 = vcmp.eq.s32.totalorder %v1644_v36, 1 }
 0x30e   : > { %1846 = vperm.xlu1 %2302, %v1832_v5  }
 0x310   : > { %v3274_v51 = vpop.permute.xlu1 %1646  ;;  %v3276_v12 = vpop.permute.xlu0 %1652 }
 0x314   : > { %v947_v20 = vpop.permute.xlu1 %946  ;;  %v3284_v62 = vpop.permute.xlu0 %1142 }
 0x315   : > { %v967_v5 = vsel %vm3175_vm6, %v947_v20, 0.0  ;;  %v1293_v20 = vmul.f32 %v2771_v45, %v1253_v50  ;;  %v2307_v50 = vld [vmem:[%s3344_s26] sm:$0xff]  }
 0x316   : > { %v1015_v55 = vmul.f32 %v2743_v49, %v967_v5  ;;  %2199 = vmatprep.mubr.msk.bf16.mxu1 %vm3732_vm5, %v2307_v50 }
 0x317   : > { %v1301_v45 = vadd.f32 %v1293_v20, %v1212_v16 }
 0x318   : > { %v1051_v53 = vpop.permute.xlu1 %1050  ;;  %v3295_v27 = vpop.permute.xlu0 %1383 }
 0x319   : > { %v1071_v54 = vsel %vm3197_vm1, %v1051_v53, 0.0  ;;  %v1365_v60 = vadd.f32 %v1357_v6, %v1301_v45  ;;  %v3735_v6 = vld [vmem:[#allocation36_spill] sm:$0xff] }
 0x31a   : > { %v1111_v4 = vmul.f32 %v2787_v8, %v1071_v54  ;;  %v1320_v8 = vsel %vm3207_vm3, %v2833_v22, 0.0  ;;  %v1556_v22 = vrot.slane %v1552_v57, %v3139_v44  ;;  %v1497_v54 = vsel %vm3235_vm7, %v3267_v58, 0.0 }
 0x31b   : > { %v1360_v26 = vmul.f32 %v2785_v7, %v1320_v8  ;;  %v1494_v44 = vsel %vm3235_vm7, %v3265_v29, 0.0  ;;  %v1537_v58 = vmul.f32 %v2887_v41, %v1497_v54  ;;  %v1670_v41 = vsel %vm3361_vm4, %v3274_v51, 0.0 }
 0x31c   : > { %v1119_v42 = vadd.f32 %v1111_v4, %v1015_v55  ;;  %v1236_v39 = vpop.permute.xlu1 %1235  ;;  %v3314_v38 = vpop.permute.xlu0 %1560  ;;  %vm3355_vm12 = vcmp.eq.s32.totalorder %v1556_v22, 1  ;;  %v1710_v45 = vmul.f32 %v2831_v46, %v1670_v41  ;;  %v1318_v46 = vsel %vm3207_vm3, %v2843_v2, 0.0 }
 0x31d   : > { %v1256_v49 = vsel %vm3220_vm13, %v1236_v39, 0.0  ;;  %v1582_v29 = vsel %vm3355_vm12, %v3270_v3, 0.0  ;;  %v1534_v39 = vmul.f32 %v2789_v9, %v1494_v44  ;;  %v1585_v20 = vsel %vm3355_vm12, %v3272_v61, 0.0  ;;  %v3737_v44 = vld [vmem:[#allocation11_spill] sm:$0xff] }
 0x31e   : > { %v1215_v33 = vadd.f32 %v1207_v21, %v1119_v42  ;;  %v1296_v23 = vmul.f32 %v2777_v1, %v1256_v49  ;;  %v1405_v1 = vsel %vm3226_vm2, %v3260_v31, 0.0  ;;  %v1584_v49 = vsel %vm3355_vm12, %v3245_v52, 0.0 }
 0x31f   : > { %v1445_v16 = vmul.f32 %v2849_v32, %v1405_v1  ;;  %v1622_v9 = vmul.f32 %v2805_v17, %v1582_v29  ;;  %v1165_v61 = vsel %vm3189_vm14, %v3284_v62, 0.0  ;;  %v1624_v51 = vmul.f32 %v2903_v48, %v1584_v49  ;;  %v3739_v29 = vld [vmem:[#allocation34_spill] sm:$0xff]  ;;  %v3741_v49 = vld [vmem:[#allocation49_spill] sm:$0xff] }
 0x320   : > { %v1304_v24 = vadd.f32 %v1296_v23, %v1215_v33  ;;  %v1388_v5 = vpop.permute.xlu1 %1387  ;;  %v3329_v53 = vpop.permute.xlu0 %952  ;;  %v1625_v33 = vmul.f32 %v2877_v30, %v1585_v20  ;;  %v1673_v17 = vsel %vm3361_vm4, %v3276_v12, 0.0  ;;  %v1672_v62 = vsel %vm3361_vm4, %v3254_v35, 0.0  ;;  %v3740_v20 = vld [vmem:[#allocation51_spill] sm:$0xff] }
 0x321   : > { %v1408_v37 = vsel %vm3226_vm2, %v1388_v5, 0.0  ;;  %v1453_v42 = vadd.f32 %v1445_v16, %v1365_v60  ;;  %v1713_v22 = vmul.f32 %v2913_v63, %v1673_v17 }
 0x322   : > { %v1368_v13 = vadd.f32 %v1360_v26, %v1304_v24  ;;  %v1448_v7 = vmul.f32 %v2801_v15, %v1408_v37  ;;  %v1205_v24 = vmul.f32 %v2799_v14, %v1165_v61  ;;  %v1712_v37 = vmul.f32 %v3735_v6, %v1672_v62  ;;  %v3744_v62 = vld [vmem:[#allocation40_spill] sm:$0xff] }
 0x323   : > { %v1542_v10 = vadd.f32 %v1534_v39, %v1453_v42 }
 0x324   : > { %v1456_v31 = vadd.f32 %v1448_v7, %v1368_v13  ;;  %v943_v55 = vpop.permute.xlu1 %942  ;;  %v3353_v4 = vpop.permute.xlu0 %1056  ;;  %v3736_v13 = vld [vmem:[#allocation10_spill] sm:$0xff] }
 0x325   : > { %v965_v32 = vsel %vm3175_vm6, %v943_v55, 0.0  ;;  %v1630_v48 = vadd.f32 %v1622_v9, %v1542_v10  ;;  %v1358_v7 = vmul.f32 %v3736_v13, %v1318_v46  ;;  %v3738_v55 = vld [vmem:[#allocation38_spill] sm:$0xff] }
 0x326   : > { %v1545_v8 = vadd.f32 %v1537_v58, %v1456_v31  ;;  %v1013_v52 = vmul.f32 %v2737_v47, %v965_v32 }
 0x327   : > { %v1718_v36 = vadd.f32 %v1710_v45, %v1630_v48 }
 0x328   : > { %v1047_v3 = vpop.permute.xlu1 %1046  ;;  %v3381_v57 = vpop.permute.xlu0 %1241  ;;  %v1633_v30 = vadd.f32 %v1625_v33, %v1545_v8 }
 0x329   : > { %v1069_v59 = vsel %vm3197_vm1, %v1047_v3, 0.0  ;;  %v1774_v16 = vadd.f32 %v3738_v55, %v1718_v36  ;;  %v3742_v3 = vld [vmem:[#allocation41_spill] sm:$0xff] }
 0x32a   : > { %v1109_v23 = vmul.f32 %v2754_v43, %v1069_v59  ;;  %v1632_v43 = vadd.f32 %v1624_v51, %v3256_v0  ;;  %v1406_v0 = vsel %vm3226_vm2, %v3295_v27, 0.0  ;;  %v1721_v1 = vadd.f32 %v1713_v22, %v1633_v30 }
 0x32b   : > { %v1583_v27 = vsel %vm3355_vm12, %v3314_v38, 0.0  ;;  %v1790_v33 = vmul.f32 0.70710677, %v1774_v16  ;;  %v1782_v13 = vmul.f32 0.5, %v1774_v16 }
 0x32c   : > { %v1117_v26 = vadd.f32 %v1109_v23, %v1013_v52  ;;  %v1232_v47 = vpop.permute.xlu1 %1231  ;;  %v3401_v5 = vpop.permute.xlu0 %1482  ;;  %v1720_v50 = vadd.f32 %v1712_v37, %v1632_v43  ;;  %v1777_v32 = vadd.f32 %v3740_v20, %v1721_v1  ;;  %v1623_v9 = vmul.f32 %v3742_v3, %v1583_v27  ;;  %v3743_v23 = vld [vmem:[#allocation24_spill] sm:$0xff] }
 0x32d   : > { %v1254_v12 = vsel %vm3220_vm13, %v1232_v47, 0.0  ;;  %2327 = verf.f32 %v1790_v33 }
 0x32e   : > { %v1213_v35 = vadd.f32 %v1205_v24, %v1117_v26  ;;  %v1294_v14 = vmul.f32 %v2807_v18, %v1254_v12  ;;  %v1446_v18 = vmul.f32 %v3737_v44, %v1406_v0  ;;  %v1776_v41 = vadd.f32 %v3741_v49, %v1720_v50 }
 0x32f   : > { %v1793_v10 = vmul.f32 0.70710677, %v1777_v32 }
 0x330   : > { %v1302_v60 = vadd.f32 %v1294_v14, %v1213_v35  ;;  %v1473_v2 = vpop.permute.xlu1 %1472  ;;  %v3416_v54 = vpop.permute.xlu0 %948  ;;  %v1792_v45 = vmul.f32 0.70710677, %v1776_v41 }
 0x331   : > { %v1495_v63 = vsel %vm3235_vm7, %v1473_v2, 0.0  ;;  %2329 = verf.f32 %v1793_v10  ;;  %v1785_v2 = vmul.f32 0.5, %v1777_v32  ;;  %v3747_v10 = vld [vmem:[#allocation17_spill] sm:$0xff] }
 0x332   : > { %v1366_v31 = vadd.f32 %v1358_v7, %v1302_v60  ;;  %v1535_v42 = vmul.f32 %v3739_v29, %v1495_v63  ;;  %2331 = verf.f32 %v1792_v45  ;;  %v1784_v63 = vmul.f32 0.5, %v1776_v41 }
 0x334   : > { %v1454_v58 = vadd.f32 %v1446_v18, %v1366_v31  ;;  %v1649_v39 = vpop.permute.xlu1 %1648  ;;  %v1053_v59 = vpop.permute.xlu0 %1052 }
 0x335   : > { %v1671_v8 = vsel %vm3361_vm4, %v1649_v39, 0.0  ;;  %v1072_v49 = vsel %vm3197_vm1, %v1053_v59, 0.0 }
 0x336   : > { %v1543_v61 = vadd.f32 %v1535_v42, %v1454_v58  ;;  %v1711_v51 = vmul.f32 %v3743_v23, %v1671_v8  ;;  %v968_v8 = vsel %vm3175_vm6, %v3416_v54, 0.0  ;;  %v3746_v23 = vld [vmem:[#allocation54_spill] sm:$0xff] }
 0x337   : > { %v2328_v12 = vpop.eup %2327 }
 0x338   : > { %v1631_v52 = vadd.f32 %v1623_v9, %v1543_v61  ;;  %v3432_v38 = vpop.permute.xlu1 %1152  ;;  %v3435_v30 = vpop.permute.xlu0 %1389  ;;  %v1806_v37 = vadd.f32 1.0, %v2328_v12  ;;  %v3745_v9 = vld [vmem:[#allocation8_spill] sm:$0xff] }
 0x339   : > { %v1112_v61 = vmul.f32 %v3745_v9, %v1072_v49  ;;  %v3756_v9 = vld [vmem:[#allocation28_spill] sm:$0xff]  ;;  %v1170_v56 = vsel %vm3189_vm14, %v3432_v38, 0.0  ;;  %v3762_v38 = vld [vmem:[#allocation18_spill] sm:$0xff] }
 0x33a   : > { %v1719_v17 = vadd.f32 %v1711_v51, %v1631_v52  ;;  %v1814_v44 = vmul.f32 %v1806_v37, %v1782_v13  ;;  %v1016_v51 = vmul.f32 %v3746_v23, %v968_v8  ;;  %v3751_v37 = vld [vmem:[#allocation7_spill] sm:$0xff] }
 0x33b   : > { %v2330_v22 = vpop.eup %2329 }
 0x33c   : > { %v1775_v24 = vadd.f32 %v3744_v62, %v1719_v17  ;;  %v3437_v26 = vpop.permute.xlu1 %1393  ;;  %v3439_v48 = vpop.permute.xlu0 %1478  ;;  %v1809_v36 = vadd.f32 1.0, %v2330_v22  ;;  %v1120_v17 = vadd.f32 %v1112_v61, %v1016_v51  ;;  %v3748_v62 = vld [vmem:[#allocation14_spill] sm:$0xff] }
 0x33d   : > { %v2332_v35 = vpop.eup %2331 }
 0x33e   : > { %v1791_v47 = vmul.f32 0.70710677, %v1775_v24  ;;  %v1808_v1 = vadd.f32 1.0, %v2332_v35  ;;  %v1783_v7 = vmul.f32 0.5, %v1775_v24  ;;  %v1817_v31 = vmul.f32 %v1809_v36, %v1785_v2  ;;  %v3750_v35 = vld [vmem:[#allocation27_spill] sm:$0xff] }
 0x340   : > { %2333 = verf.f32 %v1791_v47  ;;  %v1149_v43 = vpop.permute.xlu1 %1148  ;;  %v3441_v14 = vpop.permute.xlu0 %1654  ;;  %v1816_v58 = vmul.f32 %v1808_v1, %v1784_v63 }
 0x341   : > { %v1168_v3 = vsel %vm3189_vm14, %v1149_v43, 0.0  ;;  %v3749_v43 = vld [vmem:[#allocation15_spill] sm:$0xff] }
 0x342   : > { %v1827_v42 = vpack.c.bf16 %v1817_v31, %v1816_v58  ;;  %v1208_v45 = vmul.f32 %v3747_v10, %v1168_v3  ;;  %v1409_v58 = vsel %vm3226_vm2, %v3435_v30, 0.0  ;;  %v970_v30 = vsel %vm3175_vm6, %v3329_v53, 0.0  ;;  %v3758_v10 = vld [vmem:[#allocation9_spill] sm:$0xff] }
 0x344   : > { %v1238_v46 = vpop.permute.xlu1 %1237  ;;  %v1155_v55 = vpop.permute.xlu0 %1154  ;;  %v1216_v22 = vadd.f32 %v1208_v45, %v1120_v17 }
 0x345   : > { %v1257_v33 = vsel %vm3220_vm13, %v1238_v46, 0.0  ;;  %v1321_v46 = vsel %vm3207_vm3, %v3750_v35, 0.0  ;;  %v3763_v35 = vld [vmem:[#allocation37_spill] sm:$0xff] }
 0x346   : > { %v1297_v24 = vmul.f32 %v3748_v62, %v1257_v33 }
 0x348   : > { %v3443_v6 = vpop.permute.xlu1 %1566  ;;  %v3445_v39 = vpop.permute.xlu0 %1395  ;;  %v1305_v13 = vadd.f32 %v1297_v24, %v1216_v22 }
 0x34a   : > { %v2334_v0 = vpop.eup %2333 }
 0x34b   : > { %v1807_v60 = vadd.f32 1.0, %v2334_v0 }
 0x34c   : > { %v955_v50 = vpop.permute.xlu1 %954  ;;  %v1151_v32 = vpop.permute.xlu0 %1150 }
 0x34d   : > { %v1815_v18 = vmul.f32 %v1807_v60, %v1783_v7  ;;  %v971_v54 = vsel %vm3175_vm6, %v955_v50, 0.0  ;;  %v1171_v7 = vsel %vm3189_vm14, %v1155_v55, 0.0  ;;  %v3752_v50 = vld [vmem:[#allocation22_spill] sm:$0xff]  ;;  %v1074_v55 = vsel %vm3197_vm1, %v3353_v4, 0.0 }
 0x34e   : > { %v1019_v36 = vmul.f32 %v3751_v37, %v971_v54  ;;  %v1361_v63 = vmul.f32 %v3752_v50, %v1321_v46  ;;  %v1169_v3 = vsel %vm3189_vm14, %v1151_v32, 0.0  ;;  %v3757_v4 = vld [vmem:[#allocation30_spill] sm:$0xff]  ;;  %v1114_v45 = vmul.f32 %v3758_v10, %v1074_v55  ;;  %v3761_v54 = vld [vmem:[#allocation56_spill] sm:$0xff]  ;;  %v3764_v37 = vld [vmem:[#allocation23_spill] sm:$0xff] }
 0x34f   : > { %v1826_v27 = vpack.c.bf16 %v1815_v18, %v1814_v44  ;;  %v3753_v18 = vld [vmem:[#allocation13_spill] sm:$0xff]  ;;  %v1449_v23 = vmul.f32 %v3757_v4, %v1409_v58  ;;  %v1498_v32 = vsel %vm3235_vm7, %v3439_v48, 0.0  ;;  %v1209_v53 = vmul.f32 %v3760_v34, %v1169_v3  ;;  %v3767_v58 = vld [vmem:[#allocation43_spill] sm:$0xff]  ;;  %v3768_v55 = vld [vmem:[#allocation20_spill] sm:$0xff] }
 0x350   : > { %v1059_v29 = vpop.permute.xlu1 %1058  ;;  %v1240_v52 = vpop.permute.xlu0 %1239  ;;  %v1369_v49 = vadd.f32 %v1361_v63, %v1305_v13  ;;  %v1018_v19 = vmul.f32 %v3761_v54, %v970_v30  ;;  %v1538_v48 = vmul.f32 %v3763_v35, %v1498_v32  ;;  %v1586_v13 = vsel %vm3355_vm12, %v3443_v6, 0.0  ;;  %v3772_v10 = vld [vmem:[#allocation47_spill] sm:$0xff]  ;;  %v3775_v34 = vld [vmem:[#allocation52_spill] sm:$0xff]  ;;  %vm3794_vm14 = vmmov %vm3787_vm0 }
 0x351   : > { %2191 = vmatprep.subr.bf16.mxu1 %v1826_v27  ;;  %v1075_v59 = vsel %vm3197_vm1, %v1059_v29, 0.0  ;;  %v3754_v29 = vld [vmem:[#allocation19_spill] sm:$0xff] }
 0x352   : > { %2192 = vmatpush3.bf16.msra.mxu1 %v1826_v27  ;;  %v1115_v12 = vmul.f32 %v3749_v43, %v1075_v59  ;;  %v3759_v59 = vld [vmem:[#allocation26_spill] sm:$0xff]  ;;  %v1457_v62 = vadd.f32 %v1449_v23, %v1369_v49  ;;  %v1258_v43 = vsel %vm3220_vm13, %v1240_v52, 0.0  ;;  %v1412_v52 = vsel %vm3226_vm2, %v3445_v39, 0.0 }
 0x353   : > { %2193 = vmatprep.subr.bf16.mxu1 %v1827_v42  ;;  %v1324_v17 = vsel %vm3207_vm3, %v3759_v59, 0.0  ;;  %v3769_v49 = vld [vmem:[#allocation42_spill] sm:$0xff]  ;;  %v3773_v59 = vld [vmem:[#allocation31_spill] sm:$0xff] }
 0x354   : > { %v1244_v20 = vpop.permute.xlu1 %1243  ;;  %v3471_v0 = vpop.permute.xlu0 %1570  ;;  %v1123_v60 = vadd.f32 %v1115_v12, %v1019_v36  ;;  %v1364_v36 = vmul.f32 %v3764_v37, %v1324_v17  ;;  %v1452_v39 = vmul.f32 %v3769_v49, %v1412_v52  ;;  %v3780_v52 = vld [vmem:[#allocation55_spill] sm:$0xff] }
 0x355   : > { %v1260_v44 = vsel %vm3220_vm13, %v1244_v20, 0.0 }
 0x356   : > { %2194 = vmatpush3.bf16.msra.mxu1 %v1827_v42  ;;  %v1211_v42 = vmul.f32 %v3754_v29, %v1171_v7  ;;  %v1300_v61 = vmul.f32 %v3756_v9, %v1260_v44  ;;  %v1259_v7 = vsel %vm3220_vm13, %v3381_v57, 0.0  ;;  %v1626_v29 = vmul.f32 %v3767_v58, %v1586_v13 }
 0x357   : > { %v1299_v25 = vmul.f32 %v3768_v55, %v1259_v7  ;;  %v1674_v57 = vsel %vm3361_vm4, %v3441_v14, 0.0  ;;  %v1500_v13 = vsel %vm3235_vm7, %v3401_v5, 0.0  ;;  %v3779_v7 = vld [vmem:[#allocation32_spill] sm:$0xff] }
 0x358   : > { %v3447_v16 = vpop.permute.xlu1 %1484  ;;  %v1219_v20 = vadd.f32 %v1211_v42, %v1123_v60  ;;  %v3494_v33 = vpop.permute.xlu0 %1568  ;;  %v1546_v60 = vadd.f32 %v1538_v48, %v1457_v62 }
 0x35a   : > { %v1308_v12 = vadd.f32 %v1300_v61, %v1219_v20  ;;  %v1634_v3 = vadd.f32 %v1626_v29, %v1546_v60  ;;  %v1501_v20 = vsel %vm3235_vm7, %v3447_v16, 0.0  ;;  %v3770_v61 = vld [vmem:[#allocation21_spill] sm:$0xff] }
 0x35c   : > { %v951_v41 = vpop.permute.xlu1 %950  ;;  %v1372_v44 = vadd.f32 %v1364_v36, %v1308_v12  ;;  %v3778_v12 = vld [vmem:[#allocation50_spill] sm:$0xff]  ;;  %v1587_v36 = vsel %vm3355_vm12, %v3494_v33, 0.0  ;;  %v3782_v33 = vld [vmem:[#allocation39_spill] sm:$0xff] }
 0x35d   : > { %v969_v2 = vsel %vm3175_vm6, %v951_v41, 0.0  ;;  %v3755_v41 = vld [vmem:[#allocation6_spill] sm:$0xff]  ;;  %v1540_v58 = vmul.f32 %v3782_v33, %v1500_v13  ;;  %v3788_v13 = vld [vmem:[#allocation5_spill] sm:$0xff]  ;;  %vm3790_vm6 = vmmov %vm3787_vm0 }
 0x35e   : > { %v1017_v8 = vmul.f32 %v3755_v41, %v969_v2  ;;  %v3765_v2 = vld [vmem:[#allocation16_spill] sm:$0xff]  ;;  %v1460_v23 = vadd.f32 %v1452_v39, %v1372_v44 }
 0x35f   : > { %v1298_v50 = vmul.f32 %v3765_v2, %v1258_v43  ;;  %v1588_v2 = vsel %vm3355_vm12, %v3471_v0, 0.0  ;;  %v3781_v44 = vld [vmem:[#allocation44_spill] sm:$0xff] }
 0x360   : > { %v1055_v47 = vpop.permute.xlu1 %1054 }
 0x361   : > { %v1073_v1 = vsel %vm3197_vm1, %v1055_v47, 0.0  ;;  %v1210_v47 = vmul.f32 %v3762_v38, %v1170_v56  ;;  %v3771_v56 = vld [vmem:[#allocation25_spill] sm:$0xff]  ;;  %vm3795_vm1 = vmmov %vm3787_vm0 }
 0x362   : > { %v1113_v31 = vmul.f32 %v3753_v18, %v1073_v1  ;;  %v1122_v1 = vadd.f32 %v1114_v45, %v1018_v19  ;;  %v3766_v18 = vld [vmem:[#allocation29_spill] sm:$0xff]  ;;  %v1323_v14 = vsel %vm3207_vm3, %v3771_v56, 0.0  ;;  %v1714_v45 = vmul.f32 %v3772_v10, %v1674_v57  ;;  %v3777_v19 = vld [vmem:[#allocation35_spill] sm:$0xff] }
 0x364   : > { %v1573_v27 = vpop.permute.xlu1 %1572  ;;  %v1121_v51 = vadd.f32 %v1113_v31, %v1017_v8  ;;  %v1218_v63 = vadd.f32 %v1210_v47, %v1122_v1  ;;  %v1322_v31 = vsel %vm3207_vm3, %v3766_v18, 0.0  ;;  %v1722_v54 = vadd.f32 %v1714_v45, %v1634_v3  ;;  %v3785_v3 = vld [vmem:[#allocation57_spill] sm:$0xff] }
 0x365   : > { %v1589_v9 = vsel %vm3355_vm12, %v1573_v27, 0.0  ;;  %v1362_v30 = vmul.f32 %v3770_v61, %v1322_v31  ;;  %v3774_v27 = vld [vmem:[#allocation45_spill] sm:$0xff]  ;;  %v1411_v47 = vsel %vm3226_vm2, %v3437_v26, 0.0  ;;  %v1627_v18 = vmul.f32 %v3781_v44, %v1587_v36  ;;  %v3793_v44 = vld [vmem:[#allocation3_spill] sm:$0xff] }
 0x366   : > { %v1217_v46 = vadd.f32 %v1209_v53, %v1121_v51  ;;  %v1307_v4 = vadd.f32 %v1299_v25, %v1218_v63  ;;  %v1541_v62 = vmul.f32 %v3774_v27, %v1501_v20  ;;  %v1629_v53 = vmul.f32 %v3775_v34, %v1589_v9  ;;  %v3784_v25 = vld [vmem:[#allocation48_spill] sm:$0xff]  ;;  %v3786_v9 = vld [vmem:[#allocation53_spill] sm:$0xff] }
 0x367   : > { %v1451_v60 = vmul.f32 %v3779_v7, %v1411_v47  ;;  %v1778_v40 = vadd.f32 %v3780_v52, %v1722_v54 }
 0x368   : > { %v1392_v24 = vpop.permute.xlu1 %1391  ;;  %v1306_v6 = vadd.f32 %v1298_v50, %v1217_v46  ;;  %v1549_v43 = vadd.f32 %v1541_v62, %v1460_v23 }
 0x369   : > { %v3515_v22 = vpop.permute.xlu0 %1766  ;;  %v1410_v41 = vsel %vm3226_vm2, %v1392_v24, 0.0  ;;  %v3776_v24 = vld [vmem:[#allocation33_spill] sm:$0xff]  ;;  %v1794_v5 = vmul.f32 0.70710677, %v1778_v40 }
 0x36a   : > { %v1370_v32 = vadd.f32 %v1362_v30, %v1306_v6  ;;  %v1450_v17 = vmul.f32 %v3773_v59, %v1410_v41  ;;  %v1363_v28 = vmul.f32 %v3776_v24, %v1323_v14  ;;  %v1637_v1 = vadd.f32 %v1629_v53, %v1549_v43  ;;  %v3783_v6 = vld [vmem:[#allocation46_spill] sm:$0xff] }
 0x36b   : > { %2335 = verf.f32 %v1794_v5 }
 0x36c   : > { %v1481_v42 = vpop.permute.xlu1 %1480  ;;  %v1371_v48 = vadd.f32 %v1363_v28, %v1307_v4  ;;  %v1458_v46 = vadd.f32 %v1450_v17, %v1370_v32  ;;  %v1786_v32 = vmul.f32 0.5, %v1778_v40  ;;  %v3789_v40 = vld [vmem:[#allocation2_spill] sm:$0xff] }
 0x36d   : > { %v1661_v8 = vpop.permute.xlu0 %1660  ;;  %v1499_v51 = vsel %vm3235_vm7, %v1481_v42, 0.0  ;;  %v1628_v42 = vmul.f32 %v3783_v6, %v1588_v2 }
 0x36e   : > { %v1677_v16 = vsel %vm3361_vm4, %v1661_v8, 0.0  ;;  %v1539_v38 = vmul.f32 %v3777_v19, %v1499_v51  ;;  %v1459_v63 = vadd.f32 %v1451_v60, %v1371_v48 }
 0x36f   : > { %v1717_v35 = vmul.f32 %v3778_v12, %v1677_v16 }
 0x370   : > { %v1547_v26 = vadd.f32 %v1539_v38, %v1458_v46  ;;  %v1548_v49 = vadd.f32 %v1540_v58, %v1459_v63  ;;  %v2308_v38 = vld [vmem:[%s3344_s26 + $0x8] sm:$0xff]  }
 0x371   : > { %v1725_v50 = vadd.f32 %v1717_v35, %v1637_v1  ;;  %v1842_v43 = vpop.permute.xlu0 %1841 }
 0x372   : > { %v1635_v55 = vadd.f32 %v1627_v18, %v1547_v26  ;;  %v1636_v8 = vadd.f32 %v1628_v42, %v1548_v49 }
 0x375   : > { %v2336_v23 = vpop.eup %2335 }
 0x376   : > { %v1810_v10 = vadd.f32 1.0, %v2336_v23 }
 0x378   : > { %v1818_v16 = vmul.f32 %v1810_v10, %v1786_v32 }
 0x37d   : > { %v1772_v37 = vpop.permute.xlu1 %1771 }
 0x37e   : > { %v1781_v29 = vadd.f32 %v1772_v37, %v1725_v50  ;;  %v1852_v37 = vpop.permute.xlu0 %1851  ;;  %v3791_v50 = vld [vmem:[#allocation4_spill] sm:$0xff] }
 0x380   : > { %v1797_v39 = vmul.f32 0.70710677, %v1781_v29  ;;  %v1789_v34 = vmul.f32 0.5, %v1781_v29 }
 0x381   : > { %v1657_v31 = vpop.permute.xlu1 %1656 }
 0x382   : > { %v1675_v11 = vsel %vm3361_vm4, %v1657_v31, 0.0  ;;  %2337 = verf.f32 %v1797_v39 }
 0x383   : > { %v1715_v57 = vmul.f32 %v3784_v25, %v1675_v11 }
 0x385   : > { %v1723_v15 = vadd.f32 %v1715_v57, %v1635_v55  ;;  %v1659_v0 = vpop.permute.xlu1 %1658 }
 0x386   : > { %v1676_v41 = vsel %vm3361_vm4, %v1659_v0, 0.0 }
 0x387   : > { %v1779_v20 = vadd.f32 %v3785_v3, %v1723_v15  ;;  %v1716_v61 = vmul.f32 %v3786_v9, %v1676_v41 }
 0x389   : > { %v1795_v30 = vmul.f32 0.70710677, %v1779_v20  ;;  %v1724_v56 = vadd.f32 %v1716_v61, %v1636_v8  ;;  %v1787_v21 = vmul.f32 0.5, %v1779_v20  ;;  %v1837_v47 = vpop.permute.xlu1 %1836 }
 0x38b   : > { %2339 = verf.f32 %v1795_v30  ;;  %v1780_v14 = vadd.f32 %v3515_v22, %v1724_v56 }
 0x38c   : > { %v2338_v51 = vpop.eup %2337 }
 0x38d   : > { %v1796_v4 = vmul.f32 0.70710677, %v1780_v14  ;;  %v1813_v17 = vadd.f32 1.0, %v2338_v51  ;;  %v1788_v53 = vmul.f32 0.5, %v1780_v14  ;;  %v1847_v12 = vpop.permute.xlu1 %1846 }
 0x38f   : > { %2341 = verf.f32 %v1796_v4  ;;  %v1821_v54 = vmul.f32 %v1813_v17, %v1789_v34 }
 0x395   : > { %v2340_v45 = vpop.eup %2339 }
 0x396   : > { %v1811_v59 = vadd.f32 1.0, %v2340_v45 }
 0x398   : > { %v1819_v27 = vmul.f32 %v1811_v59, %v1787_v21 }
 0x399   : > { %v2342_v62 = vpop.eup %2341 }
 0x39a   : > { %v1828_v24 = vpack.c.bf16 %v1819_v27, %v1818_v16  ;;  %v1812_v28 = vadd.f32 1.0, %v2342_v62 }
 0x39c   : > { %2195 = vmatprep.subr.bf16.mxu1 %v1828_v24  ;;  %v1820_v22 = vmul.f32 %v1812_v28, %v1788_v53 }
 0x39d   : > { %2196 = vmatpush3.bf16.msra.mxu1 %v1828_v24 }
 0x39e   : > { %v1829_v19 = vpack.c.bf16 %v1821_v54, %v1820_v22 }
 0x3a0   : > { %2197 = vmatprep.subr.bf16.mxu1 %v1829_v19 }
 0x3a1   : > { %2198 = vmatpush3.bf16.msra.mxu1 %v1829_v19 }
 0x3a4   : > { %2200 = vmatmul.mubr.msk.bf16.vlgmr.msra.gmra.mrb[0].mxu1 %vm3787_vm0, %v2308_v38 }
 0x477   : > { %v2201_v35 = vpop.f32.mrb[0].mxu1 }
 0x478   : > { %v1913_v48 = vadd.f32 %v2201_v35, %v1847_v12  ;;  %v1904_v46 = vpop.f32.mrb[1].mxu1 }
 0x479   : > { %v1905_v36 = vadd.f32 %v1904_v46, %v1837_v47  ;;  %v2202_v1 = vpop.f32.mrb[2].mxu1 }
 0x47a   : > { %v1921_v7 = vadd.f32 %v1913_v48, %v3788_v13  ;;  %v1916_v60 = vadd.f32 %v2202_v1, %v1852_v37  ;;  %v1907_v52 = vpop.f32.mrb[3].mxu1 }
 0x47b   : > { %v1919_v26 = vadd.f32 %v1905_v36, %v3789_v40  ;;  %v1908_v2 = vadd.f32 %v1907_v52, %v1842_v43 }
 0x47c   : > { %1925 = vst.msk [vmem:[%s555_s11 + $0x10] sm:$0xff] %vm3790_vm6, %v1921_v7  ;;  %v1922_v63 = vadd.f32 %v1916_v60, %v3791_v50 }
 0x47d   : > { %1923 = vst.msk [vmem:[%s555_s11] sm:$0xff] %vm3792_vm10, %v1919_v26  ;;  %v1920_v18 = vadd.f32 %v1908_v2, %v3793_v44 }
 0x47e   : > { %1926 = vst.msk [vmem:[%s555_s11 + $0x18] sm:$0xff] %vm3794_vm14, %v1922_v63 }
 0x47f   : > { %1924 = vst.msk [vmem:[%s555_s11 + $0x8] sm:$0xff] %vm3795_vm1, %v1920_v18 }
 0x480 PF: > { %s20_s17 = sadd.s32 1, %s2381_s17   ;;  %s3796_s13 = smov %s2373_s15 }
 0x481   : > { %p17_p7 = scmp.ge.s32.totalorder %s20_s17, 6   ;;  %s3797_s14 = smov %s2377_s16 }
 0x482   : > { %s3798_s15 = smov %s3801_s18  ;;  %s3799_s16 = smov %s3805_s19 }
 0x483   :  { %19 = sbr.rel (!%p17_p7) target bundleno = 3 (0x3), region = 114 }

</bundles_post_ra>
